<compile_context>
chip_gen: v5e
topology: v5e:2x2
jax: 0.10.0
libtpu: 0.0.40
codegen_flags: <defaults>
</compile_context>

<pallas_src>
import jax
import jax.numpy as jnp
from jax.experimental import pallas as pl
from jax.experimental.pallas import tpu as pltpu


def pointnet_kernel(x_ref, w1_ref, b1_ref, w2_ref, b2_ref, w3_ref, b3_ref,
                    w4_ref, b4_ref, w5_ref, b5_ref, w6_ref, b6_ref,
                    out_ref, pool_ref):
    c = pl.program_id(1)                                    # point-chunk index

    bt, n, _ = x_ref.shape
    x = x_ref[...].reshape(bt * n, 3)                       # (M, 3) f32

    # Layer 1 (3 -> 64) on the VPU: K=3 would waste 125/128 of the MXU
    # contraction dimension, three broadcast FMAs are effectively free.
    w1 = w1_ref[...]
    h = (x[:, 0:1] * w1[0:1, :]
         + x[:, 1:2] * w1[1:2, :]
         + x[:, 2:3] * w1[2:3, :]
         + b1_ref[...])                                     # (M, 64) f32
    h = jnp.maximum(h, 0.0)

    # Layer 2 (64 -> 128): MXU, bf16 operands, f32 accumulation.  The ReLU
    # must stay here -- it feeds the layer-3 matmul.
    h = jnp.dot(h.astype(jnp.bfloat16), w2_ref[...],
                preferred_element_type=jnp.float32) + b2_ref[...]
    h = jnp.maximum(h, 0.0)                                 # (M, 128)

    # Layer 3 (128 -> 1024): bias-add and final ReLU are hoisted past the
    # max-pool (valid: b3 is point-invariant and ReLU is monotone), so the
    # only per-point work on the (M, 1024) slab is the matmul + pool.
    h = jnp.dot(h.astype(jnp.bfloat16), w3_ref[...],
                preferred_element_type=jnp.float32)         # (M, 1024) f32

    chunk_max = jnp.max(h.reshape(bt, n, 1024), axis=1)     # (bt, 1024)

    @pl.when(c == 0)
    def _():
        pool_ref[...] = jnp.full(pool_ref.shape, -jnp.inf, pool_ref.dtype)

    pool_ref[...] = jnp.maximum(pool_ref[...], chunk_max)

    # Fused classifier head (runs once per batch tile, on the last chunk).
    @pl.when(c == pl.num_programs(1) - 1)
    def _():
        g = jnp.maximum(pool_ref[...] + b3_ref[...], 0.0)   # hoisted b3 + ReLU
        g = jnp.dot(g.astype(jnp.bfloat16), w4_ref[...],
                    preferred_element_type=jnp.float32) + b4_ref[...]
        g = jnp.dot(g.astype(jnp.bfloat16), w5_ref[...],
                    preferred_element_type=jnp.float32) + b5_ref[...]
        # w6/b6 are zero-padded to 128 output lanes -> lane-dense store.
        out_ref[...] = jnp.dot(g.astype(jnp.bfloat16), w6_ref[...],
                               preferred_element_type=jnp.float32) + b6_ref[...]


def _vmem_capacity_bytes():
    """Best-effort per-core VMEM query; conservative (v7x-sized) fallback."""
    try:
        info = pltpu.get_tpu_info()
        for attr in ("vmem_capacity_bytes", "vmem_size_bytes", "vmem_bytes"):
            v = getattr(info, attr, None)
            if v:
                return int(v)
    except Exception:
        pass
    return 64 * 2 ** 20


def init_params(key):
    """Deterministic PyTorch-Linear-style init (uniform +-1/sqrt(fan_in))."""
    dims = [(3, 64), (64, 128), (128, 1024), (1024, 512), (512, 256), (256, 5)]
    params = []
    for i, (fan_in, fan_out) in enumerate(dims):
        kw, kb = jax.random.split(jax.random.fold_in(key, i))
        bound = 1.0 / float(fan_in) ** 0.5
        w = jax.random.uniform(kw, (fan_in, fan_out), jnp.float32, -bound, bound)
        b = jax.random.uniform(kb, (1, fan_out), jnp.float32, -bound, bound)
        params += [w, b]
    return tuple(params)


def pointnet_forward(x, params, *, max_rows_per_tile=None, vmem_limit_bytes=None):
    w1, b1, w2, b2, w3, b3, w4, b4, w5, b5, w6, b6 = params
    B, N, _ = x.shape
    num_cls = w6.shape[1]

    # Generation-aware budgets: v7x has 64 MiB VMEM per TensorCore (keep the
    # activation slab <= ~4K rows and scoped VMEM <= 40 MiB); v5e/v6e have
    # 128 MiB (8K-row tiles amortize the ~0.35 us/step pipeline overhead).
    big_vmem = _vmem_capacity_bytes() >= 100 * 2 ** 20
    if max_rows_per_tile is None:
        max_rows_per_tile = 8192 if big_vmem else 4096
    if vmem_limit_bytes is None:
        vmem_limit_bytes = (64 if big_vmem else 40) * 2 ** 20

    # ---- batch tiling -----------------------------------------------------
    # Harden awkward batch sizes: if even a minimal 8-point chunk cannot fit
    # the whole batch in one tile, pad B to a multiple of 8 (duplicate cloud
    # 0; sliced off at the end) so multiple-of-8 batch tiles exist.
    Bp = B
    if B % 8 != 0 and B * 8 > max_rows_per_tile:
        Bp = -(-B // 8) * 8
        x = jnp.concatenate(
            [x, jnp.broadcast_to(x[:1], (Bp - B, N, 3))], axis=0)

    divisors = [d for d in range(1, Bp + 1) if Bp % d == 0]
    # Valid tiles keep the (8,128) tiling of the pooled/output blocks.
    valid = [d for d in divisors if d % 8 == 0 or d == Bp]
    capped = [d for d in valid if d * 8 <= max_rows_per_tile] or [min(valid)]
    # Prefer >=2 batch tiles so dimension_semantics=("parallel",...) can keep
    # both v7x TensorCores busy; otherwise take the largest tile.
    multi = [d for d in capped if d < Bp]
    bt = max(multi) if multi else max(capped)

    # ---- point chunking (accumulator axis) --------------------------------
    # Peak VMEM is chunk-bound: ~ bt*chunk * (512 B padded input + ~5 KiB f32
    # activations) + ~4 MiB of double-buffered weights.
    Np = -(-N // 8) * 8
    chunk = min(Np, max(8, (max_rows_per_tile // bt) // 8 * 8))
    Np = -(-Np // chunk) * chunk
    if Np != N:
        # Duplicate the first point: max-pool over raw layer-3 outputs is
        # invariant to duplicated points.
        x = jnp.concatenate(
            [x, jnp.broadcast_to(x[:, :1, :], (Bp, Np - N, 3))], axis=1)
    num_chunks = Np // chunk

    # bf16 weights on the MXU path; biases and the tiny layer-1 weight stay
    # f32 (f32 accumulation happens inside the kernel).
    w2b = w2.astype(jnp.bfloat16)
    w3b = w3.astype(jnp.bfloat16)
    w4b = w4.astype(jnp.bfloat16)
    w5b = w5.astype(jnp.bfloat16)
    w6b = (jnp.zeros((w6.shape[0], 128), jnp.float32)
           .at[:, :num_cls].set(w6).astype(jnp.bfloat16))
    b6p = jnp.zeros((1, 128), jnp.float32).at[:, :num_cls].set(b6)

    const = lambda i, c: (0, 0)

    out_padded = pl.pallas_call(
        pointnet_kernel,
        out_shape=jax.ShapeDtypeStruct((Bp, 128), jnp.float32),
        grid=(Bp // bt, num_chunks),
        in_specs=[
            pl.BlockSpec((bt, chunk, 3), lambda i, c: (i, c, 0)),
            pl.BlockSpec((3, 64), const),
            pl.BlockSpec((1, 64), const),
            pl.BlockSpec((64, 128), const),
            pl.BlockSpec((1, 128), const),
            pl.BlockSpec((128, 1024), const),
            pl.BlockSpec((1, 1024), const),
            pl.BlockSpec((1024, 512), const),
            pl.BlockSpec((1, 512), const),
            pl.BlockSpec((512, 256), const),
            pl.BlockSpec((1, 256), const),
            pl.BlockSpec((256, 128), const),
            pl.BlockSpec((1, 128), const),
        ],
        out_specs=pl.BlockSpec((bt, 128), lambda i, c: (i, 0)),
        scratch_shapes=[pltpu.VMEM((bt, 1024), jnp.float32)],
        compiler_params=pltpu.CompilerParams(
            dimension_semantics=("parallel", "arbitrary"),
            vmem_limit_bytes=vmem_limit_bytes,
        ),
    )(x, w1, b1, w2b, b2, w3b, b3, w4b, b4, w5b, b5, w6b, b6p)

    return out_padded[:B, :num_cls]


def pointnet_ref(x, params):
    """Pure-JAX f32 reference (mirrors the PyTorch module)."""
    w1, b1, w2, b2, w3, b3, w4, b4, w5, b5, w6, b6 = params
    h = jax.nn.relu(x @ w1 + b1)
    h = jax.nn.relu(h @ w2 + b2)
    h = jax.nn.relu(h @ w3 + b3)
    g = jnp.max(h, axis=1)          # (B, 1024)
    g = g @ w4 + b4
    g = g @ w5 + b5
    g = g @ w6 + b6
    return g


if __name__ == "__main__":
    key = jax.random.PRNGKey(0)
    kx, kp = jax.random.split(key)

    B, N = 2, 16                    # batch of 2 point clouds, 16 points each
    x = jax.random.normal(kx, (B, N, 3), dtype=jnp.float32)
    params = init_params(kp)

    fwd = jax.jit(pointnet_forward)
    out = jax.block_until_ready(fwd(x, params))

    ref = pointnet_ref(x, params)
    assert out.shape == (B, 5), out.shape
    # bf16 MXU operands with f32 accumulation -> loosened tolerance vs the
    # pure-f32 reference.
    assert jnp.allclose(out, ref, atol=2e-2, rtol=2e-2), (out, ref)

    print("KERNEL_OK")
</pallas_src>

<mosaic_0001>
module attributes {stable_mosaic.version = 11 : i64} {
  func.func @pointnet_kernel(%arg0: i32, %arg1: i32, %arg2: memref<2x16x3xf32, #tpu.memory_space<vmem>>, %arg3: memref<3x64xf32, #tpu.memory_space<vmem>>, %arg4: memref<1x64xf32, #tpu.memory_space<vmem>>, %arg5: memref<64x128xbf16, #tpu.memory_space<vmem>>, %arg6: memref<1x128xf32, #tpu.memory_space<vmem>>, %arg7: memref<128x1024xbf16, #tpu.memory_space<vmem>>, %arg8: memref<1x1024xf32, #tpu.memory_space<vmem>>, %arg9: memref<1024x512xbf16, #tpu.memory_space<vmem>>, %arg10: memref<1x512xf32, #tpu.memory_space<vmem>>, %arg11: memref<512x256xbf16, #tpu.memory_space<vmem>>, %arg12: memref<1x256xf32, #tpu.memory_space<vmem>>, %arg13: memref<256x128xbf16, #tpu.memory_space<vmem>>, %arg14: memref<1x128xf32, #tpu.memory_space<vmem>>, %arg15: memref<2x128xf32, #tpu.memory_space<vmem>>, %arg16: memref<2x1024xf32, #tpu.memory_space<vmem>>) attributes {dimension_semantics = [#tpu.dimension_semantics<parallel>, #tpu.dimension_semantics<arbitrary>], iteration_bounds = array<i64: 1, 1>, scalar_prefetch = 0 : i64, scratch_operands = 1 : i64, tpu.core_type = #tpu.core_type<tc>, window_params = [{transform_indices = @transform_0, window_bounds = array<i64: 2, 16, 3>}, {pipeline_mode = #tpu.pipeline_mode<synchronous>, transform_indices = @transform_1, window_bounds = array<i64: 3, 64>}, {pipeline_mode = #tpu.pipeline_mode<synchronous>, transform_indices = @transform_2, window_bounds = array<i64: 1, 64>}, {pipeline_mode = #tpu.pipeline_mode<synchronous>, transform_indices = @transform_3, window_bounds = array<i64: 64, 128>}, {pipeline_mode = #tpu.pipeline_mode<synchronous>, transform_indices = @transform_4, window_bounds = array<i64: 1, 128>}, {pipeline_mode = #tpu.pipeline_mode<synchronous>, transform_indices = @transform_5, window_bounds = array<i64: 128, 1024>}, {pipeline_mode = #tpu.pipeline_mode<synchronous>, transform_indices = @transform_6, window_bounds = array<i64: 1, 1024>}, {pipeline_mode = #tpu.pipeline_mode<synchronous>, transform_indices = @transform_7, window_bounds = array<i64: 1024, 512>}, {pipeline_mode = #tpu.pipeline_mode<synchronous>, transform_indices = @transform_8, window_bounds = array<i64: 1, 512>}, {pipeline_mode = #tpu.pipeline_mode<synchronous>, transform_indices = @transform_9, window_bounds = array<i64: 512, 256>}, {pipeline_mode = #tpu.pipeline_mode<synchronous>, transform_indices = @transform_10, window_bounds = array<i64: 1, 256>}, {pipeline_mode = #tpu.pipeline_mode<synchronous>, transform_indices = @transform_11, window_bounds = array<i64: 256, 128>}, {pipeline_mode = #tpu.pipeline_mode<synchronous>, transform_indices = @transform_12, window_bounds = array<i64: 1, 128>}, {transform_indices = @transform_13, window_bounds = array<i64: 2, 128>}]} {
    %c0 = arith.constant 0 : index
    %c0_0 = arith.constant 0 : index
    %c0_1 = arith.constant 0 : index
    %0 = vector.load %arg2[%c0, %c0_0, %c0_1] : memref<2x16x3xf32, #tpu.memory_space<vmem>>, vector<2x16x3xf32>
    %1 = vector.shape_cast %0 : vector<2x16x3xf32> to vector<32x3xf32>
    %c0_2 = arith.constant 0 : index
    %c0_3 = arith.constant 0 : index
    %2 = vector.load %arg3[%c0_2, %c0_3] : memref<3x64xf32, #tpu.memory_space<vmem>>, vector<3x64xf32>
    %3 = vector.extract_strided_slice %1 {offsets = [0, 0], sizes = [32, 1], strides = [1, 1]} : vector<32x3xf32> to vector<32x1xf32>
    %4 = vector.extract_strided_slice %2 {offsets = [0, 0], sizes = [1, 64], strides = [1, 1]} : vector<3x64xf32> to vector<1x64xf32>
    %5 = vector.broadcast %3 : vector<32x1xf32> to vector<32x64xf32>
    %6 = vector.broadcast %4 : vector<1x64xf32> to vector<32x64xf32>
    %7 = arith.mulf %5, %6 : vector<32x64xf32>
    %8 = vector.extract_strided_slice %1 {offsets = [0, 1], sizes = [32, 1], strides = [1, 1]} : vector<32x3xf32> to vector<32x1xf32>
    %9 = vector.extract_strided_slice %2 {offsets = [1, 0], sizes = [1, 64], strides = [1, 1]} : vector<3x64xf32> to vector<1x64xf32>
    %10 = vector.broadcast %8 : vector<32x1xf32> to vector<32x64xf32>
    %11 = vector.broadcast %9 : vector<1x64xf32> to vector<32x64xf32>
    %12 = arith.mulf %10, %11 : vector<32x64xf32>
    %13 = arith.addf %7, %12 : vector<32x64xf32>
    %14 = vector.extract_strided_slice %1 {offsets = [0, 2], sizes = [32, 1], strides = [1, 1]} : vector<32x3xf32> to vector<32x1xf32>
    %15 = vector.extract_strided_slice %2 {offsets = [2, 0], sizes = [1, 64], strides = [1, 1]} : vector<3x64xf32> to vector<1x64xf32>
    %16 = vector.broadcast %14 : vector<32x1xf32> to vector<32x64xf32>
    %17 = vector.broadcast %15 : vector<1x64xf32> to vector<32x64xf32>
    %18 = arith.mulf %16, %17 : vector<32x64xf32>
    %19 = arith.addf %13, %18 : vector<32x64xf32>
    %c0_4 = arith.constant 0 : index
    %c0_5 = arith.constant 0 : index
    %20 = vector.load %arg4[%c0_4, %c0_5] : memref<1x64xf32, #tpu.memory_space<vmem>>, vector<1x64xf32>
    %21 = vector.broadcast %20 : vector<1x64xf32> to vector<32x64xf32>
    %22 = arith.addf %19, %21 : vector<32x64xf32>
    %cst = arith.constant 0.000000e+00 : f32
    %23 = vector.broadcast %cst : f32 to vector<32x64xf32>
    %24 = arith.maximumf %22, %23 : vector<32x64xf32>
    %25 = arith.truncf %24 : vector<32x64xf32> to vector<32x64xbf16>
    %c0_6 = arith.constant 0 : index
    %c0_7 = arith.constant 0 : index
    %26 = vector.load %arg5[%c0_6, %c0_7] : memref<64x128xbf16, #tpu.memory_space<vmem>>, vector<64x128xbf16>
    %cst_8 = arith.constant dense<0.000000e+00> : vector<32x128xf32>
    %27 = tpu.matmul %25, %26, %cst_8 {dimension_numbers = #tpu.dot_dimension_numbers<[1], [0], [0], [1], [0, 0, 1, 1], [], []>} : vector<32x64xbf16>, vector<64x128xbf16>, vector<32x128xf32> -> vector<32x128xf32>
    %c0_9 = arith.constant 0 : index
    %c0_10 = arith.constant 0 : index
    %28 = vector.load %arg6[%c0_9, %c0_10] : memref<1x128xf32, #tpu.memory_space<vmem>>, vector<1x128xf32>
    %29 = vector.broadcast %28 : vector<1x128xf32> to vector<32x128xf32>
    %30 = arith.addf %27, %29 : vector<32x128xf32>
    %cst_11 = arith.constant 0.000000e+00 : f32
    %31 = vector.broadcast %cst_11 : f32 to vector<32x128xf32>
    %32 = arith.maximumf %30, %31 : vector<32x128xf32>
    %33 = arith.truncf %32 : vector<32x128xf32> to vector<32x128xbf16>
    %c0_12 = arith.constant 0 : index
    %c0_13 = arith.constant 0 : index
    %34 = vector.load %arg7[%c0_12, %c0_13] : memref<128x1024xbf16, #tpu.memory_space<vmem>>, vector<128x1024xbf16>
    %cst_14 = arith.constant dense<0.000000e+00> : vector<32x1024xf32>
    %35 = tpu.matmul %33, %34, %cst_14 {dimension_numbers = #tpu.dot_dimension_numbers<[1], [0], [0], [1], [0, 0, 1, 1], [], []>} : vector<32x128xbf16>, vector<128x1024xbf16>, vector<32x1024xf32> -> vector<32x1024xf32>
    %36 = vector.shape_cast %35 : vector<32x1024xf32> to vector<2x16x1024xf32>
    %cst_15 = arith.constant dense<0xFF800000> : vector<2x1024xf32>
    %37 = vector.multi_reduction <maximumf>, %36, %cst_15 [1] : vector<2x16x1024xf32> to vector<2x1024xf32>
    %c0_i32 = arith.constant 0 : i32
    %38 = arith.cmpi eq, %arg1, %c0_i32 : i32
    %39 = arith.extui %38 : i1 to i32
    %c0_i32_16 = arith.constant 0 : i32
    %40 = arith.cmpi ne, %39, %c0_i32_16 : i32
    scf.if %40 {
      %cst_23 = arith.constant 0xFF800000 : f32
      %47 = vector.broadcast %cst_23 : f32 to vector<2x1024xf32>
      %c0_24 = arith.constant 0 : index
      %c0_25 = arith.constant 0 : index
      %48 = vector.load %arg16[%c0_24, %c0_25] : memref<2x1024xf32, #tpu.memory_space<vmem>>, vector<2x1024xf32>
      tpu.vector_store %arg16[%c0_24, %c0_25], %47 {strides = array<i32>} : memref<2x1024xf32, #tpu.memory_space<vmem>>, vector<2x1024xf32>,
    } else {
    }
    %c0_17 = arith.constant 0 : index
    %c0_18 = arith.constant 0 : index
    %41 = vector.load %arg16[%c0_17, %c0_18] : memref<2x1024xf32, #tpu.memory_space<vmem>>, vector<2x1024xf32>
    %42 = arith.maximumf %41, %37 : vector<2x1024xf32>
    %c0_19 = arith.constant 0 : index
    %c0_20 = arith.constant 0 : index
    %43 = vector.load %arg16[%c0_19, %c0_20] : memref<2x1024xf32, #tpu.memory_space<vmem>>, vector<2x1024xf32>
    tpu.vector_store %arg16[%c0_19, %c0_20], %42 {strides = array<i32>} : memref<2x1024xf32, #tpu.memory_space<vmem>>, vector<2x1024xf32>,
    %c0_i32_21 = arith.constant 0 : i32
    %44 = arith.cmpi eq, %arg1, %c0_i32_21 : i32
    %45 = arith.extui %44 : i1 to i32
    %c0_i32_22 = arith.constant 0 : i32
    %46 = arith.cmpi ne, %45, %c0_i32_22 : i32
    scf.if %46 {
      %c0_23 = arith.constant 0 : index
      %c0_24 = arith.constant 0 : index
      %47 = vector.load %arg16[%c0_23, %c0_24] : memref<2x1024xf32, #tpu.memory_space<vmem>>, vector<2x1024xf32>
      %c0_25 = arith.constant 0 : index
      %c0_26 = arith.constant 0 : index
      %48 = vector.load %arg8[%c0_25, %c0_26] : memref<1x1024xf32, #tpu.memory_space<vmem>>, vector<1x1024xf32>
      %49 = vector.broadcast %48 : vector<1x1024xf32> to vector<2x1024xf32>
      %50 = arith.addf %47, %49 : vector<2x1024xf32>
      %cst_27 = arith.constant 0.000000e+00 : f32
      %51 = vector.broadcast %cst_27 : f32 to vector<2x1024xf32>
      %52 = arith.maximumf %50, %51 : vector<2x1024xf32>
      %53 = arith.truncf %52 : vector<2x1024xf32> to vector<2x1024xbf16>
      %c0_28 = arith.constant 0 : index
      %c0_29 = arith.constant 0 : index
      %54 = vector.load %arg9[%c0_28, %c0_29] : memref<1024x512xbf16, #tpu.memory_space<vmem>>, vector<1024x512xbf16>
      %cst_30 = arith.constant dense<0.000000e+00> : vector<2x512xf32>
      %55 = tpu.matmul %53, %54, %cst_30 {dimension_numbers = #tpu.dot_dimension_numbers<[1], [0], [0], [1], [0, 0, 1, 1], [], []>} : vector<2x1024xbf16>, vector<1024x512xbf16>, vector<2x512xf32> -> vector<2x512xf32>
      %c0_31 = arith.constant 0 : index
      %c0_32 = arith.constant 0 : index
      %56 = vector.load %arg10[%c0_31, %c0_32] : memref<1x512xf32, #tpu.memory_space<vmem>>, vector<1x512xf32>
      %57 = vector.broadcast %56 : vector<1x512xf32> to vector<2x512xf32>
      %58 = arith.addf %55, %57 : vector<2x512xf32>
      %59 = arith.truncf %58 : vector<2x512xf32> to vector<2x512xbf16>
      %c0_33 = arith.constant 0 : index
      %c0_34 = arith.constant 0 : index
      %60 = vector.load %arg11[%c0_33, %c0_34] : memref<512x256xbf16, #tpu.memory_space<vmem>>, vector<512x256xbf16>
      %cst_35 = arith.constant dense<0.000000e+00> : vector<2x256xf32>
      %61 = tpu.matmul %59, %60, %cst_35 {dimension_numbers = #tpu.dot_dimension_numbers<[1], [0], [0], [1], [0, 0, 1, 1], [], []>} : vector<2x512xbf16>, vector<512x256xbf16>, vector<2x256xf32> -> vector<2x256xf32>
      %c0_36 = arith.constant 0 : index
      %c0_37 = arith.constant 0 : index
      %62 = vector.load %arg12[%c0_36, %c0_37] : memref<1x256xf32, #tpu.memory_space<vmem>>, vector<1x256xf32>
      %63 = vector.broadcast %62 : vector<1x256xf32> to vector<2x256xf32>
      %64 = arith.addf %61, %63 : vector<2x256xf32>
      %65 = arith.truncf %64 : vector<2x256xf32> to vector<2x256xbf16>
      %c0_38 = arith.constant 0 : index
      %c0_39 = arith.constant 0 : index
      %66 = vector.load %arg13[%c0_38, %c0_39] : memref<256x128xbf16, #tpu.memory_space<vmem>>, vector<256x128xbf16>
      %cst_40 = arith.constant dense<0.000000e+00> : vector<2x128xf32>
      %67 = tpu.matmul %65, %66, %cst_40 {dimension_numbers = #tpu.dot_dimension_numbers<[1], [0], [0], [1], [0, 0, 1, 1], [], []>} : vector<2x256xbf16>, vector<256x128xbf16>, vector<2x128xf32> -> vector<2x128xf32>
      %c0_41 = arith.constant 0 : index
      %c0_42 = arith.constant 0 : index
      %68 = vector.load %arg14[%c0_41, %c0_42] : memref<1x128xf32, #tpu.memory_space<vmem>>, vector<1x128xf32>
      %69 = vector.broadcast %68 : vector<1x128xf32> to vector<2x128xf32>
      %70 = arith.addf %67, %69 : vector<2x128xf32>
      %c0_43 = arith.constant 0 : index
      %c0_44 = arith.constant 0 : index
      %71 = vector.load %arg15[%c0_43, %c0_44] : memref<2x128xf32, #tpu.memory_space<vmem>>, vector<2x128xf32>
      tpu.vector_store %arg15[%c0_43, %c0_44], %70 {strides = array<i32>} : memref<2x128xf32, #tpu.memory_space<vmem>>, vector<2x128xf32>,
    } else {
    }
    return
  }
  func.func @transform_0(%arg0: i32, %arg1: i32) -> (i32, i32, i32) {
    %c0_i32 = arith.constant 0 : i32
    %c0_i32_0 = arith.constant 0 : i32
    return %arg0, %arg1, %c0_i32 : i32, i32, i32
  }
  func.func @transform_1(%arg0: i32, %arg1: i32) -> (i32, i32) {
    %c0_i32 = arith.constant 0 : i32
    %c0_i32_0 = arith.constant 0 : i32
    %c0_i32_1 = arith.constant 0 : i32
    return %c0_i32, %c0_i32_0 : i32, i32
  }
  func.func @transform_2(%arg0: i32, %arg1: i32) -> (i32, i32) {
    %c0_i32 = arith.constant 0 : i32
    %c0_i32_0 = arith.constant 0 : i32
    %c0_i32_1 = arith.constant 0 : i32
    return %c0_i32, %c0_i32_0 : i32, i32
  }
  func.func @transform_3(%arg0: i32, %arg1: i32) -> (i32, i32) {
    %c0_i32 = arith.constant 0 : i32
    %c0_i32_0 = arith.constant 0 : i32
    %c0_i32_1 = arith.constant 0 : i32
    return %c0_i32, %c0_i32_0 : i32, i32
  }
  func.func @transform_4(%arg0: i32, %arg1: i32) -> (i32, i32) {
    %c0_i32 = arith.constant 0 : i32
    %c0_i32_0 = arith.constant 0 : i32
    %c0_i32_1 = arith.constant 0 : i32
    return %c0_i32, %c0_i32_0 : i32, i32
  }
  func.func @transform_5(%arg0: i32, %arg1: i32) -> (i32, i32) {
    %c0_i32 = arith.constant 0 : i32
    %c0_i32_0 = arith.constant 0 : i32
    %c0_i32_1 = arith.constant 0 : i32
    return %c0_i32, %c0_i32_0 : i32, i32
  }
  func.func @transform_6(%arg0: i32, %arg1: i32) -> (i32, i32) {
    %c0_i32 = arith.constant 0 : i32
    %c0_i32_0 = arith.constant 0 : i32
    %c0_i32_1 = arith.constant 0 : i32
    return %c0_i32, %c0_i32_0 : i32, i32
  }
  func.func @transform_7(%arg0: i32, %arg1: i32) -> (i32, i32) {
    %c0_i32 = arith.constant 0 : i32
    %c0_i32_0 = arith.constant 0 : i32
    %c0_i32_1 = arith.constant 0 : i32
    return %c0_i32, %c0_i32_0 : i32, i32
  }
  func.func @transform_8(%arg0: i32, %arg1: i32) -> (i32, i32) {
    %c0_i32 = arith.constant 0 : i32
    %c0_i32_0 = arith.constant 0 : i32
    %c0_i32_1 = arith.constant 0 : i32
    return %c0_i32, %c0_i32_0 : i32, i32
  }
  func.func @transform_9(%arg0: i32, %arg1: i32) -> (i32, i32) {
    %c0_i32 = arith.constant 0 : i32
    %c0_i32_0 = arith.constant 0 : i32
    %c0_i32_1 = arith.constant 0 : i32
    return %c0_i32, %c0_i32_0 : i32, i32
  }
  func.func @transform_10(%arg0: i32, %arg1: i32) -> (i32, i32) {
    %c0_i32 = arith.constant 0 : i32
    %c0_i32_0 = arith.constant 0 : i32
    %c0_i32_1 = arith.constant 0 : i32
    return %c0_i32, %c0_i32_0 : i32, i32
  }
  func.func @transform_11(%arg0: i32, %arg1: i32) -> (i32, i32) {
    %c0_i32 = arith.constant 0 : i32
    %c0_i32_0 = arith.constant 0 : i32
    %c0_i32_1 = arith.constant 0 : i32
    return %c0_i32, %c0_i32_0 : i32, i32
  }
  func.func @transform_12(%arg0: i32, %arg1: i32) -> (i32, i32) {
    %c0_i32 = arith.constant 0 : i32
    %c0_i32_0 = arith.constant 0 : i32
    %c0_i32_1 = arith.constant 0 : i32
    return %c0_i32, %c0_i32_0 : i32, i32
  }
  func.func @transform_13(%arg0: i32, %arg1: i32) -> (i32, i32) {
    %c0_i32 = arith.constant 0 : i32
    %c0_i32_0 = arith.constant 0 : i32
    return %arg0, %c0_i32 : i32, i32
  }
}

</mosaic_0001>

<bundles_post_ra>
// kernel: pointnet_forward.1
= control target key start
LH: loop header
LB: loop body
LE: loop exit
PB: predicated region body
PF: predicated region fallthrough
CT: control target
= control target key end

     0   :  { %v5697_v1 = vmov 1   ;;  %v5698_v2 = vmov 0   ;;  %v5699_v3 = vmov 2   ;;  %s8379_s0 = inlined_call_operand.vmem [shape: f32[2,16,3], index: 0, kind: input, shape index: {}]   ;;  %s8380_s1 = inlined_call_operand.vmem [shape: f32[3,64], index: 1, kind: input, shape index: {}]   ;;  %s8381_s2 = inlined_call_operand.vmem [shape: f32[1,64], index: 2, kind: input, shape index: {}]   ;;  %s8382_s3 = inlined_call_operand.vmem [shape: bf16[64,128], index: 3, kind: input, shape index: {}]   ;;  %s8383_s4 = inlined_call_operand.vmem [shape: f32[1,128], index: 4, kind: input, shape index: {}]   ;;  %s8384_s5 = inlined_call_operand.vmem [shape: bf16[128,1024], index: 5, kind: input, shape index: {}]   ;;  %s8385_s6 = inlined_call_operand.vmem [shape: f32[1,1024], index: 6, kind: input, shape index: {}]   ;;  %s8386_s7 = inlined_call_operand.vmem [shape: bf16[1024,512], index: 7, kind: input, shape index: {}]   ;;  %s8387_s8 = inlined_call_operand.vmem [shape: f32[1,512], index: 8, kind: input, shape index: {}]   ;;  %s8388_s9 = inlined_call_operand.vmem [shape: bf16[512,256], index: 9, kind: input, shape index: {}]   ;;  %s8389_s10 = inlined_call_operand.vmem [shape: f32[1,256], index: 10, kind: input, shape index: {}]   ;;  %s8390_s11 = inlined_call_operand.vmem [shape: bf16[256,128], index: 11, kind: input, shape index: {}]   ;;  %s8391_s12 = inlined_call_operand.vmem [shape: f32[1,128], index: 12, kind: input, shape index: {}]   ;;  %s8392_s13 = inlined_call_operand.hbm [shape: f32[2,128], index: 13, kind: output, shape index: {}]  }
   0x1   :  { %v46_v0 = vld [vmem:[%s8379_s0] sm:$0xff]  ;;  %5659 = vset.pattern.permute.xlu1 %v5697_v1  ;;  %5658 = vset.pattern.permute.xlu0 %v5698_v2 }
   0x2   :  { %77 = vperm.xlu1 %5659, %v46_v0   ;;  %53 = vperm.xlu0 %5658, %v46_v0  }
   0x3   :  { %5660 = vset.pattern.permute.xlu2 %v5699_v3 }
   0x4   :  { %18 = vsyncpa [#allocation4], 0  ;;  %102 = vperm.xlu2 %5660, %v46_v0   ;;  %v47_v4 = vld [vmem:[%s8379_s0 + $0x8] sm:$0xff]  ;;  %v48_v5 = vld [vmem:[%s8379_s0 + $0x10] sm:$0xff]  ;;  %vm176_vm0 = vcmask 523264   ;;  %vm892_vm1 = vcmask 1041408  }
   0x5   :  { %v49_v6 = vld [vmem:[%s8379_s0 + $0x18] sm:$0xff]  ;;  %v5252_v8 = vld [vmem:[%s8382_s3 + $0x10] sm:$0xff]  ;;  %v5251_v9 = vld [vmem:[%s8382_s3 + $0x8] sm:$0xff]  ;;  %vm894_vm2 = vcmask 1045508   ;;  %vm896_vm3 = vcmask 1043456   ;;  %vm912_vm4 = vcmask 1041409  }
   0x6   :  { %v5253_v7 = vld [vmem:[%s8382_s3 + $0x18] sm:$0xff]  ;;  %v5250_v10 = vld [vmem:[%s8382_s3] sm:$0xff]  ;;  %v3884_v28 = vld [vmem:[%s8384_s5 + $0x1c8] sm:$0xf]  ;;  %vm914_vm5 = vcmask 1043459   ;;  %vm916_vm6 = vcmask 1045509  }
   0x7   :  { %187 = vmatpush.bf16.msra.mxu0 %v5253_v7  ;;  %v50_v11 = vld [vmem:[%s8380_s1] sm:$0x7]  ;;  %v5310_v24 = vld [vmem:[%s8384_s5 + $0x1c4] sm:$0xf]  ;;  %v5315_v29 = vld [vmem:[%s8384_s5 + $0x1e4] sm:$0xf0] }
   0x8   :  { %v5798_v13 = vperm.slane %v50_v11, 1  ;;  %v5800_v14 = vperm.slane %v50_v11, 0  ;;  %v5802_v17 = vperm.slane %v50_v11, 2  ;;  %v3876_v22 = vld [vmem:[%s8384_s5 + $0x1c0] sm:$0xf]  ;;  %v3885_v33 = vor.u32 %v5315_v29, %v3884_v28  ;;  %s3623_s27 = sshll.u32 %s8392_s13, 4  ;;  %s3624_s27 = int_to_ptr.hbm [resolvable:$true] %s3623_s27 }
   0x9   :  { %v5314_v23 = vld [vmem:[%s8384_s5 + $0x1dc] sm:$0xf0]  ;;  %v3878_v27 = vld [vmem:[%s8384_s5 + $0x1e0] sm:$0xf0]  ;;  %v5311_v34 = vld [vmem:[%s8384_s5 + $0x1cc] sm:$0xf] }
   0xa   :  { %81 = vperm.xlu1 %5659, %v47_v4   ;;  %58 = vperm.xlu0 %5658, %v47_v4   ;;  %v3877_v26 = vor.u32 %v5314_v23, %v3876_v22  ;;  %v3881_v32 = vor.u32 %v5310_v24, %v3878_v27  ;;  %v3886_v35 = vld [vmem:[%s8384_s5 + $0x1e8] sm:$0xf0]  ;;  %v3844_v36 = vld [vmem:[%s8384_s5 + $0x180] sm:$0xf]  ;;  %v5302_v43 = vld [vmem:[%s8384_s5 + $0x184] sm:$0xf] }
   0xb   :  { %188 = vmatpush.bf16.msra.mxu0 %v5252_v8  ;;  %v5839_v40 = vld [vmem:[%s8381_s2] ss:$0 sm:$0xff]  ;;  %v3889_v41 = vor.u32 %v5311_v34, %v3886_v35  ;;  %630 = vmatpush.bf16.msra.mxu3 %v3885_v33  ;;  %v3846_v45 = vld [vmem:[%s8384_s5 + $0x1a0] sm:$0xf0]  ;;  %v3852_v46 = vld [vmem:[%s8384_s5 + $0x188] sm:$0xf] }
   0xc   :  { %106 = vperm.xlu2 %5660, %v47_v4   ;;  %592 = vmatpush.bf16.msra.mxu1 %v3877_v26  ;;  %v5306_v42 = vld [vmem:[%s8384_s5 + $0x19c] sm:$0xf0]  ;;  %v5307_v47 = vld [vmem:[%s8384_s5 + $0x1a4] sm:$0xf0]  ;;  %v3849_v50 = vor.u32 %v5302_v43, %v3846_v45  ;;  %v5303_v52 = vld [vmem:[%s8384_s5 + $0x18c] sm:$0xf] }
   0xd   :  { %611 = vmatpush.bf16.msra.mxu2 %v3881_v32  ;;  %v3845_v44 = vor.u32 %v5306_v42, %v3844_v36  ;;  %v3853_v51 = vor.u32 %v5307_v47, %v3852_v46  ;;  %v3854_v53 = vld [vmem:[%s8384_s5 + $0x1a8] sm:$0xf0]  ;;  %v3812_v54 = vld [vmem:[%s8384_s5 + $0x140] sm:$0xf]  ;;  %v5294_v57 = vld [vmem:[%s8384_s5 + $0x144] sm:$0xf] }
   0xe   :  { %v3857_v55 = vor.u32 %v5303_v52, %v3854_v53  ;;  %v5298_v56 = vld [vmem:[%s8384_s5 + $0x15c] sm:$0xf0]  ;;  %v3814_v58 = vld [vmem:[%s8384_s5 + $0x160] sm:$0xf0]  ;;  %v3820_v62 = vld [vmem:[%s8384_s5 + $0x148] sm:$0xf] }
   0xf   :  { %189 = vmatpush.bf16.msra.mxu0 %v5251_v9  ;;  %v3813_v61 = vor.u32 %v5298_v56, %v3812_v54  ;;  %v5299_v63 = vld [vmem:[%s8384_s5 + $0x164] sm:$0xf0]  ;;  %v5295_v0 = vld [vmem:[%s8384_s5 + $0x14c] sm:$0xf]  ;;  %631 = vmatpush.bf16.msra.mxu3 %v3853_v51  ;;  %v3780_v4 = vld [vmem:[%s8384_s5 + $0x100] sm:$0xf] }
  0x10   :  { %593 = vmatpush.bf16.msra.mxu1 %v3845_v44  ;;  %v5286_v9 = vld [vmem:[%s8384_s5 + $0x104] sm:$0xf]  ;;  %v3788_v11 = vld [vmem:[%s8384_s5 + $0x108] sm:$0xf]  ;;  %v5279_v51 = vld [vmem:[%s8384_s5 + $0xcc] sm:$0xf] }
  0x11   :  { %612 = vmatpush.bf16.msra.mxu2 %v3849_v50  ;;  %v3756_v47 = vld [vmem:[%s8384_s5 + $0xc8] sm:$0xf]  ;;  %v3758_v52 = vld [vmem:[%s8384_s5 + $0xe8] sm:$0xf0]  ;;  %v3716_v54 = vld [vmem:[%s8384_s5 + $0x80] sm:$0xf] }
  0x12   :  { %5661 = vset.pattern.permute.xlu1 %v5698_v2  ;;  %63 = vperm.xlu0 %5658, %v48_v5   ;;  %v3821_v2 = vor.u32 %v5299_v63, %v3820_v62  ;;  %v3761_v53 = vor.u32 %v5279_v51, %v3758_v52  ;;  %v5270_v56 = vld [vmem:[%s8384_s5 + $0x84] sm:$0xf]  ;;  %v5271_v63 = vld [vmem:[%s8384_s5 + $0x8c] sm:$0xf]  ;;  %v5300_v51 = vld [vmem:[%s8384_s5 + $0x16c] sm:$0xf0] }
  0x13   :  { %68 = vperm.xlu1 %5661, %v49_v6   ;;  %190 = vmatpush.bf16.msra.mxu0 %v5250_v10  ;;  %v3782_v10 = vld [vmem:[%s8384_s5 + $0x120] sm:$0xf0]  ;;  %v5296_v52 = vld [vmem:[%s8384_s5 + $0x154] sm:$0xf]  ;;  %vm918_vm7 = vcmask 1047559  }
  0x14   :  { %5662 = vset.pattern.permute.xlu2 %v5697_v1  ;;  %594 = vmatpush.bf16.msra.mxu1 %v3813_v61  ;;  %v3785_v23 = vor.u32 %v5286_v9, %v3782_v10 }
  0x15   :  { %85 = vperm.xlu2 %5662, %v48_v5   ;;  %632 = vmatpush.bf16.msra.mxu3 %v3821_v2  ;;  %v3684_v2 = vld [vmem:[%s8384_s5 + $0x40] sm:$0xf] }
  0x17   :  { %649 = vmatpush.bf16.msrb.mxu0 %v3889_v41 }
  0x1a   :  { %5663 = vset.pattern.permute.xlu0 %v5697_v1  ;;  %v3817_v1 = vor.u32 %v5294_v57, %v3814_v58  ;;  %v3718_v58 = vld [vmem:[%s8384_s5 + $0xa0] sm:$0xf0] }
  0x1b   :  { %5664 = vset.pattern.permute.xlu1 %v5699_v3  ;;  %89 = vperm.xlu0 %5663, %v49_v6   ;;  %v3721_v61 = vor.u32 %v5270_v56, %v3718_v58  ;;  %v5301_v56 = vld [vmem:[%s8384_s5 + $0x174] sm:$0xf0] }
  0x1c   :  { %110 = vperm.xlu1 %5664, %v48_v5   ;;  %v5290_v5 = vld [vmem:[%s8384_s5 + $0x11c] sm:$0xf0]  ;;  %650 = vmatpush.bf16.msrb.mxu0 %v3857_v55 }
  0x1d   :  { %5665 = vset.pattern.permute.xlu2 %v5699_v3  ;;  %v3781_v22 = vor.u32 %v5290_v5, %v3780_v4  ;;  %613 = vmatpush.bf16.msra.mxu2 %v3817_v1  ;;  %v5274_v55 = vld [vmem:[%s8384_s5 + $0x9c] sm:$0xf0]  ;;  %v5262_v4 = vld [vmem:[%s8384_s5 + $0x44] sm:$0xf] }
  0x1e   :  { %114 = vperm.xlu2 %5665, %v49_v6   ;;  %v3717_v57 = vor.u32 %v5274_v55, %v3716_v54  ;;  %v3830_v54 = vld [vmem:[%s8384_s5 + $0x170] sm:$0xf0]  ;;  %v3836_v55 = vld [vmem:[%s8384_s5 + $0x158] sm:$0xf] }
  0x1f   :  { %595 = vmatpush.bf16.msra.mxu1 %v3781_v22  ;;  %v3660_v22 = vld [vmem:[%s8384_s5 + $0x8] sm:$0xf]  ;;  %v3837_v58 = vor.u32 %v5301_v56, %v3836_v55  ;;  %v3670_v55 = vld [vmem:[%s8384_s5 + $0x30] sm:$0xf0]  ;;  %v3676_v56 = vld [vmem:[%s8384_s5 + $0x18] sm:$0xf] }
  0x21   :  { %614 = vmatpush.bf16.msra.mxu2 %v3785_v23  ;;  %v5259_v23 = vld [vmem:[%s8384_s5 + $0x24] sm:$0xf0] }
  0x23   :  { %5666 = vset.pattern.permute.xlu0 %v5699_v3  ;;  %v3822_v3 = vld [vmem:[%s8384_s5 + $0x168] sm:$0xf0] }
  0x24   :  { %v3825_v8 = vor.u32 %v5295_v0, %v3822_v3  ;;  %v3726_v0 = vld [vmem:[%s8384_s5 + $0xa8] sm:$0xf0]  ;;  %v5266_v3 = vld [vmem:[%s8384_s5 + $0x5c] sm:$0xf0] }
  0x25   :  { %v3729_v1 = vor.u32 %v5271_v63, %v3726_v0  ;;  %v3685_v5 = vor.u32 %v5266_v3, %v3684_v2  ;;  %v5292_v63 = vld [vmem:[%s8384_s5 + $0x12c] sm:$0xf0]  ;;  %v5288_v0 = vld [vmem:[%s8384_s5 + $0x114] sm:$0xf]  ;;  %v3804_v3 = vld [vmem:[%s8384_s5 + $0x118] sm:$0xf] }
  0x26   :  { %651 = vmatpush.bf16.msrb.mxu0 %v3825_v8  ;;  %v5267_v8 = vld [vmem:[%s8384_s5 + $0x64] sm:$0xf0]  ;;  %v3798_v2 = vld [vmem:[%s8384_s5 + $0x130] sm:$0xf0] }
  0x5e   :  { %v103_v12 = vpop.permute.xlu2 %102 }
  0x5f   :  { %v118_v20 = vmul.f32 %v5802_v17, %v103_v12 }
  0x66   :  { %v107_v25 = vpop.permute.xlu2 %106 }
  0x67   :  { %v119_v48 = vmul.f32 %v5802_v17, %v107_v25 }
  0x6f   :  { %v86_v6 = vpop.permute.xlu2 %85 }
  0x70   :  { %v95_v27 = vmul.f32 %v5798_v13, %v86_v6  ;;  %v3686_v6 = vld [vmem:[%s8384_s5 + $0x60] sm:$0xf0] }
  0x71   :  { %v3689_v9 = vor.u32 %v5262_v4, %v3686_v6  ;;  %v5293_v4 = vld [vmem:[%s8384_s5 + $0x134] sm:$0xf0] }
  0x72   :  { %v3805_v6 = vor.u32 %v5293_v4, %v3804_v3 }
  0x74   :  { %v78_v15 = vpop.permute.xlu1 %77  ;;  %v54_v16 = vpop.permute.xlu0 %53 }
  0x75   :  { %v93_v18 = vmul.f32 %v5798_v13, %v78_v15  ;;  %v72_v19 = vmul.f32 %v5800_v14, %v54_v16  ;;  %v5291_v15 = vld [vmem:[%s8384_s5 + $0x124] sm:$0xf0]  ;;  %v5287_v16 = vld [vmem:[%s8384_s5 + $0x10c] sm:$0xf] }
  0x76   :  { %v3789_v24 = vor.u32 %v5291_v15, %v3788_v11  ;;  %v5263_v11 = vld [vmem:[%s8384_s5 + $0x4c] sm:$0xf] }
  0x77   :  { %v97_v21 = vadd.f32 %v93_v18, %v72_v19  ;;  %v3790_v18 = vld [vmem:[%s8384_s5 + $0x128] sm:$0xf0] }
  0x78   :  { %v3793_v26 = vor.u32 %v5287_v16, %v3790_v18  ;;  %633 = vmatpush.bf16.msra.mxu3 %v3789_v24  ;;  %v115_v29 = vpop.permute.xlu2 %114  ;;  %v3652_v16 = vld [vmem:[%s8384_s5] sm:$0xf] }
  0x79   :  { %v122_v37 = vadd.f32 %v118_v20, %v97_v21  ;;  %v121_v34 = vmul.f32 %v5802_v17, %v115_v29  ;;  %v5258_v18 = vld [vmem:[%s8384_s5 + $0x1c] sm:$0xf0]  ;;  %v3892_v29 = vld [vmem:[%s8384_s5 + $0x1d0] sm:$0xf] }
  0x7a   :  { %652 = vmatpush.bf16.msrb.mxu0 %v3793_v26  ;;  %v5255_v26 = vld [vmem:[%s8384_s5 + $0xc] sm:$0xf] }
  0x7b   :  { %v130_v60 = vadd.f32 %v5839_v40, %v122_v37 }
  0x7c   :  { %v82_v30 = vpop.permute.xlu1 %81  ;;  %v59_v31 = vpop.permute.xlu0 %58 }
  0x7d   :  { %v94_v38 = vmul.f32 %v5798_v13, %v82_v30  ;;  %v73_v39 = vmul.f32 %v5800_v14, %v59_v31  ;;  %v134_v20 = vmax.f32 %v130_v60, 0.0  ;;  %v5275_v60 = vld [vmem:[%s8384_s5 + $0xa4] sm:$0xf0] }
  0x7e   :  { %653 = vmatpush.bf16.msrb.mxu0 %v3761_v53 }
  0x7f   :  { %v98_v49 = vadd.f32 %v94_v38, %v73_v39 }
  0x81   :  { %v123_v59 = vadd.f32 %v119_v48, %v98_v49  ;;  %v5283_v48 = vld [vmem:[%s8384_s5 + $0xe4] sm:$0xf0] }
  0x82   :  { %v3757_v50 = vor.u32 %v5283_v48, %v3756_v47  ;;  %654 = vmatpush.bf16.msrb.mxu0 %v3729_v1  ;;  %v5305_v47 = vld [vmem:[%s8384_s5 + $0x19c] sm:$0xf] }
  0x83   :  { %v131_v7 = vadd.f32 %v5839_v40, %v123_v59  ;;  %v3724_v59 = vld [vmem:[%s8384_s5 + $0x88] sm:$0xf]  ;;  %v3870_v48 = vld [vmem:[%s8384_s5 + $0x1b8] sm:$0xf0] }
  0x84   :  { %v64_v12 = vpop.permute.xlu0 %63  ;;  %634 = vmatpush.bf16.msra.mxu3 %v3757_v50  ;;  %v3725_v62 = vor.u32 %v5275_v60, %v3724_v59  ;;  %v3828_v50 = vld [vmem:[%s8384_s5 + $0x150] sm:$0xf]  ;;  %v5297_v59 = vld [vmem:[%s8384_s5 + $0x15c] sm:$0xf] }
  0x85   :  { %v69_v19 = vpop.permute.xlu1 %68  ;;  %v135_v21 = vmax.f32 %v131_v7, 0.0  ;;  %v74_v28 = vmul.f32 %v5800_v14, %v64_v12  ;;  %v3692_v7 = vld [vmem:[%s8384_s5 + $0x48] sm:$0xf]  ;;  %v3694_v12 = vld [vmem:[%s8384_s5 + $0x68] sm:$0xf0]  ;;  %v3829_v53 = vor.u32 %v5300_v51, %v3828_v50 }
  0x86   :  { %v75_v31 = vmul.f32 %v5800_v14, %v69_v19  ;;  %v5282_v14 = vld [vmem:[%s8384_s5 + $0xdc] sm:$0xf0]  ;;  %v3693_v10 = vor.u32 %v5267_v8, %v3692_v7  ;;  %v3697_v15 = vor.u32 %v5263_v11, %v3694_v12  ;;  %v5254_v19 = vld [vmem:[%s8384_s5 + $0x4] sm:$0xf]  ;;  %v3838_v60 = vld [vmem:[%s8384_s5 + $0x178] sm:$0xf0] }
  0x87   :  { %v138_v25 = vpack.c.bf16 %v135_v21, %v134_v20  ;;  %v99_v35 = vadd.f32 %v95_v27, %v74_v28  ;;  %v3653_v20 = vor.u32 %v5258_v18, %v3652_v16  ;;  %v3654_v21 = vld [vmem:[%s8384_s5 + $0x20] sm:$0xf0]  ;;  %v3662_v27 = vld [vmem:[%s8384_s5 + $0x28] sm:$0xf0]  ;;  %v5289_v7 = vld [vmem:[%s8384_s5 + $0x11c] sm:$0xf] }
  0x88   :  { %635 = vmatpush.bf16.msra.mxu3 %v3725_v62  ;;  %655 = vmatpush.bf16.msrb.mxu0 %v3697_v15  ;;  %v3657_v24 = vor.u32 %v5254_v19, %v3654_v21  ;;  %v3665_v28 = vor.u32 %v5255_v26, %v3662_v27  ;;  %v3796_v62 = vld [vmem:[%s8384_s5 + $0x110] sm:$0xf]  ;;  %v3806_v8 = vld [vmem:[%s8384_s5 + $0x138] sm:$0xf0]  ;;  %v5280_v12 = vld [vmem:[%s8384_s5 + $0xd4] sm:$0xf] }
  0x89   :  { %3648 = vmatmul.msk.bf16.vlgmr.msra.gmra.mxu0 %vm176_vm0, %v138_v25  ;;  %v3661_v25 = vor.u32 %v5259_v23, %v3660_v22  ;;  %v3797_v1 = vor.u32 %v5292_v63, %v3796_v62  ;;  %v5284_v11 = vld [vmem:[%s8384_s5 + $0xec] sm:$0xf0]  ;;  %v3766_v18 = vld [vmem:[%s8384_s5 + $0xf0] sm:$0xf0]  ;;  %v3772_v19 = vld [vmem:[%s8384_s5 + $0xd8] sm:$0xf] }
  0x8a   :  { %v3769_v21 = vor.u32 %v5280_v12, %v3766_v18  ;;  %v5281_v23 = vld [vmem:[%s8384_s5 + $0xdc] sm:$0xf]  ;;  %v5276_v27 = vld [vmem:[%s8384_s5 + $0xac] sm:$0xf0] }
  0x8b   :  { %v5412_v18 = vld [vmem:[%s8386_s7 + $0x2ec] sm:$0xf0] }
  0x8c   :  { %636 = vmatpush.bf16.msra.mxu3 %v3693_v10  ;;  %656 = vmatpush.bf16.msrb.mxu0 %v3665_v28  ;;  %v3764_v10 = vld [vmem:[%s8384_s5 + $0xd0] sm:$0xf]  ;;  %v5272_v28 = vld [vmem:[%s8384_s5 + $0x94] sm:$0xf] }
  0x8d   :  { %v90_v30 = vpop.permute.xlu0 %89  ;;  %v3765_v16 = vor.u32 %v5284_v11, %v3764_v10  ;;  %v5348_v10 = vld [vmem:[%s8386_s7 + $0xec] sm:$0xf0]  ;;  %v4148_v11 = vld [vmem:[%s8386_s7 + $0x1e0] sm:$0xf] }
  0x8e   :  { %v96_v32 = vmul.f32 %v5798_v13, %v90_v30  ;;  %v111_v33 = vpop.permute.xlu1 %110  ;;  %v3748_v13 = vld [vmem:[%s8384_s5 + $0xc0] sm:$0xf]  ;;  %v5316_v30 = vld [vmem:[%s8384_s5 + $0x1ec] sm:$0xf0] }
  0x8f   :  { %v120_v36 = vmul.f32 %v5802_v17, %v111_v33  ;;  %v5278_v17 = vld [vmem:[%s8384_s5 + $0xc4] sm:$0xf]  ;;  %v3749_v46 = vor.u32 %v5282_v14, %v3748_v13  ;;  %v3894_v33 = vld [vmem:[%s8384_s5 + $0x1f0] sm:$0xf0]  ;;  %v3868_v14 = vld [vmem:[%s8384_s5 + $0x198] sm:$0xf] }
  0x90   :  { %v100_v37 = vadd.f32 %v96_v32, %v75_v31  ;;  %637 = vmatpush.bf16.msra.mxu3 %v3661_v25  ;;  %v5312_v31 = vld [vmem:[%s8384_s5 + $0x1d4] sm:$0xf]  ;;  %v3893_v32 = vor.u32 %v5316_v30, %v3892_v29  ;;  %v3732_v25 = vld [vmem:[%s8384_s5 + $0x90] sm:$0xf]  ;;  %v5668_v30 = vld [vmem:[%s8383_s4] ss:$0 sm:$0xff] }
  0x91   :  { %v124_v38 = vadd.f32 %v120_v36, %v99_v35  ;;  %596 = vmatpush.bf16.msra.mxu1 %v3749_v46  ;;  %v5317_v35 = vld [vmem:[%s8384_s5 + $0x1f4] sm:$0xf0]  ;;  %v3897_v36 = vor.u32 %v5312_v31, %v3894_v33  ;;  %v3862_v13 = vld [vmem:[%s8384_s5 + $0x1b0] sm:$0xf0]  ;;  %v3733_v31 = vor.u32 %v5276_v27, %v3732_v25  ;;  %v5344_v25 = vld [vmem:[%s8386_s7 + $0xcc] sm:$0xf0] }
  0x92   :  { %v125_v39 = vadd.f32 %v121_v34, %v100_v37  ;;  %v3900_v34 = vld [vmem:[%s8384_s5 + $0x1d8] sm:$0xf]  ;;  %v3734_v29 = vld [vmem:[%s8384_s5 + $0xb0] sm:$0xf0] }
  0x93   :  { %v132_v41 = vadd.f32 %v5839_v40, %v124_v38  ;;  %v3901_v37 = vor.u32 %v5317_v35, %v3900_v34  ;;  %v5313_v38 = vld [vmem:[%s8384_s5 + $0x1dc] sm:$0xf]  ;;  %v3740_v33 = vld [vmem:[%s8384_s5 + $0x98] sm:$0xf] }
  0x94   :  { %v133_v42 = vadd.f32 %v5839_v40, %v125_v39  ;;  %v3750_v40 = vld [vmem:[%s8384_s5 + $0xe0] sm:$0xf0]  ;;  %v3902_v39 = vld [vmem:[%s8384_s5 + $0x1f8] sm:$0xf0]  ;;  %v5277_v34 = vld [vmem:[%s8384_s5 + $0xb4] sm:$0xf0] }
  0x95   :  { %v136_v43 = vmax.f32 %v132_v41, 0.0  ;;  %v3753_v49 = vor.u32 %v5278_v17, %v3750_v40  ;;  %597 = vmatpush.bf16.msra.mxu1 %v3717_v57  ;;  %v3905_v41 = vor.u32 %v5313_v38, %v3902_v39  ;;  %706 = vmatpush.bf16.msrb.mxu3 %v3901_v37  ;;  %v5309_v17 = vld [vmem:[%s8384_s5 + $0x1b4] sm:$0xf0]  ;;  %v3833_v57 = vor.u32 %v5296_v52, %v3830_v54  ;;  %v3742_v37 = vld [vmem:[%s8384_s5 + $0xb8] sm:$0xf0] }
  0x96   :  { %v137_v44 = vmax.f32 %v133_v42, 0.0  ;;  %v3860_v42 = vld [vmem:[%s8384_s5 + $0x190] sm:$0xf]  ;;  %v3869_v40 = vor.u32 %v5309_v17, %v3868_v14  ;;  %v3741_v35 = vor.u32 %v5277_v34, %v3740_v33  ;;  %v5265_v14 = vld [vmem:[%s8384_s5 + $0x5c] sm:$0xf] }
  0x97   :  { %615 = vmatpush.bf16.msra.mxu2 %v3753_v49  ;;  %725 = vmatpush.bf16.msra.mxu0 %v3905_v41  ;;  %v3873_v49 = vor.u32 %v5305_v47, %v3870_v48  ;;  %v3700_v38 = vld [vmem:[%s8384_s5 + $0x50] sm:$0xf]  ;;  %v3710_v47 = vld [vmem:[%s8384_s5 + $0x78] sm:$0xf0]  ;;  %v4388_v33 = vld [vmem:[%s8386_s7 + $0x3c0] sm:$0xf] }
  0x98   :  { %v139_v45 = vpack.c.bf16 %v137_v44, %v136_v43  ;;  %v5308_v43 = vld [vmem:[%s8384_s5 + $0x1ac] sm:$0xf0]  ;;  %v5304_v44 = vld [vmem:[%s8384_s5 + $0x194] sm:$0xf]  ;;  %v3713_v51 = vor.u32 %v5265_v14, %v3710_v47  ;;  %v4100_v47 = vld [vmem:[%s8386_s7 + $0x180] sm:$0xf] }
  0x99   :  { %598 = vmatpush.bf16.msra.mxu1 %v3685_v5  ;;  %v3865_v46 = vor.u32 %v5304_v44, %v3862_v13  ;;  %707 = vmatpush.bf16.msrb.mxu3 %v3869_v40  ;;  %v3801_v5 = vor.u32 %v5288_v0, %v3798_v2  ;;  %v5268_v41 = vld [vmem:[%s8384_s5 + $0x6c] sm:$0xf0]  ;;  %v5269_v13 = vld [vmem:[%s8384_s5 + $0x74] sm:$0xf0] }
  0x9a   :  { %3649 = vmatmul.msk.bf16.gmra.mxu0 %vm176_vm0, %v139_v45  ;;  %v3861_v45 = vor.u32 %v5308_v43, %v3860_v42  ;;  %v5264_v42 = vld [vmem:[%s8384_s5 + $0x54] sm:$0xf]  ;;  %v3701_v44 = vor.u32 %v5268_v41, %v3700_v38  ;;  %v3668_v48 = vld [vmem:[%s8384_s5 + $0x10] sm:$0xf]  ;;  %v4116_v38 = vld [vmem:[%s8386_s7 + $0x1a0] sm:$0xf] }
  0x9b   :  { %616 = vmatpush.bf16.msra.mxu2 %v3721_v61  ;;  %726 = vmatpush.bf16.msra.mxu0 %v3873_v49  ;;  %v3841_v61 = vor.u32 %v5297_v59, %v3838_v60  ;;  %v3702_v43 = vld [vmem:[%s8384_s5 + $0x70] sm:$0xf0]  ;;  %v5260_v49 = vld [vmem:[%s8384_s5 + $0x2c] sm:$0xf0]  ;;  %v5257_v60 = vld [vmem:[%s8384_s5 + $0x1c] sm:$0xf] }
  0x9c   :  { %v3669_v54 = vor.u32 %v5260_v49, %v3668_v48  ;;  %v5440_v34 = vld [vmem:[%s8386_s7 + $0x3cc] sm:$0xf0] }
  0x9d   :  { %599 = vmatpush.bf16.msra.mxu1 %v3653_v20  ;;  %708 = vmatpush.bf16.msrb.mxu3 %v3837_v58  ;;  %v5285_v20 = vld [vmem:[%s8384_s5 + $0xf4] sm:$0xf0]  ;;  %v5372_v41 = vld [vmem:[%s8386_s7 + $0x1ac] sm:$0xf0] }
  0x9e   :  { %v3773_v22 = vor.u32 %v5285_v20, %v3772_v19  ;;  %v5436_v14 = vld [vmem:[%s8386_s7 + $0x3ac] sm:$0xf0] }
  0x9f   :  { %617 = vmatpush.bf16.msra.mxu2 %v3689_v9  ;;  %727 = vmatpush.bf16.msra.mxu0 %v3841_v61  ;;  %v3809_v9 = vor.u32 %v5289_v7, %v3806_v8  ;;  %v3678_v61 = vld [vmem:[%s8384_s5 + $0x38] sm:$0xf0]  ;;  %v5368_v49 = vld [vmem:[%s8386_s7 + $0x18c] sm:$0xf0] }
  0xa1   :  { %668 = vmatpush.bf16.msrb.mxu1 %v3893_v32  ;;  %709 = vmatpush.bf16.msrb.mxu3 %v3805_v6  ;;  %v3737_v32 = vor.u32 %v5272_v28, %v3734_v29  ;;  %v5376_v28 = vld [vmem:[%s8386_s7 + $0x1cc] sm:$0xf0]  ;;  %v4260_v29 = vld [vmem:[%s8386_s7 + $0x2c0] sm:$0xf] }
  0xa3   :  { %618 = vmatpush.bf16.msra.mxu2 %v3657_v24  ;;  %728 = vmatpush.bf16.msra.mxu0 %v3809_v9  ;;  %v3774_v24 = vld [vmem:[%s8384_s5 + $0xf8] sm:$0xf0]  ;;  %v4020_v9 = vld [vmem:[%s8386_s7 + $0xe0] sm:$0xf] }
  0xa4   :  { %v3777_v26 = vor.u32 %v5281_v23, %v3774_v24  ;;  %v4021_v12 = vor.u32 %v5348_v10, %v4020_v9  ;;  %v4004_v24 = vld [vmem:[%s8386_s7 + $0xc0] sm:$0xf] }
  0xa5   :  { %669 = vmatpush.bf16.msrb.mxu1 %v3861_v45  ;;  %710 = vmatpush.bf16.msrb.mxu3 %v3773_v22  ;;  %v3708_v45 = vld [vmem:[%s8384_s5 + $0x58] sm:$0xf]  ;;  %v5444_v22 = vld [vmem:[%s8386_s7 + $0x3ec] sm:$0xf0]  ;;  %v4005_v27 = vor.u32 %v5344_v25, %v4004_v24  ;;  %v4068_v9 = vld [vmem:[%s8386_s7 + $0x140] sm:$0xf] }
  0xa6   :  { %v3709_v40 = vor.u32 %v5269_v13, %v3708_v45  ;;  %v4372_v13 = vld [vmem:[%s8386_s7 + $0x3a0] sm:$0xf] }
  0xa7   :  { %687 = vmatpush.bf16.msrb.mxu2 %v3897_v36  ;;  %729 = vmatpush.bf16.msra.mxu0 %v3777_v26  ;;  %v5273_v36 = vld [vmem:[%s8384_s5 + $0x9c] sm:$0xf]  ;;  %v4132_v26 = vld [vmem:[%s8386_s7 + $0x1c0] sm:$0xf] }
  0xa8   :  { %v3745_v39 = vor.u32 %v5273_v36, %v3742_v37  ;;  %v3988_v36 = vld [vmem:[%s8386_s7 + $0xa0] sm:$0xf]  ;;  %v5340_v37 = vld [vmem:[%s8386_s7 + $0xac] sm:$0xf0] }
  0xa9   :  { %670 = vmatpush.bf16.msrb.mxu1 %v3829_v53  ;;  %711 = vmatpush.bf16.msrb.mxu3 %v3741_v35  ;;  %v5256_v53 = vld [vmem:[%s8384_s5 + $0x14] sm:$0xf]  ;;  %v4389_v35 = vor.u32 %v5440_v34, %v4388_v33  ;;  %v4052_v24 = vld [vmem:[%s8386_s7 + $0x120] sm:$0xf]  ;;  %v5420_v34 = vld [vmem:[%s8386_s7 + $0x32c] sm:$0xf0] }
  0xaa   :  { %v3673_v63 = vor.u32 %v5256_v53, %v3670_v55  ;;  %v5432_v55 = vld [vmem:[%s8386_s7 + $0x38c] sm:$0xf0]  ;;  %v4308_v33 = vld [vmem:[%s8386_s7 + $0x320] sm:$0xf] }
  0xab   :  { %688 = vmatpush.bf16.msrb.mxu2 %v3865_v46  ;;  %v3705_v46 = vor.u32 %v5264_v42, %v3702_v43  ;;  %730 = vmatpush.bf16.msra.mxu0 %v3745_v39  ;;  %v3989_v39 = vor.u32 %v5340_v37, %v3988_v36  ;;  %v4244_v42 = vld [vmem:[%s8386_s7 + $0x2a0] sm:$0xf]  ;;  %v5404_v43 = vld [vmem:[%s8386_s7 + $0x2ac] sm:$0xf0]  ;;  %v4309_v36 = vor.u32 %v5420_v34, %v4308_v33 }
  0xac   :  { %v4245_v45 = vor.u32 %v5404_v43, %v4244_v42  ;;  %v5352_v43 = vld [vmem:[%s8386_s7 + $0x10c] sm:$0xf0] }
  0xad   :  { %671 = vmatpush.bf16.msrb.mxu1 %v3797_v1  ;;  %712 = vmatpush.bf16.msrb.mxu3 %v3709_v40  ;;  %v3681_v1 = vor.u32 %v5257_v60, %v3678_v61  ;;  %v5336_v40 = vld [vmem:[%s8386_s7 + $0x8c] sm:$0xf0]  ;;  %v4084_v60 = vld [vmem:[%s8386_s7 + $0x160] sm:$0xf] }
  0xae   :  { %v5364_v61 = vld [vmem:[%s8386_s7 + $0x16c] sm:$0xf0] }
  0xaf   :  { %689 = vmatpush.bf16.msrb.mxu2 %v3833_v57  ;;  %v5261_v57 = vld [vmem:[%s8384_s5 + $0x34] sm:$0xf0]  ;;  %731 = vmatpush.bf16.msra.mxu0 %v3713_v51  ;;  %v5400_v51 = vld [vmem:[%s8386_s7 + $0x28c] sm:$0xf0] }
  0xb0   :  { %v3677_v0 = vor.u32 %v5261_v57, %v3676_v56  ;;  %v3956_v57 = vld [vmem:[%s8386_s7 + $0x60] sm:$0xf] }
  0xb1   :  { %672 = vmatpush.bf16.msrb.mxu1 %v3765_v16  ;;  %v4276_v16 = vld [vmem:[%s8386_s7 + $0x2e0] sm:$0xf] }
  0xb2   :  { %713 = vmatpush.bf16.msrb.mxu3 %v3677_v0  ;;  %v4277_v20 = vor.u32 %v5412_v18, %v4276_v16  ;;  %v5396_v0 = vld [vmem:[%s8386_s7 + $0x26c] sm:$0xf0] }
  0xb3   :  { %690 = vmatpush.bf16.msrb.mxu2 %v3801_v5  ;;  %732 = vmatpush.bf16.msra.mxu0 %v3681_v1  ;;  %v4340_v1 = vld [vmem:[%s8386_s7 + $0x360] sm:$0xf] }
  0xb5   :  { %673 = vmatpush.bf16.msrb.mxu1 %v3733_v31  ;;  %v4133_v31 = vor.u32 %v5376_v28, %v4132_v26  ;;  %v4180_v28 = vld [vmem:[%s8386_s7 + $0x220] sm:$0xf] }
  0xb7   :  { %691 = vmatpush.bf16.msrb.mxu2 %v3769_v21  ;;  %v4404_v21 = vld [vmem:[%s8386_s7 + $0x3e0] sm:$0xf] }
  0xb8   :  { %v4405_v23 = vor.u32 %v5444_v22, %v4404_v21  ;;  %v3924_v22 = vld [vmem:[%s8386_s7 + $0x20] sm:$0xf] }
  0xb9   :  { %674 = vmatpush.bf16.msrb.mxu1 %v3701_v44  ;;  %v4117_v44 = vor.u32 %v5372_v41, %v4116_v38  ;;  %v3908_v38 = vld [vmem:[%s8386_s7] sm:$0xf] }
  0xba   :  { %v4036_v41 = vld [vmem:[%s8386_s7 + $0x100] sm:$0xf] }
  0xbb   :  { %692 = vmatpush.bf16.msrb.mxu2 %v3737_v32 }
  0xbd   :  { %675 = vmatpush.bf16.msrb.mxu1 %v3669_v54  ;;  %v4356_v54 = vld [vmem:[%s8386_s7 + $0x380] sm:$0xf] }
  0xbe   :  { %v4357_v56 = vor.u32 %v5432_v55, %v4356_v54 }
  0xbf   :  { %693 = vmatpush.bf16.msrb.mxu2 %v3705_v46  ;;  %v3972_v46 = vld [vmem:[%s8386_s7 + $0x80] sm:$0xf] }
  0xc0   :  { %v3973_v48 = vor.u32 %v5336_v40, %v3972_v46  ;;  %v5416_v46 = vld [vmem:[%s8386_s7 + $0x30c] sm:$0xf0] }
  0xc3   :  { %694 = vmatpush.bf16.msrb.mxu2 %v3673_v63  ;;  %v4085_v63 = vor.u32 %v5364_v61, %v4084_v60 }
 0x106   :  { %v192_v15 = vpop.f32.mrf.mxu0 }
 0x107   :  { %v193_v17 = vadd.f32 %v5668_v30, %v192_v15  ;;  %v5380_v15 = vld [vmem:[%s8386_s7 + $0x1ec] sm:$0xf0] }
 0x108   :  { %v4149_v19 = vor.u32 %v5380_v15, %v4148_v11  ;;  %v5360_v11 = vld [vmem:[%s8386_s7 + $0x14c] sm:$0xf0] }
 0x109   :  { %v202_v58 = vmax.f32 %v193_v17, 0.0  ;;  %v4373_v17 = vor.u32 %v5436_v14, %v4372_v13  ;;  %v5392_v15 = vld [vmem:[%s8386_s7 + $0x24c] sm:$0xf0]  ;;  %v4069_v16 = vor.u32 %v5360_v11, %v4068_v9  ;;  %v4037_v13 = vor.u32 %v5352_v43, %v4036_v41 }
 0x10a   :  { %v5536_v9 = vld [vmem:[%s8386_s7 + $0x6cc] sm:$0xf0] }
 0x10e   :  { %v194_v50 = vpop.f32.mrf.mxu0 }
 0x10f   :  { %v195_v52 = vadd.f32 %v5668_v30, %v194_v50  ;;  %v4228_v50 = vld [vmem:[%s8386_s7 + $0x280] sm:$0xf] }
 0x110   :  { %v4229_v53 = vor.u32 %v5400_v51, %v4228_v50  ;;  %v4660_v50 = vld [vmem:[%s8386_s7 + $0x5e0] sm:$0xf]  ;;  %v5508_v51 = vld [vmem:[%s8386_s7 + $0x5ec] sm:$0xf0] }
 0x111   :  { %v203_v59 = vmax.f32 %v195_v52, 0.0  ;;  %v4101_v52 = vor.u32 %v5368_v49, %v4100_v47  ;;  %v4532_v47 = vld [vmem:[%s8386_s7 + $0x4e0] sm:$0xf]  ;;  %v4661_v55 = vor.u32 %v5508_v51, %v4660_v50 }
 0x113   :  { %v206_v62 = vpack.c.bf16 %v203_v59, %v202_v58  ;;  %v5332_v58 = vld [vmem:[%s8386_s7 + $0x6c] sm:$0xf0] }
 0x114   :  { %v3957_v59 = vor.u32 %v5332_v58, %v3956_v57  ;;  %v4916_v57 = vld [vmem:[%s8386_s7 + $0x7e0] sm:$0xf]  ;;  %v5572_v58 = vld [vmem:[%s8386_s7 + $0x7ec] sm:$0xf0] }
 0x115   :  { %600 = vmatmul.bf16.vlgmr.msra.gmra.mxu1 %v206_v62  ;;  %619 = vmatmul.bf16.vlgmr.msra.gmra.mxu2 %v206_v62  ;;  %v4917_v61 = vor.u32 %v5572_v58, %v4916_v57  ;;  %v4468_v57 = vld [vmem:[%s8386_s7 + $0x460] sm:$0xf]  ;;  %v5460_v58 = vld [vmem:[%s8386_s7 + $0x46c] sm:$0xf0] }
 0x116   :  { %638 = vmatmul.bf16.vlgmr.msra.gmra.mxu3 %v206_v62  ;;  %657 = vmatmul.bf16.vlgmr.msrb.gmra.mxu0 %v206_v62 }
 0x117   :  { %v197_v2 = vpop.f32.mrf.mxu0  ;;  %2541 = vmatpush.bf16.msra.mxu1 %v4021_v12  ;;  %2554 = vmatpush.bf16.msra.mxu2 %v4149_v19  ;;  %v4196_v12 = vld [vmem:[%s8386_s7 + $0x240] sm:$0xf] }
 0x118   :  { %v198_v3 = vadd.f32 %v5668_v30, %v197_v2  ;;  %2567 = vmatpush.bf16.msra.mxu3 %v4277_v20  ;;  %2580 = vmatpush.bf16.msrb.mxu0 %v4405_v23  ;;  %v4197_v18 = vor.u32 %v5392_v15, %v4196_v12  ;;  %v4324_v19 = vld [vmem:[%s8386_s7 + $0x340] sm:$0xf]  ;;  %v5424_v20 = vld [vmem:[%s8386_s7 + $0x34c] sm:$0xf0] }
 0x119   :  { %v4325_v21 = vor.u32 %v5424_v20, %v4324_v19  ;;  %v5324_v23 = vld [vmem:[%s8386_s7 + $0x2c] sm:$0xf0]  ;;  %v4900_v19 = vld [vmem:[%s8386_s7 + $0x7c0] sm:$0xf] }
 0x11a   :  { %v204_v6 = vmax.f32 %v198_v3, 0.0  ;;  %v3925_v26 = vor.u32 %v5324_v23, %v3924_v22  ;;  %v5568_v20 = vld [vmem:[%s8386_s7 + $0x7cc] sm:$0xf0] }
 0x11b   :  { %2542 = vmatpush.bf16.msra.mxu1 %v4005_v27  ;;  %2555 = vmatpush.bf16.msra.mxu2 %v4133_v31  ;;  %v5356_v27 = vld [vmem:[%s8386_s7 + $0x12c] sm:$0xf0] }
 0x11c   :  { %2581 = vmatpush.bf16.msrb.mxu0 %v4389_v35  ;;  %v4053_v31 = vor.u32 %v5356_v27, %v4052_v24  ;;  %v5468_v23 = vld [vmem:[%s8386_s7 + $0x4ac] sm:$0xf0]  ;;  %v4628_v24 = vld [vmem:[%s8386_s7 + $0x5a0] sm:$0xf] }
 0x11d   :  { %v4756_v27 = vld [vmem:[%s8386_s7 + $0x6a0] sm:$0xf] }
 0x11f   :  { %v199_v4 = vpop.f32.mrf.mxu0  ;;  %2543 = vmatpush.bf16.msra.mxu1 %v3989_v39  ;;  %2556 = vmatpush.bf16.msra.mxu2 %v4117_v44  ;;  %v5320_v39 = vld [vmem:[%s8386_s7 + $0xc] sm:$0xf0]  ;;  %v4164_v44 = vld [vmem:[%s8386_s7 + $0x200] sm:$0xf] }
 0x120   :  { %v200_v5 = vadd.f32 %v5668_v30, %v199_v4  ;;  %v5408_v30 = vld [vmem:[%s8386_s7 + $0x2cc] sm:$0xf0]  ;;  %2582 = vmatpush.bf16.msrb.mxu0 %v4373_v17  ;;  %v3909_v42 = vor.u32 %v5320_v39, %v3908_v38  ;;  %v4292_v17 = vld [vmem:[%s8386_s7 + $0x300] sm:$0xf] }
 0x121   :  { %v4261_v32 = vor.u32 %v5408_v30, %v4260_v29  ;;  %v5428_v4 = vld [vmem:[%s8386_s7 + $0x36c] sm:$0xf0]  ;;  %v4293_v40 = vor.u32 %v5416_v46, %v4292_v17  ;;  %v4484_v38 = vld [vmem:[%s8386_s7 + $0x480] sm:$0xf] }
 0x122   :  { %v205_v7 = vmax.f32 %v200_v5, 0.0  ;;  %v5388_v29 = vld [vmem:[%s8386_s7 + $0x22c] sm:$0xf0] }
 0x123   :  { %2568 = vmatpush.bf16.msra.mxu3 %v4261_v32  ;;  %2544 = vmatpush.bf16.msra.mxu1 %v3973_v48  ;;  %v4181_v32 = vor.u32 %v5388_v29, %v4180_v28  ;;  %v5476_v48 = vld [vmem:[%s8386_s7 + $0x4ec] sm:$0xf0] }
 0x124   :  { %v207_v8 = vpack.c.bf16 %v205_v7, %v204_v6  ;;  %2557 = vmatpush.bf16.msra.mxu2 %v4101_v52  ;;  %2583 = vmatpush.bf16.msrb.mxu0 %v4357_v56  ;;  %v4341_v6 = vor.u32 %v5428_v4, %v4340_v1  ;;  %v3940_v7 = vld [vmem:[%s8386_s7 + $0x40] sm:$0xf]  ;;  %v4533_v49 = vor.u32 %v5476_v48, %v4532_v47  ;;  %v5540_v56 = vld [vmem:[%s8386_s7 + $0x6ec] sm:$0xf0] }
 0x125   :  { %v4788_v52 = vld [vmem:[%s8386_s7 + $0x6e0] sm:$0xf]  ;;  %v5496_v46 = vld [vmem:[%s8386_s7 + $0x58c] sm:$0xf0] }
 0x126   :  { %605 = vmatmul.bf16.gmra.mxu1 %v207_v8  ;;  %624 = vmatmul.bf16.gmra.mxu2 %v207_v8  ;;  %v4789_v60 = vor.u32 %v5540_v56, %v4788_v52  ;;  %v4644_v4 = vld [vmem:[%s8386_s7 + $0x5c0] sm:$0xf]  ;;  %v5528_v47 = vld [vmem:[%s8386_s7 + $0x68c] sm:$0xf0] }
 0x127   :  { %643 = vmatmul.bf16.gmra.mxu3 %v207_v8  ;;  %662 = vmatmul.bf16.gmra.mxu0 %v207_v8  ;;  %v4868_v52 = vld [vmem:[%s8386_s7 + $0x780] sm:$0xf] }
 0x128   :  { %2569 = vmatpush.bf16.msra.mxu3 %v4245_v45  ;;  %2545 = vmatpush.bf16.msra.mxu1 %v3957_v59  ;;  %v5384_v45 = vld [vmem:[%s8386_s7 + $0x20c] sm:$0xf0] }
 0x129   :  { %2558 = vmatpush.bf16.msra.mxu2 %v4085_v63  ;;  %2584 = vmatpush.bf16.msrb.mxu0 %v4341_v6  ;;  %v4165_v14 = vor.u32 %v5384_v45, %v4164_v44  ;;  %v5472_v63 = vld [vmem:[%s8386_s7 + $0x4cc] sm:$0xf0] }
 0x12a   :  { %v5504_v6 = vld [vmem:[%s8386_s7 + $0x5cc] sm:$0xf0] }
 0x12b   :  { %v5464_v45 = vld [vmem:[%s8386_s7 + $0x48c] sm:$0xf0] }
 0x12c   :  { %2570 = vmatpush.bf16.msra.mxu3 %v4229_v53  ;;  %v4485_v50 = vor.u32 %v5464_v45, %v4484_v38  ;;  %v6566_v38 = vld [vmem:[%s8385_s6] sm:$0xff] }
 0x12d   :  { %2559 = vmatpush.bf16.msra.mxu2 %v4069_v16  ;;  %2585 = vmatpush.bf16.msrb.mxu0 %v4325_v21  ;;  %v4500_v21 = vld [vmem:[%s8386_s7 + $0x4a0] sm:$0xf] }
 0x131   :  { %2560 = vmatpush.bf16.msra.mxu2 %v4053_v31  ;;  %2586 = vmatpush.bf16.msrb.mxu0 %v4309_v36  ;;  %v5532_v31 = vld [vmem:[%s8386_s7 + $0x6ac] sm:$0xf0] }
 0x132   :  { %v4757_v44 = vor.u32 %v5532_v31, %v4756_v27 }
 0x135   :  { %2561 = vmatpush.bf16.msra.mxu2 %v4037_v13  ;;  %2587 = vmatpush.bf16.msrb.mxu0 %v4293_v40  ;;  %v4612_v13 = vld [vmem:[%s8386_s7 + $0x580] sm:$0xf] }
 0x136   :  { %676 = vmatmul.bf16.vlgmr.msrb.gmra.mxu1 %v206_v62  ;;  %695 = vmatmul.bf16.vlgmr.msrb.gmra.mxu2 %v206_v62  ;;  %v4740_v40 = vld [vmem:[%s8386_s7 + $0x680] sm:$0xf]  ;;  %v4613_v51 = vor.u32 %v5496_v46, %v4612_v13  ;;  %v5452_v13 = vld [vmem:[%s8386_s7 + $0x42c] sm:$0xf0] }
 0x137   :  { %714 = vmatmul.bf16.vlgmr.msrb.gmra.mxu3 %v206_v62  ;;  %733 = vmatmul.bf16.vlgmr.msra.gmra.mxu0 %v206_v62  ;;  %v4212_v62 = vld [vmem:[%s8386_s7 + $0x260] sm:$0xf]  ;;  %v4741_v56 = vor.u32 %v5528_v47, %v4740_v40 }
 0x138   :  { %v4213_v3 = vor.u32 %v5396_v0, %v4212_v62  ;;  %v4516_v62 = vld [vmem:[%s8386_s7 + $0x4c0] sm:$0xf] }
 0x139   :  { %2606 = vmatpush.bf16.msrb.mxu2 %v4661_v55  ;;  %2632 = vmatpush.bf16.msra.mxu0 %v4917_v61 }
 0x13a   :  { %2571 = vmatpush.bf16.msra.mxu3 %v4213_v3  ;;  %v4517_v3 = vor.u32 %v5472_v63, %v4516_v62  ;;  %v4596_v62 = vld [vmem:[%s8386_s7 + $0x560] sm:$0xf]  ;;  %v5492_v63 = vld [vmem:[%s8386_s7 + $0x56c] sm:$0xf0] }
 0x13e   :  { %2572 = vmatpush.bf16.msra.mxu3 %v4197_v18 }
 0x142   :  { %2573 = vmatpush.bf16.msra.mxu3 %v4181_v32  ;;  %v4884_v32 = vld [vmem:[%s8386_s7 + $0x7a0] sm:$0xf] }
 0x146   :  { %681 = vmatmul.bf16.gmra.mxu1 %v207_v8  ;;  %700 = vmatmul.bf16.gmra.mxu2 %v207_v8 }
 0x147   :  { %719 = vmatmul.bf16.gmra.mxu3 %v207_v8  ;;  %738 = vmatmul.bf16.gmra.mxu0 %v207_v8  ;;  %v5328_v8 = vld [vmem:[%s8386_s7 + $0x4c] sm:$0xf0] }
 0x148   :  { %v3941_v10 = vor.u32 %v5328_v8, %v3940_v7  ;;  %2574 = vmatpush.bf16.msra.mxu3 %v4165_v14  ;;  %v4645_v8 = vor.u32 %v5504_v6, %v4644_v4  ;;  %v4724_v4 = vld [vmem:[%s8386_s7 + $0x660] sm:$0xf]  ;;  %v5524_v6 = vld [vmem:[%s8386_s7 + $0x66c] sm:$0xf0] }
 0x14a   :  { %2546 = vmatpush.bf16.msra.mxu1 %v3941_v10  ;;  %2607 = vmatpush.bf16.msrb.mxu2 %v4645_v8 }
 0x14c   :  { %2619 = vmatpush.bf16.msrb.mxu3 %v4789_v60 }
 0x14e   :  { %2547 = vmatpush.bf16.msra.mxu1 %v3925_v26 }
 0x152   :  { %2548 = vmatpush.bf16.msra.mxu1 %v3909_v42 }
 0x156   :  { %2593 = vmatpush.bf16.msrb.mxu1 %v4533_v49 }
 0x15a   :  { %2594 = vmatpush.bf16.msrb.mxu1 %v4517_v3  ;;  %v4597_v3 = vor.u32 %v5492_v63, %v4596_v62  ;;  %v5548_v62 = vld [vmem:[%s8386_s7 + $0x72c] sm:$0xf0] }
 0x192   :  { %v6331_v2 = vpop.f32.mrf.mxu1 }
 0x193   :  { %v6336_v5 = vpop.f32.mrf.mxu0 }
 0x198   :  { %v620_v25 = vpop.f32.mrf.mxu2 }
 0x199   :  { %v639_v30 = vpop.f32.mrf.mxu3 }
 0x19a   :  { %v603_v35 = vpop.f32.mrf.mxu1 }
 0x19b   :  { %v660_v37 = vpop.f32.mrf.mxu0  ;;  %v744_v53 = vmax.f32 %v6331_v2, %v603_v35  ;;  %v4501_v35 = vor.u32 %v5468_v23, %v4500_v21  ;;  %v5456_v21 = vld [vmem:[%s8386_s7 + $0x44c] sm:$0xf0]  ;;  %v4580_v23 = vld [vmem:[%s8386_s7 + $0x540] sm:$0xf] }
 0x19c   :  { %v765_v0 = vmax.f32 %v6336_v5, %v660_v37  ;;  %v4772_v5 = vld [vmem:[%s8386_s7 + $0x6c0] sm:$0xf]  ;;  %v5564_v37 = vld [vmem:[%s8386_s7 + $0x7ac] sm:$0xf0] }
 0x19d   :  { %v745_v10 = vrot.slane %v744_v53, 4  ;;  %v4773_v12 = vor.u32 %v5536_v9, %v4772_v5  ;;  %2595 = vmatpush.bf16.msrb.mxu1 %v4501_v35  ;;  %v4885_v17 = vor.u32 %v5564_v37, %v4884_v32  ;;  %v4836_v35 = vld [vmem:[%s8386_s7 + $0x740] sm:$0xf] }
 0x19e   :  { %v766_v15 = vrot.slane %v765_v0, 4 }
 0x19f   :  { %2620 = vmatpush.bf16.msrb.mxu3 %v4773_v12  ;;  %v6463_v22 = vmax.f32 %v744_v53, %v745_v10  ;;  %v5560_v53 = vld [vmem:[%s8386_s7 + $0x78c] sm:$0xf0]  ;;  %v4725_v10 = vor.u32 %v5524_v6, %v4724_v4  ;;  %v4452_v12 = vld [vmem:[%s8386_s7 + $0x440] sm:$0xf] }
 0x1a0   :  { %v622_v54 = vpop.f32.mrf.mxu2  ;;  %v767_v41 = vmax.f32 %v765_v0, %v766_v15  ;;  %v4869_v61 = vor.u32 %v5560_v53, %v4868_v52  ;;  %v4453_v32 = vor.u32 %v5456_v21, %v4452_v12  ;;  %v4420_v4 = vld [vmem:[%s8386_s7 + $0x400] sm:$0xf]  ;;  %v5448_v6 = vld [vmem:[%s8386_s7 + $0x40c] sm:$0xf0] }
 0x1a1   :  { %v641_v59 = vpop.f32.mrf.mxu3  ;;  %v751_v1 = vmax.f32 %v620_v25, %v622_v54  ;;  %v5500_v25 = vld [vmem:[%s8386_s7 + $0x5ac] sm:$0xf0]  ;;  %v747_v39 = vrot.slane %v6463_v22, 2  ;;  %2596 = vmatpush.bf16.msrb.mxu1 %v4485_v50 }
 0x1a2   :  { %v758_v2 = vmax.f32 %v639_v30, %v641_v59  ;;  %v4901_v30 = vor.u32 %v5568_v20, %v4900_v19  ;;  %v4629_v36 = vor.u32 %v5500_v25, %v4628_v24  ;;  %v768_v59 = vrot.slane %v767_v41, 2  ;;  %v5480_v12 = vld [vmem:[%s8386_s7 + $0x50c] sm:$0xf0] }
 0x1a3   :  { %v606_v7 = vpop.f32.mrf.mxu1  ;;  %v752_v16 = vrot.slane %v751_v1, 4  ;;  %2621 = vmatpush.bf16.msrb.mxu3 %v4757_v44  ;;  %v6539_v15 = vmax.f32 %v6463_v22, %v747_v39 }
 0x1a4   :  { %v663_v11 = vpop.f32.mrf.mxu0  ;;  %v759_v18 = vrot.slane %v758_v2, 4  ;;  %2633 = vmatpush.bf16.msra.mxu0 %v4901_v30  ;;  %2608 = vmatpush.bf16.msrb.mxu2 %v4629_v36  ;;  %v769_v24 = vmax.f32 %v767_v41, %v768_v59  ;;  %v5552_v41 = vld [vmem:[%s8386_s7 + $0x74c] sm:$0xf0]  ;;  %v941_v59 = vperm.slane %v6566_v38, 1 }
 0x1a5   :  { %v753_v28 = vmax.f32 %v751_v1, %v752_v16  ;;  %v4837_v47 = vor.u32 %v5552_v41, %v4836_v35 }
 0x1a6   :  { %v760_v33 = vmax.f32 %v758_v2, %v759_v18  ;;  %v4469_v2 = vor.u32 %v5460_v58, %v4468_v57 }
 0x1a7   :  { %v754_v48 = vrot.slane %v753_v28, 2  ;;  %2622 = vmatpush.bf16.msrb.mxu3 %v4741_v56  ;;  %v4820_v56 = vld [vmem:[%s8386_s7 + $0x720] sm:$0xf] }
 0x1a8   :  { %v761_v54 = vrot.slane %v760_v33, 2  ;;  %2634 = vmatpush.bf16.msra.mxu0 %v4885_v17  ;;  %2609 = vmatpush.bf16.msrb.mxu2 %v4613_v51  ;;  %v770_v17 = vrot.slane %v769_v24, 1 }
 0x1a9   :  { %v625_v26 = vpop.f32.mrf.mxu2  ;;  %v755_v8 = vmax.f32 %v753_v28, %v754_v48  ;;  %v5488_v28 = vld [vmem:[%s8386_s7 + $0x54c] sm:$0xf0]  ;;  %2597 = vmatpush.bf16.msrb.mxu1 %v4469_v2  ;;  %v943_v2 = vperm.slane %v6566_v38, 3 }
 0x1aa   :  { %v644_v29 = vpop.f32.mrf.mxu3  ;;  %v762_v16 = vmax.f32 %v760_v33, %v761_v54  ;;  %v4581_v33 = vor.u32 %v5488_v28, %v4580_v23  ;;  %v5484_v48 = vld [vmem:[%s8386_s7 + $0x52c] sm:$0xf0]  ;;  %v4676_v23 = vld [vmem:[%s8386_s7 + $0x600] sm:$0xf] }
 0x1ab   :  { %v608_v34 = vpop.f32.mrf.mxu1  ;;  %v756_v36 = vrot.slane %v755_v8, 1  ;;  %2623 = vmatpush.bf16.msrb.mxu3 %v4725_v10  ;;  %v4821_v10 = vor.u32 %v5548_v62, %v4820_v56 }
 0x1ac   :  { %v800_v42 = vmax.f32 %v606_v7, %v608_v34  ;;  %v665_v43 = vpop.f32.mrf.mxu0  ;;  %v4852_v7 = vld [vmem:[%s8386_s7 + $0x760] sm:$0xf]  ;;  %2635 = vmatpush.bf16.msra.mxu0 %v4869_v61  ;;  %2610 = vmatpush.bf16.msrb.mxu2 %v4597_v3  ;;  %v5520_v34 = vld [vmem:[%s8386_s7 + $0x64c] sm:$0xf0]  ;;  %v763_v44 = vrot.slane %v762_v16, 1 }
 0x1ad   :  { %v821_v14 = vmax.f32 %v663_v11, %v665_v43  ;;  %v5556_v11 = vld [vmem:[%s8386_s7 + $0x76c] sm:$0xf0]  ;;  %v749_v43 = vrot.slane %v6539_v15, 1  ;;  %2598 = vmatpush.bf16.msrb.mxu1 %v4453_v32  ;;  %v757_v57 = vmax.f32 %v755_v8, %v756_v36 }
 0x1ae   :  { %v801_v49 = vrot.slane %v800_v42, 4  ;;  %v4853_v22 = vor.u32 %v5556_v11, %v4852_v7  ;;  %v764_v63 = vmax.f32 %v762_v16, %v763_v44  ;;  %v771_v7 = vmax.f32 %v769_v24, %v770_v17  ;;  %v4548_v11 = vld [vmem:[%s8386_s7 + $0x500] sm:$0xf]  ;;  %v5512_v24 = vld [vmem:[%s8386_s7 + $0x60c] sm:$0xf0] }
 0x1af   :  { %v822_v55 = vrot.slane %v821_v14, 4  ;;  %v4549_v21 = vor.u32 %v5480_v12, %v4548_v11  ;;  %v4677_v28 = vor.u32 %v5512_v24, %v4676_v23 }
 0x1b0   :  { %v802_v60 = vmax.f32 %v800_v42, %v801_v49  ;;  %v4436_v42 = vld [vmem:[%s8386_s7 + $0x420] sm:$0xf]  ;;  %2636 = vmatpush.bf16.msra.mxu0 %v4853_v22  ;;  %2611 = vmatpush.bf16.msrb.mxu2 %v4581_v33  ;;  %v940_v33 = vperm.slane %v6566_v38, 0 }
 0x1b1   :  { %v823_v0 = vmax.f32 %v821_v14, %v822_v55  ;;  %v627_v1 = vpop.f32.mrf.mxu2  ;;  %v4564_v14 = vld [vmem:[%s8386_s7 + $0x520] sm:$0xf]  ;;  %v4437_v53 = vor.u32 %v5452_v13, %v4436_v42  ;;  %v5516_v55 = vld [vmem:[%s8386_s7 + $0x62c] sm:$0xf0] }
 0x1b2   :  { %v807_v5 = vmax.f32 %v625_v26, %v627_v1  ;;  %v646_v9 = vpop.f32.mrf.mxu3  ;;  %v803_v25 = vrot.slane %v802_v60, 2  ;;  %v4692_v49 = vld [vmem:[%s8386_s7 + $0x620] sm:$0xf]  ;;  %v4565_v54 = vor.u32 %v5484_v48, %v4564_v14  ;;  %v942_v1 = vperm.slane %v6566_v38, 2 }
 0x1b3   :  { %v824_v18 = vrot.slane %v823_v0, 2  ;;  %v814_v19 = vmax.f32 %v644_v29, %v646_v9  ;;  %v6541_v20 = vpop.f32.mrf.mxu1  ;;  %v4708_v29 = vld [vmem:[%s8386_s7 + $0x640] sm:$0xf]  ;;  %v4693_v61 = vor.u32 %v5516_v55, %v4692_v49  ;;  %2599 = vmatpush.bf16.msrb.mxu1 %v4437_v53 }
 0x1b4   :  { %v808_v26 = vrot.slane %v807_v5, 4  ;;  %v6549_v27 = vpop.f32.mrf.mxu0  ;;  %v4709_v39 = vor.u32 %v5520_v34, %v4708_v29  ;;  %v804_v46 = vmax.f32 %v802_v60, %v803_v25  ;;  %2637 = vmatpush.bf16.msra.mxu0 %v4837_v47  ;;  %2612 = vmatpush.bf16.msrb.mxu2 %v4565_v54  ;;  %v750_v25 = vmax.f32 %v6539_v15, %v749_v43  ;;  %v4804_v29 = vld [vmem:[%s8386_s7 + $0x700] sm:$0xf] }
 0x1b5   :  { %v825_v30 = vmax.f32 %v823_v0, %v824_v18  ;;  %v815_v31 = vrot.slane %v814_v19, 4  ;;  %v948_v34 = vrot.slane %v941_v59, 6  ;;  %v949_v15 = vrot.slane %v942_v1, 4 }
 0x1b6   :  { %v809_v37 = vmax.f32 %v807_v5, %v808_v26  ;;  %2624 = vmatpush.bf16.msrb.mxu3 %v4709_v39  ;;  %v805_v8 = vrot.slane %v804_v46, 1  ;;  %v880_v26 = vrot.slane %v757_v57, 6  ;;  %v882_v39 = vrot.slane %v771_v7, 2 }
 0x1b7   :  { %v816_v45 = vmax.f32 %v814_v19, %v815_v31  ;;  %v826_v50 = vrot.slane %v825_v30, 1  ;;  %v4421_v19 = vor.u32 %v5448_v6, %v4420_v4  ;;  %v881_v31 = vrot.slane %v764_v63, 4 }
 0x1b8   :  { %v810_v40 = vrot.slane %v809_v37, 2  ;;  %v806_v35 = vmax.f32 %v804_v46, %v805_v8  ;;  %2638 = vmatpush.bf16.msra.mxu0 %v4821_v10  ;;  %v950_v43 = vrot.slane %v943_v2, 2  ;;  %2613 = vmatpush.bf16.msrb.mxu2 %v4549_v21 }
 0x1b9   :  { %v817_v51 = vrot.slane %v816_v45, 2  ;;  %v6587_v52 = vpop.f32.mrf.mxu2  ;;  %v827_v16 = vmax.f32 %v825_v30, %v826_v50  ;;  %v5544_v30 = vld [vmem:[%s8386_s7 + $0x70c] sm:$0xf0]  ;;  %2600 = vmatpush.bf16.msrb.mxu1 %v4421_v19  ;;  %v895_v46 = vsel %vm894_vm2, %v881_v31, %v882_v39  ;;  %v4022_v19 = vld [vmem:[%s8386_s7 + $0xf0] sm:$0xf0] }
 0x1ba   :  { %v811_v58 = vmax.f32 %v809_v37, %v810_v40  ;;  %v715_v60 = vpop.f32.mrf.mxu3  ;;  %2625 = vmatpush.bf16.msrb.mxu3 %v4693_v61  ;;  %v4805_v37 = vor.u32 %v5544_v30, %v4804_v29  ;;  %v955_v55 = vsel %vm894_vm2, %v949_v15, %v950_v43  ;;  %v5378_v29 = vld [vmem:[%s8386_s7 + $0x1e4] sm:$0xf]  ;;  %v4150_v30 = vld [vmem:[%s8386_s7 + $0x1f0] sm:$0xf0] }
 0x1bb   :  { %v818_v0 = vmax.f32 %v816_v45, %v817_v51  ;;  %v679_v3 = vpop.f32.mrf.mxu1  ;;  %v888_v41 = vrot.slane %v827_v16, 2  ;;  %v893_v45 = vsel %vm892_vm1, %v750_v25, %v880_v26  ;;  %v6660_v31 = vld [vmem:[%s8386_s7 + $0x2e4] sm:$0xf] }
 0x1bc   :  { %v812_v5 = vrot.slane %v811_v58, 1  ;;  %v736_v9 = vpop.f32.mrf.mxu0  ;;  %v772_v14 = vmax.f32 %v6541_v20, %v679_v3  ;;  %2639 = vmatpush.bf16.msra.mxu0 %v4805_v37  ;;  %v954_v20 = vsel %vm892_vm1, %v940_v33, %v948_v34  ;;  %v897_v56 = vsel %vm896_vm3, %v893_v45, %v895_v46  ;;  %v6671_v15 = vld [vmem:[%s8386_s7 + $0x3e4] sm:$0xf]  ;;  %v6676_v37 = vld [vmem:[%s8386_s7 + $0x3f0] sm:$0xf0] }
 0x1bd   :  { %v819_v18 = vrot.slane %v818_v0, 1  ;;  %v793_v51 = vmax.f32 %v6549_v27, %v736_v9  ;;  %v956_v27 = vsel %vm896_vm3, %v954_v20, %v955_v55  ;;  %v6686_v45 = vld [vmem:[%s8386_s7 + $0xd0] sm:$0xf0]  ;;  %v4153_v46 = vor.u32 %v5378_v29, %v4150_v30  ;;  %v5370_v30 = vld [vmem:[%s8386_s7 + $0x1a4] sm:$0xf] }
 0x1be   :  { %v813_v22 = vmax.f32 %v811_v58, %v812_v5  ;;  %2626 = vmatpush.bf16.msrb.mxu3 %v4677_v28  ;;  %v773_v57 = vrot.slane %v772_v14, 4  ;;  %v945_v20 = vperm.slane %v6566_v38, 5 }
 0x1bf   :  { %v820_v32 = vmax.f32 %v818_v0, %v819_v18  ;;  %v794_v61 = vrot.slane %v793_v51, 4  ;;  %v6646_v18 = vld [vmem:[%s8386_s7 + $0xe4] sm:$0xf] }
 0x1c0   :  { %v886_v36 = vrot.slane %v813_v22, 6  ;;  %v774_v1 = vmax.f32 %v772_v14, %v773_v57 }
 0x1c1   :  { %v887_v42 = vrot.slane %v820_v32, 4  ;;  %v698_v44 = vpop.f32.mrf.mxu2  ;;  %v795_v8 = vmax.f32 %v793_v51, %v794_v61  ;;  %v6699_v51 = vld [vmem:[%s8386_s7 + $0x1d0] sm:$0xf0] }
 0x1c2   :  { %v901_v13 = vsel %vm892_vm1, %v806_v35, %v886_v36  ;;  %v717_v17 = vpop.f32.mrf.mxu3  ;;  %v779_v47 = vmax.f32 %v6587_v52, %v698_v44  ;;  %v775_v12 = vrot.slane %v774_v1, 2  ;;  %v4025_v35 = vor.u32 %v6646_v18, %v4022_v19  ;;  %v4278_v36 = vld [vmem:[%s8386_s7 + $0x2f0] sm:$0xf0]  ;;  %v6681_v44 = vld [vmem:[%s8386_s7 + $0xc4] sm:$0xf] }
 0x1c3   :  { %v902_v40 = vsel %vm894_vm2, %v887_v42, %v888_v41  ;;  %v786_v48 = vmax.f32 %v715_v60, %v717_v17  ;;  %v682_v49 = vpop.f32.mrf.mxu1  ;;  %v796_v25 = vrot.slane %v795_v8, 2  ;;  %v4262_v61 = vld [vmem:[%s8386_s7 + $0x2d0] sm:$0xf0] }
 0x1c4   :  { %v903_v50 = vsel %vm896_vm3, %v901_v13, %v902_v40  ;;  %v739_v53 = vpop.f32.mrf.mxu0  ;;  %v780_v58 = vrot.slane %v779_v47, 4  ;;  %v6662_v32 = vmax.f32 %v774_v1, %v775_v12  ;;  %v5438_v12 = vld [vmem:[%s8386_s7 + $0x3c4] sm:$0xf] }
 0x1c5   :  { %v911_v54 = vrot.slane %v903_v50, 7  ;;  %v787_v59 = vrot.slane %v786_v48, 4  ;;  %v797_v13 = vmax.f32 %v795_v8, %v796_v25  ;;  %v6694_v50 = vld [vmem:[%s8386_s7 + $0x1c4] sm:$0xf]  ;;  %v3990_v25 = vld [vmem:[%s8386_s7 + $0xb0] sm:$0xf0] }
 0x1c6   :  { %v781_v4 = vmax.f32 %v779_v47, %v780_v58 }
 0x1c7   :  { %v913_v52 = vsel %vm912_vm4, %v911_v54, %v897_v56  ;;  %v788_v6 = vmax.f32 %v786_v48, %v787_v59  ;;  %v4281_v48 = vor.u32 %v6660_v31, %v4278_v36  ;;  %v4009_v56 = vor.u32 %v6681_v44, %v6686_v45  ;;  %v4118_v31 = vld [vmem:[%s8386_s7 + $0x1b0] sm:$0xf0]  ;;  %v5434_v44 = vld [vmem:[%s8386_s7 + $0x3a4] sm:$0xf] }
 0x1c8   :  { %v915_v60 = vsel %vm914_vm5, %v911_v54, %v913_v52  ;;  %v782_v21 = vrot.slane %v781_v4, 2  ;;  %v4374_v45 = vld [vmem:[%s8386_s7 + $0x3b0] sm:$0xf0] }
 0x1c9   :  { %v917_v62 = vsel %vm916_vm6, %v911_v54, %v915_v60  ;;  %v701_v63 = vpop.f32.mrf.mxu2  ;;  %v789_v23 = vrot.slane %v788_v6, 2 }
 0x1ca   :  { %v919_v0 = vsel %vm918_vm7, %v911_v54, %v917_v62  ;;  %v720_v2 = vpop.f32.mrf.mxu3  ;;  %v783_v39 = vmax.f32 %v781_v4, %v782_v21  ;;  %v798_v62 = vrot.slane %v797_v13, 1 }
 0x1cb   :  { %v962_v3 = vadd.f32 %v956_v27, %v919_v0  ;;  %v684_v7 = vpop.f32.mrf.mxu1  ;;  %v790_v41 = vmax.f32 %v788_v6, %v789_v23  ;;  %v5406_v27 = vld [vmem:[%s8386_s7 + $0x2c4] sm:$0xf]  ;;  %v946_v6 = vperm.slane %v6566_v38, 6  ;;  %v944_v23 = vperm.slane %v6566_v38, 4 }
 0x1cc   :  { %v828_v5 = vmax.f32 %v682_v49, %v684_v7  ;;  %v741_v9 = vpop.f32.mrf.mxu0  ;;  %v4409_v49 = vor.u32 %v6671_v15, %v6676_v37  ;;  %v784_v57 = vrot.slane %v783_v39, 1  ;;  %v4265_v29 = vor.u32 %v5406_v27, %v4262_v61  ;;  %v5402_v15 = vld [vmem:[%s8386_s7 + $0x2a4] sm:$0xf]  ;;  %v4246_v37 = vld [vmem:[%s8386_s7 + $0x2b0] sm:$0xf0] }
 0x1cd   :  { %v964_v10 = vmax.f32 %v962_v3, 0.0  ;;  %v849_v11 = vmax.f32 %v739_v53, %v741_v9  ;;  %v777_v53 = vrot.slane %v6662_v32, 1  ;;  %v791_v52 = vrot.slane %v790_v41, 1 }
 0x1ce   :  { %v829_v16 = vrot.slane %v828_v5, 4  ;;  %v947_v9 = vperm.slane %v6566_v38, 7  ;;  %v785_v18 = vmax.f32 %v783_v39, %v784_v57  ;;  %v5426_v38 = vld [vmem:[%s8386_s7 + $0x364] sm:$0xf] }
 0x1cf   :  { %968 = vst [vmem:[#allocation1] ss:$4 sm:$0xff] %v964_v10  ;;  %v850_v24 = vrot.slane %v849_v11, 4  ;;  %v792_v19 = vmax.f32 %v790_v41, %v791_v52  ;;  %v952_v41 = vrot.slane %v946_v6, 4  ;;  %v4377_v52 = vor.u32 %v5434_v44, %v4374_v45  ;;  %v4326_v44 = vld [vmem:[%s8386_s7 + $0x350] sm:$0xf0] }
 0x1d0   :  { %v830_v26 = vmax.f32 %v828_v5, %v829_v16  ;;  %v4390_v16 = vld [vmem:[%s8386_s7 + $0x3d0] sm:$0xf0] }
 0x1d1   :  { %v851_v22 = vmax.f32 %v849_v11, %v850_v24  ;;  %v703_v28 = vpop.f32.mrf.mxu2  ;;  %v4137_v11 = vor.u32 %v6694_v50, %v6699_v51  ;;  %v5338_v24 = vld [vmem:[%s8386_s7 + $0xa4] sm:$0xf]  ;;  %v4393_v36 = vor.u32 %v5438_v12, %v4390_v16  ;;  %v4249_v51 = vor.u32 %v5402_v15, %v4246_v37 }
 0x1d2   :  { %v835_v33 = vmax.f32 %v701_v63, %v703_v28  ;;  %v722_v34 = vpop.f32.mrf.mxu3  ;;  %v831_v14 = vrot.slane %v830_v26, 2  ;;  %v5390_v37 = vld [vmem:[%s8386_s7 + $0x244] sm:$0xf] }
 0x1d3   :  { %v852_v42 = vrot.slane %v851_v22, 2  ;;  %v842_v43 = vmax.f32 %v720_v2, %v722_v34 }
 0x1d4   :  { %v836_v17 = vrot.slane %v835_v33, 4  ;;  %v832_v63 = vmax.f32 %v830_v26, %v831_v14  ;;  %v799_v26 = vmax.f32 %v797_v13, %v798_v62  ;;  %v883_v13 = vrot.slane %v785_v18, 6 }
 0x1d5   :  { %v853_v40 = vmax.f32 %v851_v22, %v852_v42  ;;  %v843_v47 = vrot.slane %v842_v43, 4  ;;  %v953_v42 = vrot.slane %v947_v9, 2  ;;  %v884_v14 = vrot.slane %v792_v19, 4  ;;  %v4086_v9 = vld [vmem:[%s8386_s7 + $0x170] sm:$0xf0] }
 0x1d6   :  { %v837_v54 = vmax.f32 %v835_v33, %v836_v17  ;;  %v971_v55 = vld.sshfl [vmem:[#allocation1] sm:$0xff pattern:$0x73625140]  ;;  %v972_v60 = vld.sshfl [vmem:[#allocation1 + $0x8] sm:$0xff pattern:$0x73625140] }
 0x1d7   :  { %v844_v58 = vmax.f32 %v842_v43, %v843_v47  ;;  %v6705_v59 = vpack.c.bf16 %v971_v55, %v971_v55  ;;  %v6713_v1 = vpack.c.bf16 %v972_v60, %v972_v60  ;;  %v973_v2 = vld.sshfl [vmem:[#allocation1 + $0x10] sm:$0xff pattern:$0x73625140]  ;;  %v854_v3 = vrot.slane %v853_v40, 1  ;;  %v5394_v19 = vld [vmem:[%s8386_s7 + $0x264] sm:$0xf] }
 0x1d8   :  { %v838_v0 = vrot.slane %v837_v54, 2  ;;  %v6717_v7 = vpack.c.bf16 %v973_v2, %v973_v2  ;;  %v974_v8 = vld.sshfl [vmem:[#allocation1 + $0x18] sm:$0xff pattern:$0x73625140]  ;;  %v833_v22 = vrot.slane %v832_v63, 1  ;;  %v3993_v43 = vor.u32 %v5338_v24, %v3990_v25 }
 0x1d9   :  { %v845_v4 = vrot.slane %v844_v58, 2  ;;  %2549 = vmatmul.bf16.vlgmr.msra.gmra.mxu1 %v6705_v59  ;;  %2562 = vmatmul.bf16.vlgmr.msra.gmra.mxu2 %v6713_v1  ;;  %v6721_v10 = vpack.c.bf16 %v974_v8, %v974_v8  ;;  %v855_v33 = vmax.f32 %v853_v40, %v854_v3  ;;  %v5334_v40 = vld [vmem:[%s8386_s7 + $0x84] sm:$0xf]  ;;  %v3974_v47 = vld [vmem:[%s8386_s7 + $0x90] sm:$0xf0]  ;;  %v778_v55 = vmax.f32 %v6662_v32, %v777_v53 }
 0x1da   :  { %v839_v5 = vmax.f32 %v837_v54, %v838_v0  ;;  %2645 = vmatpush.bf16.msra.mxu1 %v4025_v35  ;;  %2575 = vmatmul.bf16.vlgmr.msra.gmra.mxu3 %v6717_v7  ;;  %v951_v35 = vrot.slane %v945_v20, 6  ;;  %v5366_v54 = vld [vmem:[%s8386_s7 + $0x184] sm:$0xf]  ;;  %v4102_v20 = vld [vmem:[%s8386_s7 + $0x190] sm:$0xf0]  ;;  %v3977_v61 = vor.u32 %v5334_v40, %v3974_v47  ;;  %v958_v16 = vsel %vm894_vm2, %v952_v41, %v953_v42 }
 0x1db   :  { %v846_v21 = vmax.f32 %v844_v58, %v845_v4  ;;  %2658 = vmatpush.bf16.msra.mxu2 %v4153_v46  ;;  %2588 = vmatmul.bf16.vlgmr.msrb.gmra.mxu0 %v6721_v10  ;;  %v4121_v46 = vor.u32 %v5370_v30, %v4118_v31  ;;  %v5398_v58 = vld [vmem:[%s8386_s7 + $0x284] sm:$0xf]  ;;  %v4230_v60 = vld [vmem:[%s8386_s7 + $0x290] sm:$0xf0]  ;;  %v898_v62 = vsel %vm892_vm1, %v778_v55, %v883_v13 }
 0x1dc   :  { %v840_v28 = vrot.slane %v839_v5, 1  ;;  %2671 = vmatpush.bf16.msra.mxu3 %v4281_v48  ;;  %2684 = vmatpush.bf16.msrb.mxu0 %v4409_v49  ;;  %v885_v48 = vrot.slane %v799_v26, 2  ;;  %v834_v49 = vmax.f32 %v832_v63, %v833_v22  ;;  %v5430_v32 = vld [vmem:[%s8386_s7 + $0x384] sm:$0xf]  ;;  %v4358_v53 = vld [vmem:[%s8386_s7 + $0x390] sm:$0xf0]  ;;  %v4105_v2 = vor.u32 %v5366_v54, %v4102_v20 }
 0x1dd   :  { %v847_v34 = vrot.slane %v846_v21, 1  ;;  %v5330_v3 = vld [vmem:[%s8386_s7 + $0x64] sm:$0xf]  ;;  %v3958_v4 = vld [vmem:[%s8386_s7 + $0x70] sm:$0xf0]  ;;  %v4233_v8 = vor.u32 %v5398_v58, %v4230_v60  ;;  %v957_v12 = vsel %vm892_vm1, %v944_v23, %v951_v35  ;;  %v4361_v18 = vor.u32 %v5430_v32, %v4358_v53 }
 0x1de   :  { %v841_v39 = vmax.f32 %v839_v5, %v840_v28  ;;  %2646 = vmatpush.bf16.msra.mxu1 %v4009_v56  ;;  %v891_v56 = vrot.slane %v855_v33, 2  ;;  %v899_v63 = vsel %vm894_vm2, %v884_v14, %v885_v48  ;;  %v5362_v5 = vld [vmem:[%s8386_s7 + $0x164] sm:$0xf]  ;;  %v3961_v25 = vor.u32 %v5330_v3, %v3958_v4  ;;  %v4342_v23 = vld [vmem:[%s8386_s7 + $0x370] sm:$0xf0] }
 0x1df   :  { %v848_v17 = vmax.f32 %v846_v21, %v847_v34  ;;  %2659 = vmatpush.bf16.msra.mxu2 %v4137_v11  ;;  %v4214_v21 = vld [vmem:[%s8386_s7 + $0x270] sm:$0xf0]  ;;  %v900_v24 = vsel %vm896_vm3, %v898_v62, %v899_v63  ;;  %v4089_v22 = vor.u32 %v5362_v5, %v4086_v9  ;;  %v5326_v28 = vld [vmem:[%s8386_s7 + $0x44] sm:$0xf]  ;;  %v959_v31 = vsel %vm896_vm3, %v957_v12, %v958_v16 }
 0x1e0   :  { %v889_v50 = vrot.slane %v841_v39, 6  ;;  %2672 = vmatpush.bf16.msra.mxu3 %v4265_v29  ;;  %2685 = vmatpush.bf16.msrb.mxu0 %v4393_v36  ;;  %v3942_v29 = vld [vmem:[%s8386_s7 + $0x50] sm:$0xf0]  ;;  %v4217_v33 = vor.u32 %v5394_v19, %v4214_v21  ;;  %v5358_v34 = vld [vmem:[%s8386_s7 + $0x144] sm:$0xf]  ;;  %v4345_v15 = vor.u32 %v5426_v38, %v4342_v23 }
 0x1e1   :  { %v890_v57 = vrot.slane %v848_v17, 4  ;;  %v4070_v35 = vld [vmem:[%s8386_s7 + $0x150] sm:$0xf0]  ;;  %v3945_v42 = vor.u32 %v5326_v28, %v3942_v29  ;;  %v5322_v14 = vld [vmem:[%s8386_s7 + $0x24] sm:$0xf] }
 0x1e2   :  { %v904_v27 = vsel %vm892_vm1, %v834_v49, %v889_v50  ;;  %2647 = vmatpush.bf16.msra.mxu1 %v3993_v43  ;;  %v4198_v39 = vld [vmem:[%s8386_s7 + $0x250] sm:$0xf0]  ;;  %v5422_v43 = vld [vmem:[%s8386_s7 + $0x344] sm:$0xf]  ;;  %v4073_v13 = vor.u32 %v5358_v34, %v4070_v35 }
 0x1e3   :  { %v905_v0 = vsel %vm894_vm2, %v890_v57, %v891_v56  ;;  %2660 = vmatpush.bf16.msra.mxu2 %v4121_v46  ;;  %v3926_v17 = vld [vmem:[%s8386_s7 + $0x30] sm:$0xf0]  ;;  %v4201_v46 = vor.u32 %v5390_v37, %v4198_v39  ;;  %v5354_v40 = vld [vmem:[%s8386_s7 + $0x124] sm:$0xf]  ;;  %v4329_v49 = vor.u32 %v5422_v43, %v4326_v44 }
 0x1e4   :  { %v906_v6 = vsel %vm896_vm3, %v904_v27, %v905_v0  ;;  %2673 = vmatpush.bf16.msra.mxu3 %v4249_v51  ;;  %2686 = vmatpush.bf16.msrb.mxu0 %v4377_v52  ;;  %v4054_v47 = vld [vmem:[%s8386_s7 + $0x130] sm:$0xf0]  ;;  %v5386_v50 = vld [vmem:[%s8386_s7 + $0x224] sm:$0xf]  ;;  %v3929_v54 = vor.u32 %v5322_v14, %v3926_v17 }
 0x1e5   :  { %v922_v11 = vrot.slane %v906_v6, 7  ;;  %v4182_v51 = vld [vmem:[%s8386_s7 + $0x230] sm:$0xf0]  ;;  %v5418_v20 = vld [vmem:[%s8386_s7 + $0x324] sm:$0xf]  ;;  %v4057_v56 = vor.u32 %v5354_v40, %v4054_v47 }
 0x1e6   :  { %2648 = vmatpush.bf16.msra.mxu1 %v3977_v61  ;;  %v4310_v55 = vld [vmem:[%s8386_s7 + $0x330] sm:$0xf0]  ;;  %v5318_v57 = vld [vmem:[%s8386_s7 + $0x4] sm:$0xf]  ;;  %v4185_v58 = vor.u32 %v5386_v50, %v4182_v51 }
 0x1e7   :  { %v923_v26 = vsel %vm912_vm4, %v922_v11, %v900_v24  ;;  %2661 = vmatpush.bf16.msra.mxu2 %v4105_v2  ;;  %v3910_v52 = vld [vmem:[%s8386_s7 + $0x10] sm:$0xf0]  ;;  %v5350_v60 = vld [vmem:[%s8386_s7 + $0x104] sm:$0xf]  ;;  %v4313_v61 = vor.u32 %v5418_v20, %v4310_v55 }
 0x1e8   :  { %v924_v30 = vsel %vm914_vm5, %v922_v11, %v923_v26  ;;  %2674 = vmatpush.bf16.msra.mxu3 %v4233_v8  ;;  %2687 = vmatpush.bf16.msrb.mxu0 %v4361_v18  ;;  %v4038_v27 = vld [vmem:[%s8386_s7 + $0x110] sm:$0xf0]  ;;  %v5382_v32 = vld [vmem:[%s8386_s7 + $0x204] sm:$0xf]  ;;  %v3913_v62 = vor.u32 %v5318_v57, %v3910_v52 }
 0x1e9   :  { %v925_v36 = vsel %vm916_vm6, %v922_v11, %v924_v30  ;;  %v4166_v53 = vld [vmem:[%s8386_s7 + $0x210] sm:$0xf0]  ;;  %v5414_v63 = vld [vmem:[%s8386_s7 + $0x304] sm:$0xf]  ;;  %v4041_v2 = vor.u32 %v5350_v60, %v4038_v27 }
 0x1ea   :  { %v926_v41 = vsel %vm918_vm7, %v922_v11, %v925_v36  ;;  %2649 = vmatpush.bf16.msra.mxu1 %v3961_v25  ;;  %v4294_v0 = vld [vmem:[%s8386_s7 + $0x310] sm:$0xf0]  ;;  %v5474_v3 = vld [vmem:[%s8386_s7 + $0x4e4] sm:$0xf]  ;;  %v4169_v6 = vor.u32 %v5382_v32, %v4166_v53 }
 0x1eb   :  { %v963_v45 = vadd.f32 %v959_v31, %v926_v41  ;;  %2662 = vmatpush.bf16.msra.mxu2 %v4089_v22  ;;  %v4534_v4 = vld [vmem:[%s8386_s7 + $0x4f0] sm:$0xf0]  ;;  %v5506_v8 = vld [vmem:[%s8386_s7 + $0x5e4] sm:$0xf]  ;;  %v4297_v11 = vor.u32 %v5414_v63, %v4294_v0 }
 0x1ec   :  { %2675 = vmatpush.bf16.msra.mxu3 %v4217_v33  ;;  %2688 = vmatpush.bf16.msrb.mxu0 %v4345_v15  ;;  %v4662_v5 = vld [vmem:[%s8386_s7 + $0x5f0] sm:$0xf0]  ;;  %v5538_v9 = vld [vmem:[%s8386_s7 + $0x6e4] sm:$0xf]  ;;  %v4537_v26 = vor.u32 %v5474_v3, %v4534_v4 }
 0x1ed   :  { %v965_v48 = vmax.f32 %v963_v45, 0.0  ;;  %v4790_v12 = vld [vmem:[%s8386_s7 + $0x6f0] sm:$0xf0]  ;;  %v5570_v16 = vld [vmem:[%s8386_s7 + $0x7e4] sm:$0xf]  ;;  %v4665_v29 = vor.u32 %v5506_v8, %v4662_v5 }
 0x1ee   :  { %2650 = vmatpush.bf16.msra.mxu1 %v3945_v42  ;;  %v4918_v18 = vld [vmem:[%s8386_s7 + $0x7f0] sm:$0xf0]  ;;  %v4793_v30 = vor.u32 %v5538_v9, %v4790_v12  ;;  %v5470_v31 = vld [vmem:[%s8386_s7 + $0x4c4] sm:$0xf] }
 0x1ef   :  { %970 = vst [vmem:[#allocation1 + $0x20] ss:$4 sm:$0xff] %v965_v48  ;;  %2663 = vmatpush.bf16.msra.mxu2 %v4073_v13  ;;  %v4518_v33 = vld [vmem:[%s8386_s7 + $0x4d0] sm:$0xf0]  ;;  %v5502_v34 = vld [vmem:[%s8386_s7 + $0x5c4] sm:$0xf]  ;;  %v4921_v35 = vor.u32 %v5570_v16, %v4918_v18 }
 0x1f0   :  { %2676 = vmatpush.bf16.msra.mxu3 %v4201_v46  ;;  %2689 = vmatpush.bf16.msrb.mxu0 %v4329_v49  ;;  %v4646_v36 = vld [vmem:[%s8386_s7 + $0x5d0] sm:$0xf0]  ;;  %v5534_v15 = vld [vmem:[%s8386_s7 + $0x6c4] sm:$0xf]  ;;  %v4521_v42 = vor.u32 %v5470_v31, %v4518_v33 }
 0x1f1   :  { %v4774_v37 = vld [vmem:[%s8386_s7 + $0x6d0] sm:$0xf0]  ;;  %v5566_v39 = vld [vmem:[%s8386_s7 + $0x7c4] sm:$0xf]  ;;  %v4649_v43 = vor.u32 %v5502_v34, %v4646_v36 }
 0x1f2   :  { %2651 = vmatpush.bf16.msra.mxu1 %v3929_v54  ;;  %v4902_v41 = vld [vmem:[%s8386_s7 + $0x7d0] sm:$0xf0]  ;;  %v4777_v44 = vor.u32 %v5534_v15, %v4774_v37  ;;  %v5466_v45 = vld [vmem:[%s8386_s7 + $0x4a4] sm:$0xf] }
 0x1f3   :  { %2664 = vmatpush.bf16.msra.mxu2 %v4057_v56  ;;  %v4502_v13 = vld [vmem:[%s8386_s7 + $0x4b0] sm:$0xf0]  ;;  %v5498_v14 = vld [vmem:[%s8386_s7 + $0x5a4] sm:$0xf]  ;;  %v4905_v17 = vor.u32 %v5566_v39, %v4902_v41 }
 0x1f4   :  { %2677 = vmatpush.bf16.msra.mxu3 %v4185_v58  ;;  %2690 = vmatpush.bf16.msrb.mxu0 %v4313_v61  ;;  %v4630_v46 = vld [vmem:[%s8386_s7 + $0x5b0] sm:$0xf0]  ;;  %v5530_v40 = vld [vmem:[%s8386_s7 + $0x6a4] sm:$0xf]  ;;  %v4505_v50 = vor.u32 %v5466_v45, %v4502_v13 }
 0x1f5   :  { %v4758_v47 = vld [vmem:[%s8386_s7 + $0x6b0] sm:$0xf0]  ;;  %v5562_v48 = vld [vmem:[%s8386_s7 + $0x7a4] sm:$0xf]  ;;  %v4633_v51 = vor.u32 %v5498_v14, %v4630_v46 }
 0x1f6   :  { %2652 = vmatpush.bf16.msra.mxu1 %v3913_v62  ;;  %v975_v19 = vld.sshfl [vmem:[#allocation1 + $0x20] sm:$0xff pattern:$0x73625140]  ;;  %v976_v21 = vld.sshfl [vmem:[#allocation1 + $0x28] sm:$0xff pattern:$0x73625140]  ;;  %v4761_v54 = vor.u32 %v5530_v40, %v4758_v47 }
 0x1f7   :  { %2665 = vmatpush.bf16.msra.mxu2 %v4041_v2  ;;  %v6920_v24 = vpack.c.bf16 %v975_v19, %v975_v19  ;;  %v6922_v25 = vpack.c.bf16 %v976_v21, %v976_v21  ;;  %v977_v38 = vld.sshfl [vmem:[#allocation1 + $0x30] sm:$0xff pattern:$0x73625140]  ;;  %v978_v23 = vld.sshfl [vmem:[#allocation1 + $0x38] sm:$0xff pattern:$0x73625140] }
 0x1f8   :  { %2678 = vmatpush.bf16.msra.mxu3 %v4169_v6  ;;  %v6924_v22 = vpack.c.bf16 %v977_v38, %v977_v38  ;;  %v6926_v28 = vpack.c.bf16 %v978_v23, %v978_v23  ;;  %2691 = vmatpush.bf16.msrb.mxu0 %v4297_v11  ;;  %v4886_v49 = vld [vmem:[%s8386_s7 + $0x7b0] sm:$0xf0]  ;;  %v5462_v20 = vld [vmem:[%s8386_s7 + $0x484] sm:$0xf] }
 0x1f9   :  { %2601 = vmatmul.bf16.vlgmr.msrb.gmra.mxu1 %v6920_v24  ;;  %2614 = vmatmul.bf16.vlgmr.msrb.gmra.mxu2 %v6922_v25  ;;  %v4486_v55 = vld [vmem:[%s8386_s7 + $0x490] sm:$0xf0]  ;;  %v5494_v56 = vld [vmem:[%s8386_s7 + $0x584] sm:$0xf]  ;;  %v4889_v57 = vor.u32 %v5562_v48, %v4886_v49 }
 0x1fa   :  { %2627 = vmatmul.bf16.vlgmr.msrb.gmra.mxu3 %v6924_v22  ;;  %2640 = vmatmul.bf16.vlgmr.msra.gmra.mxu0 %v6926_v28  ;;  %v4614_v52 = vld [vmem:[%s8386_s7 + $0x590] sm:$0xf0]  ;;  %v5526_v58 = vld [vmem:[%s8386_s7 + $0x684] sm:$0xf]  ;;  %v4489_v32 = vor.u32 %v5462_v20, %v4486_v55  ;;  %v4028_v55 = vld [vmem:[%s8386_s7 + $0xe8] sm:$0xf] }
 0x1fb   :  { %2697 = vmatpush.bf16.msrb.mxu1 %v4537_v26  ;;  %2710 = vmatpush.bf16.msrb.mxu2 %v4665_v29  ;;  %v4742_v60 = vld [vmem:[%s8386_s7 + $0x690] sm:$0xf0]  ;;  %v5558_v27 = vld [vmem:[%s8386_s7 + $0x784] sm:$0xf]  ;;  %v4617_v53 = vor.u32 %v5494_v56, %v4614_v52  ;;  %v5349_v56 = vld [vmem:[%s8386_s7 + $0xf4] sm:$0xf0] }
 0x1fc   :  { %2723 = vmatpush.bf16.msrb.mxu3 %v4793_v30  ;;  %2736 = vmatpush.bf16.msra.mxu0 %v4921_v35  ;;  %v4870_v61 = vld [vmem:[%s8386_s7 + $0x790] sm:$0xf0]  ;;  %v4745_v62 = vor.u32 %v5526_v58, %v4742_v60  ;;  %v5458_v63 = vld [vmem:[%s8386_s7 + $0x464] sm:$0xf]  ;;  %v5381_v58 = vld [vmem:[%s8386_s7 + $0x1f4] sm:$0xf0] }
 0x1fd   :  { %v4470_v0 = vld [vmem:[%s8386_s7 + $0x470] sm:$0xf0]  ;;  %v5490_v2 = vld [vmem:[%s8386_s7 + $0x564] sm:$0xf]  ;;  %v4873_v3 = vor.u32 %v5558_v27, %v4870_v61  ;;  %v4284_v60 = vld [vmem:[%s8386_s7 + $0x2e8] sm:$0xf] }
 0x1fe   :  { %v4598_v4 = vld [vmem:[%s8386_s7 + $0x570] sm:$0xf0]  ;;  %v5522_v6 = vld [vmem:[%s8386_s7 + $0x664] sm:$0xf]  ;;  %v4473_v11 = vor.u32 %v5458_v63, %v4470_v0  ;;  %v5413_v27 = vld [vmem:[%s8386_s7 + $0x2f4] sm:$0xf0]  ;;  %v4029_v0 = vor.u32 %v5349_v56, %v4028_v55 }
 0x1ff   :  { %2698 = vmatpush.bf16.msrb.mxu1 %v4521_v42  ;;  %2711 = vmatpush.bf16.msrb.mxu2 %v4649_v43  ;;  %v4726_v8 = vld [vmem:[%s8386_s7 + $0x670] sm:$0xf0]  ;;  %v5554_v5 = vld [vmem:[%s8386_s7 + $0x764] sm:$0xf]  ;;  %v4601_v12 = vor.u32 %v5490_v2, %v4598_v4  ;;  %v4012_v4 = vld [vmem:[%s8386_s7 + $0xc8] sm:$0xf] }
 0x200   :  { %2724 = vmatpush.bf16.msrb.mxu3 %v4777_v44  ;;  %2737 = vmatpush.bf16.msra.mxu0 %v4905_v17  ;;  %v4854_v9 = vld [vmem:[%s8386_s7 + $0x770] sm:$0xf0]  ;;  %v4729_v16 = vor.u32 %v5522_v6, %v4726_v8  ;;  %v5454_v18 = vld [vmem:[%s8386_s7 + $0x444] sm:$0xf]  ;;  %v5345_v6 = vld [vmem:[%s8386_s7 + $0xd4] sm:$0xf0] }
 0x201   :  { %v4454_v19 = vld [vmem:[%s8386_s7 + $0x450] sm:$0xf0]  ;;  %v5486_v21 = vld [vmem:[%s8386_s7 + $0x544] sm:$0xf]  ;;  %v4857_v38 = vor.u32 %v5554_v5, %v4854_v9  ;;  %v4140_v8 = vld [vmem:[%s8386_s7 + $0x1c8] sm:$0xf] }
 0x202   :  { %v4582_v23 = vld [vmem:[%s8386_s7 + $0x550] sm:$0xf0]  ;;  %v5518_v26 = vld [vmem:[%s8386_s7 + $0x644] sm:$0xf]  ;;  %v4457_v33 = vor.u32 %v5454_v18, %v4454_v19  ;;  %v5377_v9 = vld [vmem:[%s8386_s7 + $0x1d4] sm:$0xf0]  ;;  %v4013_v19 = vor.u32 %v5345_v6, %v4012_v4 }
 0x203   :  { %2699 = vmatpush.bf16.msrb.mxu1 %v4505_v50  ;;  %2712 = vmatpush.bf16.msrb.mxu2 %v4633_v51  ;;  %v4710_v29 = vld [vmem:[%s8386_s7 + $0x650] sm:$0xf0]  ;;  %v5550_v30 = vld [vmem:[%s8386_s7 + $0x744] sm:$0xf]  ;;  %v4585_v34 = vor.u32 %v5486_v21, %v4582_v23  ;;  %v5441_v18 = vld [vmem:[%s8386_s7 + $0x3d4] sm:$0xf0]  ;;  %v4141_v21 = vor.u32 %v5377_v9, %v4140_v8 }
 0x204   :  { %2725 = vmatpush.bf16.msrb.mxu3 %v4761_v54  ;;  %2738 = vmatpush.bf16.msra.mxu0 %v4889_v57  ;;  %v4838_v31 = vld [vmem:[%s8386_s7 + $0x750] sm:$0xf0]  ;;  %v4713_v35 = vor.u32 %v5518_v26, %v4710_v29  ;;  %v5450_v36 = vld [vmem:[%s8386_s7 + $0x424] sm:$0xf]  ;;  %v4156_v57 = vld [vmem:[%s8386_s7 + $0x1e8] sm:$0xf] }
 0x205   :  { %v4438_v15 = vld [vmem:[%s8386_s7 + $0x430] sm:$0xf0]  ;;  %v5482_v37 = vld [vmem:[%s8386_s7 + $0x524] sm:$0xf]  ;;  %v4841_v39 = vor.u32 %v5550_v30, %v4838_v31  ;;  %v4157_v2 = vor.u32 %v5381_v58, %v4156_v57  ;;  %v3996_v23 = vld [vmem:[%s8386_s7 + $0xa8] sm:$0xf] }
 0x206   :  { %v4566_v41 = vld [vmem:[%s8386_s7 + $0x530] sm:$0xf0]  ;;  %v5514_v42 = vld [vmem:[%s8386_s7 + $0x624] sm:$0xf]  ;;  %v4441_v13 = vor.u32 %v5450_v36, %v4438_v15  ;;  %v5341_v26 = vld [vmem:[%s8386_s7 + $0xb4] sm:$0xf0] }
 0x207   :  { %2700 = vmatpush.bf16.msrb.mxu1 %v4489_v32  ;;  %2713 = vmatpush.bf16.msrb.mxu2 %v4617_v53  ;;  %v4694_v43 = vld [vmem:[%s8386_s7 + $0x630] sm:$0xf0]  ;;  %v5546_v44 = vld [vmem:[%s8386_s7 + $0x724] sm:$0xf]  ;;  %v4569_v46 = vor.u32 %v5482_v37, %v4566_v41  ;;  %v4412_v53 = vld [vmem:[%s8386_s7 + $0x3e8] sm:$0xf]  ;;  %v3997_v15 = vor.u32 %v5341_v26, %v3996_v23 }
 0x208   :  { %2726 = vmatpush.bf16.msrb.mxu3 %v4745_v62  ;;  %2739 = vmatpush.bf16.msra.mxu0 %v4873_v3  ;;  %v4822_v45 = vld [vmem:[%s8386_s7 + $0x730] sm:$0xf0]  ;;  %v5446_v14 = vld [vmem:[%s8386_s7 + $0x404] sm:$0xf]  ;;  %v4697_v40 = vor.u32 %v5514_v42, %v4694_v43  ;;  %v5445_v62 = vld [vmem:[%s8386_s7 + $0x3f4] sm:$0xf0]  ;;  %v4285_v3 = vor.u32 %v5413_v27, %v4284_v60 }
 0x209   :  { %2653 = vmatmul.bf16.vlgmr.msra.gmra.mxu1 %v6705_v59  ;;  %2666 = vmatmul.bf16.vlgmr.msra.gmra.mxu2 %v6713_v1  ;;  %v4422_v17 = vld [vmem:[%s8386_s7 + $0x410] sm:$0xf0]  ;;  %v5478_v47 = vld [vmem:[%s8386_s7 + $0x504] sm:$0xf]  ;;  %v4825_v50 = vor.u32 %v5546_v44, %v4822_v45  ;;  %v4413_v5 = vor.u32 %v5445_v62, %v4412_v53  ;;  %v4124_v29 = vld [vmem:[%s8386_s7 + $0x1a8] sm:$0xf] }
 0x20a   :  { %2679 = vmatmul.bf16.vlgmr.msra.gmra.mxu3 %v6717_v7  ;;  %2692 = vmatmul.bf16.vlgmr.msrb.gmra.mxu0 %v6721_v10  ;;  %v4550_v48 = vld [vmem:[%s8386_s7 + $0x510] sm:$0xf0]  ;;  %v5510_v49 = vld [vmem:[%s8386_s7 + $0x604] sm:$0xf]  ;;  %v4425_v52 = vor.u32 %v5446_v14, %v4422_v17  ;;  %v5373_v31 = vld [vmem:[%s8386_s7 + $0x1b4] sm:$0xf0] }
 0x20b   :  { %2701 = vmatpush.bf16.msrb.mxu1 %v4473_v11  ;;  %2714 = vmatpush.bf16.msrb.mxu2 %v4601_v12  ;;  %v4678_v51 = vld [vmem:[%s8386_s7 + $0x610] sm:$0xf0]  ;;  %v5542_v54 = vld [vmem:[%s8386_s7 + $0x704] sm:$0xf]  ;;  %v4553_v61 = vor.u32 %v5478_v47, %v4550_v48  ;;  %v4268_v11 = vld [vmem:[%s8386_s7 + $0x2c8] sm:$0xf]  ;;  %v4125_v37 = vor.u32 %v5373_v31, %v4124_v29 }
 0x20c   :  { %2727 = vmatpush.bf16.msrb.mxu3 %v4729_v16  ;;  %2740 = vmatpush.bf16.msra.mxu0 %v4857_v38  ;;  %v4806_v20 = vld [vmem:[%s8386_s7 + $0x710] sm:$0xf0]  ;;  %v4681_v32 = vor.u32 %v5510_v49, %v4678_v51  ;;  %v5409_v12 = vld [vmem:[%s8386_s7 + $0x2d4] sm:$0xf0]  ;;  %v4396_v16 = vld [vmem:[%s8386_s7 + $0x3c8] sm:$0xf] }
 0x20d   :  { %v4809_v63 = vor.u32 %v5542_v54, %v4806_v20  ;;  %v4269_v38 = vor.u32 %v5409_v12, %v4268_v11  ;;  %v4397_v30 = vor.u32 %v5441_v18, %v4396_v16  ;;  %v5437_v36 = vld [vmem:[%s8386_s7 + $0x3b4] sm:$0xf0]  ;;  %v3980_v41 = vld [vmem:[%s8386_s7 + $0x88] sm:$0xf] }
 0x20e   :  { %v5337_v42 = vld [vmem:[%s8386_s7 + $0x94] sm:$0xf0]  ;;  %v4108_v43 = vld [vmem:[%s8386_s7 + $0x188] sm:$0xf] }
 0x20f   :  { %2702 = vmatpush.bf16.msrb.mxu1 %v4457_v33  ;;  %2715 = vmatpush.bf16.msrb.mxu2 %v4585_v34  ;;  %v4252_v33 = vld [vmem:[%s8386_s7 + $0x2a8] sm:$0xf]  ;;  %v5405_v34 = vld [vmem:[%s8386_s7 + $0x2b4] sm:$0xf0] }
 0x210   :  { %2728 = vmatpush.bf16.msrb.mxu3 %v4713_v35  ;;  %2741 = vmatpush.bf16.msra.mxu0 %v4841_v39  ;;  %v4380_v35 = vld [vmem:[%s8386_s7 + $0x3a8] sm:$0xf]  ;;  %v4253_v39 = vor.u32 %v5405_v34, %v4252_v33  ;;  %v5369_v45 = vld [vmem:[%s8386_s7 + $0x194] sm:$0xf0] }
 0x211   :  { %v4381_v44 = vor.u32 %v5437_v36, %v4380_v35  ;;  %v5401_v14 = vld [vmem:[%s8386_s7 + $0x294] sm:$0xf0]  ;;  %v4364_v17 = vld [vmem:[%s8386_s7 + $0x388] sm:$0xf]  ;;  %v4109_v47 = vor.u32 %v5369_v45, %v4108_v43 }
 0x212   :  { %v3964_v49 = vld [vmem:[%s8386_s7 + $0x68] sm:$0xf]  ;;  %v5365_v20 = vld [vmem:[%s8386_s7 + $0x174] sm:$0xf0] }
 0x213   :  { %2703 = vmatpush.bf16.msrb.mxu1 %v4441_v13  ;;  %2716 = vmatpush.bf16.msrb.mxu2 %v4569_v46  ;;  %v4236_v13 = vld [vmem:[%s8386_s7 + $0x288] sm:$0xf]  ;;  %v5433_v46 = vld [vmem:[%s8386_s7 + $0x394] sm:$0xf0] }
 0x214   :  { %2729 = vmatpush.bf16.msrb.mxu3 %v4697_v40  ;;  %2742 = vmatpush.bf16.msra.mxu0 %v4825_v50  ;;  %v3981_v40 = vor.u32 %v5337_v42, %v3980_v41  ;;  %v4237_v48 = vor.u32 %v5401_v14, %v4236_v13  ;;  %v5333_v50 = vld [vmem:[%s8386_s7 + $0x74] sm:$0xf0]  ;;  %v4092_v51 = vld [vmem:[%s8386_s7 + $0x168] sm:$0xf]  ;;  %v4365_v54 = vor.u32 %v5433_v46, %v4364_v17 }
 0x215   :  { %v4220_v55 = vld [vmem:[%s8386_s7 + $0x268] sm:$0xf]  ;;  %v5397_v56 = vld [vmem:[%s8386_s7 + $0x274] sm:$0xf0]  ;;  %v3965_v58 = vor.u32 %v5333_v50, %v3964_v49  ;;  %v4093_v60 = vor.u32 %v5365_v20, %v4092_v51 }
 0x216   :  { %v4348_v57 = vld [vmem:[%s8386_s7 + $0x368] sm:$0xf]  ;;  %v4221_v27 = vor.u32 %v5397_v56, %v4220_v55  ;;  %v5425_v4 = vld [vmem:[%s8386_s7 + $0x354] sm:$0xf0] }
 0x217   :  { %2704 = vmatpush.bf16.msrb.mxu1 %v4425_v52  ;;  %2717 = vmatpush.bf16.msrb.mxu2 %v4553_v61  ;;  %v5429_v52 = vld [vmem:[%s8386_s7 + $0x374] sm:$0xf0]  ;;  %v3948_v61 = vld [vmem:[%s8386_s7 + $0x48] sm:$0xf] }
 0x218   :  { %2730 = vmatpush.bf16.msrb.mxu3 %v4681_v32  ;;  %2743 = vmatpush.bf16.msra.mxu0 %v4809_v63  ;;  %v5329_v32 = vld [vmem:[%s8386_s7 + $0x54] sm:$0xf0]  ;;  %v4076_v53 = vld [vmem:[%s8386_s7 + $0x148] sm:$0xf]  ;;  %v4349_v62 = vor.u32 %v5429_v52, %v4348_v57 }
 0x219   :  { %v5361_v63 = vld [vmem:[%s8386_s7 + $0x154] sm:$0xf0]  ;;  %v3949_v6 = vor.u32 %v5329_v32, %v3948_v61  ;;  %v3932_v9 = vld [vmem:[%s8386_s7 + $0x28] sm:$0xf] }
 0x21a   :  { %2705 = vmatmul.bf16.vlgmr.msrb.gmra.mxu1 %v6920_v24  ;;  %2718 = vmatmul.bf16.vlgmr.msrb.gmra.mxu2 %v6922_v25  ;;  %v4077_v8 = vor.u32 %v5361_v63, %v4076_v53  ;;  %v5325_v11 = vld [vmem:[%s8386_s7 + $0x34] sm:$0xf0]  ;;  %v4060_v12 = vld [vmem:[%s8386_s7 + $0x128] sm:$0xf] }
 0x21b   :  { %2749 = vmatpush.bf16.msra.mxu1 %v4029_v0  ;;  %2762 = vmatpush.bf16.msra.mxu2 %v4157_v2  ;;  %v4204_v0 = vld [vmem:[%s8386_s7 + $0x248] sm:$0xf]  ;;  %v5393_v2 = vld [vmem:[%s8386_s7 + $0x254] sm:$0xf0]  ;;  %v3933_v26 = vor.u32 %v5325_v11, %v3932_v9 }
 0x21c   :  { %2775 = vmatpush.bf16.msra.mxu3 %v4285_v3  ;;  %2788 = vmatpush.bf16.msrb.mxu0 %v4413_v5  ;;  %v4332_v3 = vld [vmem:[%s8386_s7 + $0x348] sm:$0xf]  ;;  %v4205_v5 = vor.u32 %v5393_v2, %v4204_v0  ;;  %v5357_v18 = vld [vmem:[%s8386_s7 + $0x134] sm:$0xf0] }
 0x21d   :  { %2731 = vmatmul.bf16.vlgmr.msrb.gmra.mxu3 %v6924_v22  ;;  %2744 = vmatmul.bf16.vlgmr.msra.gmra.mxu0 %v6926_v28  ;;  %v4333_v16 = vor.u32 %v5425_v4, %v4332_v3  ;;  %v5421_v23 = vld [vmem:[%s8386_s7 + $0x334] sm:$0xf0]  ;;  %v3916_v29 = vld [vmem:[%s8386_s7 + $0x8] sm:$0xf]  ;;  %v4061_v31 = vor.u32 %v5357_v18, %v4060_v12 }
 0x21e   :  { %v4044_v34 = vld [vmem:[%s8386_s7 + $0x108] sm:$0xf]  ;;  %v5353_v35 = vld [vmem:[%s8386_s7 + $0x114] sm:$0xf0] }
 0x21f   :  { %2750 = vmatpush.bf16.msra.mxu1 %v4013_v19  ;;  %2763 = vmatpush.bf16.msra.mxu2 %v4141_v21  ;;  %v4188_v19 = vld [vmem:[%s8386_s7 + $0x228] sm:$0xf]  ;;  %v5389_v21 = vld [vmem:[%s8386_s7 + $0x234] sm:$0xf0]  ;;  %v4045_v46 = vor.u32 %v5353_v35, %v4044_v34 }
 0x220   :  { %2776 = vmatpush.bf16.msra.mxu3 %v4269_v38  ;;  %2789 = vmatpush.bf16.msrb.mxu0 %v4397_v30  ;;  %v4316_v38 = vld [vmem:[%s8386_s7 + $0x328] sm:$0xf]  ;;  %v5321_v30 = vld [vmem:[%s8386_s7 + $0x14] sm:$0xf0]  ;;  %v4189_v33 = vor.u32 %v5389_v21, %v4188_v19 }
 0x221   :  { %v4172_v36 = vld [vmem:[%s8386_s7 + $0x208] sm:$0xf]  ;;  %v5417_v41 = vld [vmem:[%s8386_s7 + $0x314] sm:$0xf0]  ;;  %v3917_v45 = vor.u32 %v5321_v30, %v3916_v29 }
 0x222   :  { %v4540_v42 = vld [vmem:[%s8386_s7 + $0x4e8] sm:$0xf]  ;;  %v5477_v43 = vld [vmem:[%s8386_s7 + $0x4f4] sm:$0xf0] }
 0x223   :  { %2751 = vmatpush.bf16.msra.mxu1 %v3997_v15  ;;  %2764 = vmatpush.bf16.msra.mxu2 %v4125_v37  ;;  %v4317_v15 = vor.u32 %v5421_v23, %v4316_v38  ;;  %v5385_v37 = vld [vmem:[%s8386_s7 + $0x214] sm:$0xf0]  ;;  %v4796_v14 = vld [vmem:[%s8386_s7 + $0x6e8] sm:$0xf]  ;;  %v4541_v50 = vor.u32 %v5477_v43, %v4540_v42 }
 0x224   :  { %2777 = vmatpush.bf16.msra.mxu3 %v4253_v39  ;;  %2790 = vmatpush.bf16.msrb.mxu0 %v4381_v44  ;;  %v4300_v39 = vld [vmem:[%s8386_s7 + $0x308] sm:$0xf]  ;;  %v5509_v13 = vld [vmem:[%s8386_s7 + $0x5f4] sm:$0xf0] }
 0x225   :  { %v4668_v44 = vld [vmem:[%s8386_s7 + $0x5e8] sm:$0xf]  ;;  %v5541_v17 = vld [vmem:[%s8386_s7 + $0x6f4] sm:$0xf0]  ;;  %v4301_v49 = vor.u32 %v5417_v41, %v4300_v39 }
 0x226   :  { %v4669_v51 = vor.u32 %v5509_v13, %v4668_v44  ;;  %v4524_v20 = vld [vmem:[%s8386_s7 + $0x4c8] sm:$0xf]  ;;  %v5473_v55 = vld [vmem:[%s8386_s7 + $0x4d4] sm:$0xf0] }
 0x227   :  { %2752 = vmatpush.bf16.msra.mxu1 %v3981_v40  ;;  %2765 = vmatpush.bf16.msra.mxu2 %v4109_v47  ;;  %v4173_v40 = vor.u32 %v5385_v37, %v4172_v36  ;;  %v4924_v47 = vld [vmem:[%s8386_s7 + $0x7e8] sm:$0xf]  ;;  %v5505_v52 = vld [vmem:[%s8386_s7 + $0x5d4] sm:$0xf0]  ;;  %v4525_v32 = vor.u32 %v5473_v55, %v4524_v20 }
 0x228   :  { %2778 = vmatpush.bf16.msra.mxu3 %v4237_v48  ;;  %2791 = vmatpush.bf16.msrb.mxu0 %v4365_v54  ;;  %v5573_v48 = vld [vmem:[%s8386_s7 + $0x7f4] sm:$0xf0]  ;;  %v4797_v54 = vor.u32 %v5541_v17, %v4796_v14  ;;  %v4652_v56 = vld [vmem:[%s8386_s7 + $0x5c8] sm:$0xf] }
 0x229   :  { %v4925_v57 = vor.u32 %v5573_v48, %v4924_v47  ;;  %v5569_v61 = vld [vmem:[%s8386_s7 + $0x7d4] sm:$0xf0]  ;;  %v4653_v53 = vor.u32 %v5505_v52, %v4652_v56  ;;  %v4508_v63 = vld [vmem:[%s8386_s7 + $0x4a8] sm:$0xf] }
 0x22a   :  { %v5469_v0 = vld [vmem:[%s8386_s7 + $0x4b4] sm:$0xf0]  ;;  %v4636_v2 = vld [vmem:[%s8386_s7 + $0x5a8] sm:$0xf] }
 0x22b   :  { %2753 = vmatpush.bf16.msra.mxu1 %v3965_v58  ;;  %2766 = vmatpush.bf16.msra.mxu2 %v4093_v60  ;;  %v4780_v58 = vld [vmem:[%s8386_s7 + $0x6c8] sm:$0xf]  ;;  %v5537_v60 = vld [vmem:[%s8386_s7 + $0x6d4] sm:$0xf0]  ;;  %v4509_v11 = vor.u32 %v5469_v0, %v4508_v63 }
 0x22c   :  { %2779 = vmatpush.bf16.msra.mxu3 %v4221_v27  ;;  %2792 = vmatpush.bf16.msrb.mxu0 %v4349_v62  ;;  %v4908_v27 = vld [vmem:[%s8386_s7 + $0x7c8] sm:$0xf]  ;;  %v4781_v62 = vor.u32 %v5537_v60, %v4780_v58  ;;  %v5501_v4 = vld [vmem:[%s8386_s7 + $0x5b4] sm:$0xf0] }
 0x22d   :  { %v4909_v3 = vor.u32 %v5569_v61, %v4908_v27  ;;  %v5565_v9 = vld [vmem:[%s8386_s7 + $0x7b4] sm:$0xf0]  ;;  %v4637_v12 = vor.u32 %v5501_v4, %v4636_v2  ;;  %v4492_v18 = vld [vmem:[%s8386_s7 + $0x488] sm:$0xf] }
 0x22e   :  { %v5465_v19 = vld [vmem:[%s8386_s7 + $0x494] sm:$0xf0]  ;;  %v4620_v21 = vld [vmem:[%s8386_s7 + $0x588] sm:$0xf] }
 0x22f   :  { %2754 = vmatpush.bf16.msra.mxu1 %v3949_v6  ;;  %2767 = vmatpush.bf16.msra.mxu2 %v4077_v8  ;;  %v4764_v6 = vld [vmem:[%s8386_s7 + $0x6a8] sm:$0xf]  ;;  %v5533_v8 = vld [vmem:[%s8386_s7 + $0x6b4] sm:$0xf0] }
 0x230   :  { %2780 = vmatpush.bf16.msra.mxu3 %v4205_v5  ;;  %2793 = vmatpush.bf16.msrb.mxu0 %v4333_v16  ;;  %v4892_v5 = vld [vmem:[%s8386_s7 + $0x7a8] sm:$0xf]  ;;  %v4765_v16 = vor.u32 %v5533_v8, %v4764_v6  ;;  %v5497_v23 = vld [vmem:[%s8386_s7 + $0x594] sm:$0xf0] }
 0x231   :  { %v4893_v38 = vor.u32 %v5565_v9, %v4892_v5  ;;  %v5529_v29 = vld [vmem:[%s8386_s7 + $0x694] sm:$0xf0]  ;;  %v4876_v30 = vld [vmem:[%s8386_s7 + $0x788] sm:$0xf]  ;;  %v4621_v34 = vor.u32 %v5497_v23, %v4620_v21  ;;  %v4030_v21 = vld [vmem:[%s8386_s7 + $0xf8] sm:$0xf0] }
 0x232   :  { %v4476_v36 = vld [vmem:[%s8386_s7 + $0x468] sm:$0xf]  ;;  %v5493_v41 = vld [vmem:[%s8386_s7 + $0x574] sm:$0xf0] }
 0x233   :  { %2755 = vmatpush.bf16.msra.mxu1 %v3933_v26  ;;  %2768 = vmatpush.bf16.msra.mxu2 %v4061_v31  ;;  %v4748_v26 = vld [vmem:[%s8386_s7 + $0x688] sm:$0xf]  ;;  %v5561_v31 = vld [vmem:[%s8386_s7 + $0x794] sm:$0xf0] }
 0x234   :  { %2781 = vmatpush.bf16.msra.mxu3 %v4189_v33  ;;  %2794 = vmatpush.bf16.msrb.mxu0 %v4317_v15  ;;  %v4493_v33 = vor.u32 %v5465_v19, %v4492_v18  ;;  %v4749_v35 = vor.u32 %v5529_v29, %v4748_v26  ;;  %v5461_v15 = vld [vmem:[%s8386_s7 + $0x474] sm:$0xf0]  ;;  %v4604_v37 = vld [vmem:[%s8386_s7 + $0x568] sm:$0xf]  ;;  %v4877_v39 = vor.u32 %v5561_v31, %v4876_v30  ;;  %v5347_v19 = vld [vmem:[%s8386_s7 + $0xec] sm:$0xf] }
 0x235   :  { %v4732_v42 = vld [vmem:[%s8386_s7 + $0x668] sm:$0xf]  ;;  %v5525_v43 = vld [vmem:[%s8386_s7 + $0x674] sm:$0xf0]  ;;  %v4477_v13 = vor.u32 %v5461_v15, %v4476_v36  ;;  %v4605_v14 = vor.u32 %v5493_v41, %v4604_v37  ;;  %v4158_v26 = vld [vmem:[%s8386_s7 + $0x1f8] sm:$0xf0]  ;;  %v4033_v15 = vor.u32 %v5347_v19, %v4030_v21 }
 0x236   :  { %v4860_v44 = vld [vmem:[%s8386_s7 + $0x768] sm:$0xf]  ;;  %v4733_v17 = vor.u32 %v5525_v43, %v4732_v42  ;;  %v5553_v20 = vld [vmem:[%s8386_s7 + $0x754] sm:$0xf0]  ;;  %v5411_v29 = vld [vmem:[%s8386_s7 + $0x2ec] sm:$0xf] }
 0x237   :  { %2756 = vmatpush.bf16.msra.mxu1 %v3917_v45  ;;  %2769 = vmatpush.bf16.msra.mxu2 %v4045_v46  ;;  %v5557_v45 = vld [vmem:[%s8386_s7 + $0x774] sm:$0xf0]  ;;  %v4460_v46 = vld [vmem:[%s8386_s7 + $0x448] sm:$0xf]  ;;  %v4286_v30 = vld [vmem:[%s8386_s7 + $0x2f8] sm:$0xf0] }
 0x238   :  { %2782 = vmatpush.bf16.msra.mxu3 %v4173_v40  ;;  %2795 = vmatpush.bf16.msrb.mxu0 %v4301_v49  ;;  %v5457_v40 = vld [vmem:[%s8386_s7 + $0x454] sm:$0xf0]  ;;  %v4588_v47 = vld [vmem:[%s8386_s7 + $0x548] sm:$0xf]  ;;  %v4861_v48 = vor.u32 %v5557_v45, %v4860_v44  ;;  %v5343_v41 = vld [vmem:[%s8386_s7 + $0xcc] sm:$0xf] }
 0x239   :  { %v5489_v49 = vld [vmem:[%s8386_s7 + $0x554] sm:$0xf0]  ;;  %v4461_v55 = vor.u32 %v5457_v40, %v4460_v46  ;;  %v4444_v52 = vld [vmem:[%s8386_s7 + $0x428] sm:$0xf]  ;;  %v4014_v42 = vld [vmem:[%s8386_s7 + $0xd8] sm:$0xf0] }
 0x23a   :  { %2757 = vmatmul.bf16.vlgmr.msra.gmra.mxu1 %v6705_v59  ;;  %2770 = vmatmul.bf16.vlgmr.msra.gmra.mxu2 %v6713_v1  ;;  %v4589_v56 = vor.u32 %v5489_v49, %v4588_v47  ;;  %v5453_v58 = vld [vmem:[%s8386_s7 + $0x434] sm:$0xf0]  ;;  %v4572_v60 = vld [vmem:[%s8386_s7 + $0x528] sm:$0xf]  ;;  %v5375_v43 = vld [vmem:[%s8386_s7 + $0x1cc] sm:$0xf]  ;;  %v4017_v40 = vor.u32 %v5343_v41, %v4014_v42 }
 0x23b   :  { %2801 = vmatpush.bf16.msrb.mxu1 %v4541_v50  ;;  %2814 = vmatpush.bf16.msrb.mxu2 %v4669_v51  ;;  %v4716_v50 = vld [vmem:[%s8386_s7 + $0x648] sm:$0xf]  ;;  %v5521_v51 = vld [vmem:[%s8386_s7 + $0x654] sm:$0xf0]  ;;  %v4445_v0 = vor.u32 %v5453_v58, %v4444_v52  ;;  %v4142_v45 = vld [vmem:[%s8386_s7 + $0x1d8] sm:$0xf0] }
 0x23c   :  { %2827 = vmatpush.bf16.msrb.mxu3 %v4797_v54  ;;  %2840 = vmatpush.bf16.msra.mxu0 %v4925_v57  ;;  %v4844_v54 = vld [vmem:[%s8386_s7 + $0x748] sm:$0xf]  ;;  %v4717_v57 = vor.u32 %v5521_v51, %v4716_v50  ;;  %v5485_v61 = vld [vmem:[%s8386_s7 + $0x534] sm:$0xf0]  ;;  %v4398_v46 = vld [vmem:[%s8386_s7 + $0x3d8] sm:$0xf0] }
 0x23d   :  { %2783 = vmatmul.bf16.vlgmr.msra.gmra.mxu3 %v6717_v7  ;;  %2796 = vmatmul.bf16.vlgmr.msrb.gmra.mxu0 %v6721_v10  ;;  %v4845_v27 = vor.u32 %v5553_v20, %v4844_v54  ;;  %v5549_v63 = vld [vmem:[%s8386_s7 + $0x734] sm:$0xf0]  ;;  %v4428_v2 = vld [vmem:[%s8386_s7 + $0x408] sm:$0xf]  ;;  %v4573_v4 = vor.u32 %v5485_v61, %v4572_v60  ;;  %v7547_v47 = vld [vmem:[%s8387_s8] sm:$0xf] }
 0x23e   :  { %v4556_v8 = vld [vmem:[%s8386_s7 + $0x508] sm:$0xf]  ;;  %v5481_v5 = vld [vmem:[%s8386_s7 + $0x514] sm:$0xf0]  ;;  %v5339_v51 = vld [vmem:[%s8386_s7 + $0xac] sm:$0xf] }
 0x23f   :  { %2802 = vmatpush.bf16.msrb.mxu1 %v4525_v32  ;;  %2815 = vmatpush.bf16.msrb.mxu2 %v4653_v53  ;;  %v4700_v32 = vld [vmem:[%s8386_s7 + $0x628] sm:$0xf]  ;;  %v5517_v53 = vld [vmem:[%s8386_s7 + $0x634] sm:$0xf0]  ;;  %v4557_v31 = vor.u32 %v5481_v5, %v4556_v8  ;;  %v3998_v54 = vld [vmem:[%s8386_s7 + $0xb8] sm:$0xf0] }
 0x240   :  { %2828 = vmatpush.bf16.msrb.mxu3 %v4781_v62  ;;  %2841 = vmatpush.bf16.msra.mxu0 %v4909_v3  ;;  %v4828_v62 = vld [vmem:[%s8386_s7 + $0x728] sm:$0xf]  ;;  %v5449_v3 = vld [vmem:[%s8386_s7 + $0x414] sm:$0xf0]  ;;  %v4701_v6 = vor.u32 %v5517_v53, %v4700_v32  ;;  %v5371_v20 = vld [vmem:[%s8386_s7 + $0x1ac] sm:$0xf]  ;;  %v4001_v32 = vor.u32 %v5339_v51, %v3998_v54 }
 0x241   :  { %v4684_v9 = vld [vmem:[%s8386_s7 + $0x608] sm:$0xf]  ;;  %v5545_v18 = vld [vmem:[%s8386_s7 + $0x714] sm:$0xf0]  ;;  %v4429_v23 = vor.u32 %v5449_v3, %v4428_v2  ;;  %v4254_v52 = vld [vmem:[%s8386_s7 + $0x2b8] sm:$0xf0] }
 0x242   :  { %v1253_v58 = vperm.slane %v7547_v47, 0  ;;  %v5435_v60 = vld [vmem:[%s8386_s7 + $0x3ac] sm:$0xf]  ;;  %v4238_v8 = vld [vmem:[%s8386_s7 + $0x298] sm:$0xf0] }
 0x243   :  { %2803 = vmatpush.bf16.msrb.mxu1 %v4509_v11  ;;  %2816 = vmatpush.bf16.msrb.mxu2 %v4637_v12  ;;  %v4829_v11 = vor.u32 %v5549_v63, %v4828_v62  ;;  %v5513_v12 = vld [vmem:[%s8386_s7 + $0x614] sm:$0xf0]  ;;  %v5335_v63 = vld [vmem:[%s8386_s7 + $0x8c] sm:$0xf] }
 0x244   :  { %2829 = vmatpush.bf16.msrb.mxu3 %v4765_v16  ;;  %2842 = vmatpush.bf16.msra.mxu0 %v4893_v38  ;;  %v4812_v16 = vld [vmem:[%s8386_s7 + $0x708] sm:$0xf]  ;;  %v5379_v38 = vld [vmem:[%s8386_s7 + $0x1ec] sm:$0xf] }
 0x245   :  { %v4813_v36 = vor.u32 %v5545_v18, %v4812_v16  ;;  %v4161_v37 = vor.u32 %v5379_v38, %v4158_v26  ;;  %v5367_v2 = vld [vmem:[%s8386_s7 + $0x18c] sm:$0xf] }
 0x246   :  { %v5331_v26 = vld [vmem:[%s8386_s7 + $0x6c] sm:$0xf] }
 0x247   :  { %2804 = vmatpush.bf16.msrb.mxu1 %v4493_v33  ;;  %2817 = vmatpush.bf16.msrb.mxu2 %v4621_v34  ;;  %v4685_v33 = vor.u32 %v5513_v12, %v4684_v9  ;;  %v5443_v34 = vld [vmem:[%s8386_s7 + $0x3ec] sm:$0xf] }
 0x248   :  { %2830 = vmatpush.bf16.msrb.mxu3 %v4749_v35  ;;  %2843 = vmatpush.bf16.msra.mxu0 %v4877_v39  ;;  %v4414_v35 = vld [vmem:[%s8386_s7 + $0x3f8] sm:$0xf0]  ;;  %v4289_v39 = vor.u32 %v5411_v29, %v4286_v30  ;;  %v5431_v9 = vld [vmem:[%s8386_s7 + $0x38c] sm:$0xf] }
 0x249   :  { %v4417_v44 = vor.u32 %v5443_v34, %v4414_v35  ;;  %v3966_v29 = vld [vmem:[%s8386_s7 + $0x78] sm:$0xf0]  ;;  %v5363_v30 = vld [vmem:[%s8386_s7 + $0x16c] sm:$0xf] }
 0x24a   :  { %v5395_v34 = vld [vmem:[%s8386_s7 + $0x26c] sm:$0xf]  ;;  %v4222_v35 = vld [vmem:[%s8386_s7 + $0x278] sm:$0xf0]  ;;  %v3969_v41 = vor.u32 %v5331_v26, %v3966_v29 }
 0x24b   :  { %2805 = vmatpush.bf16.msrb.mxu1 %v4477_v13  ;;  %2818 = vmatpush.bf16.msrb.mxu2 %v4605_v14  ;;  %v5407_v13 = vld [vmem:[%s8386_s7 + $0x2cc] sm:$0xf]  ;;  %v4270_v14 = vld [vmem:[%s8386_s7 + $0x2d8] sm:$0xf0] }
 0x24c   :  { %2831 = vmatpush.bf16.msrb.mxu3 %v4733_v17  ;;  %2844 = vmatpush.bf16.msra.mxu0 %v4861_v48  ;;  %v5439_v17 = vld [vmem:[%s8386_s7 + $0x3cc] sm:$0xf]  ;;  %v4145_v48 = vor.u32 %v5375_v43, %v4142_v45  ;;  %v4273_v49 = vor.u32 %v5407_v13, %v4270_v14  ;;  %v4225_v43 = vor.u32 %v5395_v34, %v4222_v35  ;;  %v3950_v45 = vld [vmem:[%s8386_s7 + $0x58] sm:$0xf0] }
 0x24d   :  { %v5359_v13 = vld [vmem:[%s8386_s7 + $0x14c] sm:$0xf]  ;;  %v4798_v29 = vld [vmem:[%s8386_s7 + $0x6f8] sm:$0xf0] }
 0x24e   :  { %v5539_v26 = vld [vmem:[%s8386_s7 + $0x6ec] sm:$0xf]  ;;  %v4926_v34 = vld [vmem:[%s8386_s7 + $0x7f8] sm:$0xf0] }
 0x24f   :  { %2806 = vmatpush.bf16.msrb.mxu1 %v4461_v55  ;;  %2819 = vmatpush.bf16.msrb.mxu2 %v4589_v56  ;;  %v4401_v55 = vor.u32 %v5439_v17, %v4398_v46  ;;  %v4126_v56 = vld [vmem:[%s8386_s7 + $0x1b8] sm:$0xf0] }
 0x250   :  { %2832 = vmatpush.bf16.msrb.mxu3 %v4717_v57  ;;  %2845 = vmatpush.bf16.msra.mxu0 %v4845_v27  ;;  %v5403_v57 = vld [vmem:[%s8386_s7 + $0x2ac] sm:$0xf]  ;;  %v4382_v27 = vld [vmem:[%s8386_s7 + $0x3b8] sm:$0xf0]  ;;  %v4129_v53 = vor.u32 %v5371_v20, %v4126_v56 }
 0x251   :  { %v4257_v62 = vor.u32 %v5403_v57, %v4254_v52  ;;  %v4385_v3 = vor.u32 %v5435_v60, %v4382_v27  ;;  %v4078_v46 = vld [vmem:[%s8386_s7 + $0x158] sm:$0xf0]  ;;  %v5323_v57 = vld [vmem:[%s8386_s7 + $0x2c] sm:$0xf] }
 0x252   :  { %v3934_v52 = vld [vmem:[%s8386_s7 + $0x38] sm:$0xf0] }
 0x253   :  { %2807 = vmatpush.bf16.msrb.mxu1 %v4445_v0  ;;  %2820 = vmatpush.bf16.msrb.mxu2 %v4573_v4  ;;  %v3982_v0 = vld [vmem:[%s8386_s7 + $0x98] sm:$0xf0] }
 0x254   :  { %2833 = vmatpush.bf16.msrb.mxu3 %v4701_v6  ;;  %2846 = vmatpush.bf16.msra.mxu0 %v4829_v11  ;;  %v4110_v4 = vld [vmem:[%s8386_s7 + $0x198] sm:$0xf0]  ;;  %v5399_v6 = vld [vmem:[%s8386_s7 + $0x28c] sm:$0xf]  ;;  %v3985_v16 = vor.u32 %v5335_v63, %v3982_v0  ;;  %v3937_v63 = vor.u32 %v5323_v57, %v3934_v52 }
 0x255   :  { %v4366_v11 = vld [vmem:[%s8386_s7 + $0x398] sm:$0xf0]  ;;  %v4113_v21 = vor.u32 %v5367_v2, %v4110_v4  ;;  %v4241_v38 = vor.u32 %v5399_v6, %v4238_v8  ;;  %v5319_v0 = vld [vmem:[%s8386_s7 + $0xc] sm:$0xf] }
 0x256   :  { %v2550_v50 = vpop.f32.mrf.mxu1  ;;  %v4062_v27 = vld [vmem:[%s8386_s7 + $0x138] sm:$0xf0]  ;;  %v5351_v6 = vld [vmem:[%s8386_s7 + $0x10c] sm:$0xf] }
 0x257   :  { %2808 = vmatpush.bf16.msrb.mxu1 %v4429_v23  ;;  %2821 = vmatpush.bf16.msrb.mxu2 %v4557_v31  ;;  %v2551_v5 = vadd.f32 %v2550_v50, %v1253_v58  ;;  %v4369_v31 = vor.u32 %v5431_v9, %v4366_v11  ;;  %v4334_v50 = vld [vmem:[%s8386_s7 + $0x358] sm:$0xf0]  ;;  %v5355_v58 = vld [vmem:[%s8386_s7 + $0x12c] sm:$0xf] }
 0x258   :  { %2834 = vmatpush.bf16.msrb.mxu3 %v4685_v33  ;;  %2847 = vmatpush.bf16.msra.mxu0 %v4813_v36  ;;  %v2589_v61 = vpop.f32.mrf.mxu0  ;;  %v4094_v33 = vld [vmem:[%s8386_s7 + $0x178] sm:$0xf0] }
 0x259   :  { %v4097_v42 = vor.u32 %v5363_v30, %v4094_v33  ;;  %v3918_v2 = vld [vmem:[%s8386_s7 + $0x18] sm:$0xf0]  ;;  %v5571_v33 = vld [vmem:[%s8386_s7 + $0x7ec] sm:$0xf] }
 0x25a   :  { %2809 = vmatmul.bf16.vlgmr.msrb.gmra.mxu1 %v6920_v24  ;;  %2822 = vmatmul.bf16.vlgmr.msrb.gmra.mxu2 %v6922_v25  ;;  %v4046_v8 = vld [vmem:[%s8386_s7 + $0x118] sm:$0xf0] }
 0x25b   :  { %2853 = vmatpush.bf16.msra.mxu1 %v4033_v15  ;;  %2866 = vmatpush.bf16.msra.mxu2 %v4161_v37  ;;  %v5427_v15 = vld [vmem:[%s8386_s7 + $0x36c] sm:$0xf]  ;;  %v4350_v37 = vld [vmem:[%s8386_s7 + $0x378] sm:$0xf0]  ;;  %v4049_v30 = vor.u32 %v5351_v6, %v4046_v8 }
 0x25c   :  { %2879 = vmatpush.bf16.msra.mxu3 %v4289_v39  ;;  %2892 = vmatpush.bf16.msrb.mxu0 %v4417_v44  ;;  %v2563_v12 = vpop.f32.mrf.mxu2  ;;  %v5327_v44 = vld [vmem:[%s8386_s7 + $0x4c] sm:$0xf]  ;;  %v4353_v17 = vor.u32 %v5427_v15, %v4350_v37  ;;  %v4174_v11 = vld [vmem:[%s8386_s7 + $0x218] sm:$0xf0]  ;;  %v4801_v37 = vor.u32 %v5539_v26, %v4798_v29 }
 0x25d   :  { %2835 = vmatmul.bf16.vlgmr.msrb.gmra.mxu3 %v6924_v22  ;;  %2848 = vmatmul.bf16.vlgmr.msra.gmra.mxu0 %v6926_v28  ;;  %v2564_v18 = vadd.f32 %v2563_v12, %v2551_v5  ;;  %v2576_v19 = vpop.f32.mrf.mxu3  ;;  %v3953_v54 = vor.u32 %v5327_v44, %v3950_v45  ;;  %v5383_v5 = vld [vmem:[%s8386_s7 + $0x20c] sm:$0xf]  ;;  %v4654_v44 = vld [vmem:[%s8386_s7 + $0x5d8] sm:$0xf0] }
 0x25e   :  { %v2552_v23 = vpop.f32.mrf.mxu1  ;;  %v5415_v12 = vld [vmem:[%s8386_s7 + $0x30c] sm:$0xf]  ;;  %v4766_v57 = vld [vmem:[%s8386_s7 + $0x6b8] sm:$0xf0] }
 0x25f   :  { %2854 = vmatpush.bf16.msra.mxu1 %v4017_v40  ;;  %2867 = vmatpush.bf16.msra.mxu2 %v4145_v48  ;;  %v2577_v36 = vadd.f32 %v2576_v19, %v2564_v18  ;;  %v5391_v40 = vld [vmem:[%s8386_s7 + $0x24c] sm:$0xf]  ;;  %v4206_v48 = vld [vmem:[%s8386_s7 + $0x258] sm:$0xf0] }
 0x260   :  { %2880 = vmatpush.bf16.msra.mxu3 %v4273_v49  ;;  %2893 = vmatpush.bf16.msrb.mxu0 %v4401_v55  ;;  %v2591_v39 = vpop.f32.mrf.mxu0  ;;  %v5423_v49 = vld [vmem:[%s8386_s7 + $0x34c] sm:$0xf]  ;;  %v4081_v55 = vor.u32 %v5359_v13, %v4078_v46  ;;  %v4209_v56 = vor.u32 %v5391_v40, %v4206_v48  ;;  %v4542_v19 = vld [vmem:[%s8386_s7 + $0x4f8] sm:$0xf0] }
 0x261   :  { %v7635_v14 = vadd.f32 %v2589_v61, %v2577_v36  ;;  %v4337_v60 = vor.u32 %v5423_v49, %v4334_v50  ;;  %v5387_v61 = vld [vmem:[%s8386_s7 + $0x22c] sm:$0xf]  ;;  %v4670_v23 = vld [vmem:[%s8386_s7 + $0x5f8] sm:$0xf0] }
 0x262   :  { %v5475_v18 = vld [vmem:[%s8386_s7 + $0x4ec] sm:$0xf]  ;;  %v4782_v13 = vld [vmem:[%s8386_s7 + $0x6d8] sm:$0xf0] }
 0x263   :  { %2855 = vmatpush.bf16.msra.mxu1 %v4001_v32  ;;  %2868 = vmatpush.bf16.msra.mxu2 %v4129_v53  ;;  %v4190_v32 = vld [vmem:[%s8386_s7 + $0x238] sm:$0xf0]  ;;  %v5419_v53 = vld [vmem:[%s8386_s7 + $0x32c] sm:$0xf]  ;;  %v4545_v36 = vor.u32 %v5475_v18, %v4542_v19 }
 0x264   :  { %2881 = vmatpush.bf16.msra.mxu3 %v4257_v62  ;;  %2894 = vmatpush.bf16.msrb.mxu0 %v4385_v3  ;;  %v2565_v51 = vpop.f32.mrf.mxu2  ;;  %v4318_v62 = vld [vmem:[%s8386_s7 + $0x338] sm:$0xf0]  ;;  %v4065_v3 = vor.u32 %v5355_v58, %v4062_v27  ;;  %v4193_v4 = vor.u32 %v5387_v61, %v4190_v32  ;;  %v5471_v39 = vld [vmem:[%s8386_s7 + $0x4cc] sm:$0xf] }
 0x265   :  { %v2578_v20 = vpop.f32.mrf.mxu3  ;;  %v4321_v9 = vor.u32 %v5419_v53, %v4318_v62  ;;  %v5535_v45 = vld [vmem:[%s8386_s7 + $0x6cc] sm:$0xf]  ;;  %v4910_v46 = vld [vmem:[%s8386_s7 + $0x7d8] sm:$0xf0] }
 0x266   :  { %v4785_v49 = vor.u32 %v5535_v45, %v4782_v13  ;;  %v5467_v50 = vld [vmem:[%s8386_s7 + $0x4ac] sm:$0xf]  ;;  %v4510_v51 = vld [vmem:[%s8386_s7 + $0x4b8] sm:$0xf0] }
 0x267   :  { %2856 = vmatpush.bf16.msra.mxu1 %v3985_v16  ;;  %2869 = vmatpush.bf16.msra.mxu2 %v4113_v21  ;;  %v4302_v16 = vld [vmem:[%s8386_s7 + $0x318] sm:$0xf0]  ;;  %v5507_v21 = vld [vmem:[%s8386_s7 + $0x5ec] sm:$0xf] }
 0x268   :  { %2882 = vmatpush.bf16.msra.mxu3 %v4241_v38  ;;  %2895 = vmatpush.bf16.msrb.mxu0 %v4369_v31  ;;  %v3921_v38 = vor.u32 %v5319_v0, %v3918_v2  ;;  %v4177_v31 = vor.u32 %v5383_v5, %v4174_v11  ;;  %v4305_v35 = vor.u32 %v5415_v12, %v4302_v16  ;;  %v4894_v52 = vld [vmem:[%s8386_s7 + $0x7b8] sm:$0xf0]  ;;  %v5559_v2 = vld [vmem:[%s8386_s7 + $0x78c] sm:$0xf] }
 0x269   :  { %v4673_v15 = vor.u32 %v5507_v21, %v4670_v23  ;;  %v4494_v32 = vld [vmem:[%s8386_s7 + $0x498] sm:$0xf0]  ;;  %v5459_v5 = vld [vmem:[%s8386_s7 + $0x46c] sm:$0xf] }
 0x26a   :  { %v4622_v62 = vld [vmem:[%s8386_s7 + $0x598] sm:$0xf0]  ;;  %v5491_v11 = vld [vmem:[%s8386_s7 + $0x56c] sm:$0xf] }
 0x26b   :  { %2857 = vmatpush.bf16.msra.mxu1 %v3969_v41  ;;  %2870 = vmatpush.bf16.msra.mxu2 %v4097_v42  ;;  %v4526_v41 = vld [vmem:[%s8386_s7 + $0x4d8] sm:$0xf0]  ;;  %v5503_v42 = vld [vmem:[%s8386_s7 + $0x5cc] sm:$0xf] }
 0x26c   :  { %2883 = vmatpush.bf16.msra.mxu3 %v4225_v43  ;;  %2896 = vmatpush.bf16.msrb.mxu0 %v4353_v17  ;;  %v4929_v43 = vor.u32 %v5571_v33, %v4926_v34  ;;  %v5567_v17 = vld [vmem:[%s8386_s7 + $0x7cc] sm:$0xf]  ;;  %v4529_v40 = vor.u32 %v5471_v39, %v4526_v41  ;;  %v4657_v48 = vor.u32 %v5503_v42, %v4654_v44  ;;  %v4750_v0 = vld [vmem:[%s8386_s7 + $0x698] sm:$0xf0] }
 0x26d   :  { %v4913_v20 = vor.u32 %v5567_v17, %v4910_v46  ;;  %v4606_v19 = vld [vmem:[%s8386_s7 + $0x578] sm:$0xf0]  ;;  %v5523_v21 = vld [vmem:[%s8386_s7 + $0x66c] sm:$0xf] }
 0x26e   :  { %v5555_v23 = vld [vmem:[%s8386_s7 + $0x76c] sm:$0xf]  ;;  %v4862_v26 = vld [vmem:[%s8386_s7 + $0x778] sm:$0xf0] }
 0x26f   :  { %2858 = vmatpush.bf16.msra.mxu1 %v3953_v54  ;;  %2871 = vmatpush.bf16.msra.mxu2 %v4081_v55  ;;  %v5499_v54 = vld [vmem:[%s8386_s7 + $0x5ac] sm:$0xf]  ;;  %v4638_v55 = vld [vmem:[%s8386_s7 + $0x5b8] sm:$0xf0] }
 0x270   :  { %2884 = vmatpush.bf16.msra.mxu3 %v4209_v56  ;;  %2897 = vmatpush.bf16.msrb.mxu0 %v4337_v60  ;;  %v5531_v56 = vld [vmem:[%s8386_s7 + $0x6ac] sm:$0xf]  ;;  %v4513_v60 = vor.u32 %v5467_v50, %v4510_v51  ;;  %v4641_v27 = vor.u32 %v5499_v54, %v4638_v55  ;;  %v4590_v39 = vld [vmem:[%s8386_s7 + $0x558] sm:$0xf0] }
 0x271   :  { %v5519_v41 = vld [vmem:[%s8386_s7 + $0x64c] sm:$0xf]  ;;  %v4718_v42 = vld [vmem:[%s8386_s7 + $0x658] sm:$0xf0] }
 0x272   :  { %v4846_v44 = vld [vmem:[%s8386_s7 + $0x758] sm:$0xf0]  ;;  %v4721_v17 = vor.u32 %v5519_v41, %v4718_v42  ;;  %v5451_v46 = vld [vmem:[%s8386_s7 + $0x42c] sm:$0xf]  ;;  %v5585_v41 = vld [vmem:[%s8388_s9 + $0x54] sm:$0xf0] }
 0x273   :  { %2859 = vmatpush.bf16.msra.mxu1 %v3937_v63  ;;  %2872 = vmatpush.bf16.msra.mxu2 %v4065_v3  ;;  %v5527_v63 = vld [vmem:[%s8386_s7 + $0x68c] sm:$0xf]  ;;  %v4878_v3 = vld [vmem:[%s8386_s7 + $0x798] sm:$0xf0]  ;;  %v5036_v42 = vld [vmem:[%s8388_s9 + $0xd0] sm:$0xf] }
 0x274   :  { %2885 = vmatpush.bf16.msra.mxu3 %v4193_v4  ;;  %2898 = vmatpush.bf16.msrb.mxu0 %v4321_v9  ;;  %v4753_v8 = vor.u32 %v5527_v63, %v4750_v0  ;;  %v4478_v9 = vld [vmem:[%s8386_s7 + $0x478] sm:$0xf0]  ;;  %v4881_v12 = vor.u32 %v5559_v2, %v4878_v3  ;;  %v5511_v63 = vld [vmem:[%s8386_s7 + $0x60c] sm:$0xf] }
 0x275   :  { %v4574_v54 = vld [vmem:[%s8386_s7 + $0x538] sm:$0xf0]  ;;  %v5543_v2 = vld [vmem:[%s8386_s7 + $0x70c] sm:$0xf] }
 0x276   :  { %v7775_v58 = vpop.f32.mrf.mxu1  ;;  %v4702_v55 = vld [vmem:[%s8386_s7 + $0x638] sm:$0xf0] }
 0x277   :  { %2860 = vmatpush.bf16.msra.mxu1 %v3921_v38  ;;  %2873 = vmatpush.bf16.msra.mxu2 %v4049_v30  ;;  %v7778_v61 = vpop.f32.mrf.mxu0  ;;  %v4734_v38 = vld [vmem:[%s8386_s7 + $0x678] sm:$0xf0]  ;;  %v4481_v30 = vor.u32 %v5459_v5, %v4478_v9  ;;  %v5052_v5 = vld [vmem:[%s8388_s9 + $0xf0] sm:$0xf]  ;;  %v5605_v9 = vld [vmem:[%s8388_s9 + $0xf4] sm:$0xf0] }
 0x278   :  { %2886 = vmatpush.bf16.msra.mxu3 %v4177_v31  ;;  %2899 = vmatpush.bf16.msrb.mxu0 %v4305_v35  ;;  %v4609_v31 = vor.u32 %v5491_v11, %v4606_v19  ;;  %v4737_v33 = vor.u32 %v5523_v21, %v4734_v38  ;;  %v5455_v35 = vld [vmem:[%s8386_s7 + $0x44c] sm:$0xf]  ;;  %v4686_v0 = vld [vmem:[%s8386_s7 + $0x618] sm:$0xf0] }
 0x279   :  { %v4814_v3 = vld [vmem:[%s8386_s7 + $0x718] sm:$0xf0] }
 0x27a   :  { %2861 = vmatmul.bf16.vlgmr.msra.gmra.mxu1 %v6705_v59  ;;  %2874 = vmatmul.bf16.vlgmr.msra.gmra.mxu2 %v6713_v1  ;;  %v5563_v59 = vld [vmem:[%s8386_s7 + $0x7ac] sm:$0xf]  ;;  %v4769_v1 = vor.u32 %v5531_v56, %v4766_v57  ;;  %v4830_v57 = vld [vmem:[%s8386_s7 + $0x738] sm:$0xf0]  ;;  %v4817_v19 = vor.u32 %v5543_v2, %v4814_v3 }
 0x27b   :  { %2905 = vmatpush.bf16.msrb.mxu1 %v4545_v36  ;;  %2918 = vmatpush.bf16.msrb.mxu2 %v4673_v15  ;;  %v4897_v53 = vor.u32 %v5563_v59, %v4894_v52  ;;  %v4462_v36 = vld [vmem:[%s8386_s7 + $0x458] sm:$0xf0]  ;;  %v5487_v15 = vld [vmem:[%s8386_s7 + $0x54c] sm:$0xf] }
 0x27c   :  { %2931 = vmatpush.bf16.msrb.mxu3 %v4801_v37  ;;  %2944 = vmatpush.bf16.msra.mxu0 %v4929_v43  ;;  %v7813_v16 = vpop.f32.mrf.mxu2  ;;  %v4865_v37 = vor.u32 %v5555_v23, %v4862_v26  ;;  %v5551_v43 = vld [vmem:[%s8386_s7 + $0x74c] sm:$0xf]  ;;  %v4465_v45 = vor.u32 %v5455_v35, %v4462_v36  ;;  %v4593_v13 = vor.u32 %v5487_v15, %v4590_v39  ;;  %v1254_v36 = vperm.slane %v7547_v47, 1  ;;  %v4972_v39 = vld [vmem:[%s8388_s9 + $0x50] sm:$0xf] }
 0x27d   :  { %2887 = vmatmul.bf16.vlgmr.msra.gmra.mxu3 %v6717_v7  ;;  %2900 = vmatmul.bf16.vlgmr.msrb.gmra.mxu0 %v6721_v10  ;;  %v5463_v7 = vld [vmem:[%s8386_s7 + $0x48c] sm:$0xf]  ;;  %v7815_v18 = vpop.f32.mrf.mxu3  ;;  %v5053_v26 = vor.u32 %v5605_v9, %v5052_v5  ;;  %v5617_v5 = vld [vmem:[%s8388_s9 + $0x154] sm:$0xf0]  ;;  %v2603_v9 = vadd.f32 %v7775_v58, %v7635_v14  ;;  %v5004_v14 = vld [vmem:[%s8388_s9 + $0x90] sm:$0xf] }
 0x27e   :  { %v5495_v10 = vld [vmem:[%s8386_s7 + $0x58c] sm:$0xf]  ;;  %v4497_v4 = vor.u32 %v5463_v7, %v4494_v32  ;;  %v2604_v29 = vpop.f32.mrf.mxu1  ;;  %v4430_v32 = vld [vmem:[%s8386_s7 + $0x418] sm:$0xf0] }
 0x27f   :  { %2906 = vmatpush.bf16.msrb.mxu1 %v4529_v40  ;;  %2919 = vmatpush.bf16.msrb.mxu2 %v4657_v48  ;;  %v4625_v6 = vor.u32 %v5495_v10, %v4622_v62  ;;  %v2643_v34 = vpop.f32.mrf.mxu0  ;;  %v4446_v40 = vld [vmem:[%s8386_s7 + $0x438] sm:$0xf0]  ;;  %v5483_v48 = vld [vmem:[%s8386_s7 + $0x52c] sm:$0xf] }
 0x280   :  { %2932 = vmatpush.bf16.msrb.mxu3 %v4785_v49  ;;  %2945 = vmatpush.bf16.msra.mxu0 %v4913_v20  ;;  %v4849_v49 = vor.u32 %v5551_v43, %v4846_v44  ;;  %v5515_v20 = vld [vmem:[%s8386_s7 + $0x62c] sm:$0xf]  ;;  %v4449_v52 = vor.u32 %v5451_v46, %v4446_v40  ;;  %v5603_v34 = vld [vmem:[%s8388_s9 + $0xe4] sm:$0xf0]  ;;  %v4973_v44 = vor.u32 %v5585_v41, %v4972_v39  ;;  %v5028_v46 = vld [vmem:[%s8388_s9 + $0xc0] sm:$0xf] }
 0x281   :  { %v5547_v56 = vld [vmem:[%s8386_s7 + $0x72c] sm:$0xf]  ;;  %v5599_v40 = vld [vmem:[%s8388_s9 + $0xc4] sm:$0xf0]  ;;  %v4996_v39 = vld [vmem:[%s8388_s9 + $0x80] sm:$0xf] }
 0x282   :  { %v5479_v10 = vld [vmem:[%s8386_s7 + $0x50c] sm:$0xf]  ;;  %v4833_v62 = vor.u32 %v5547_v56, %v4830_v57  ;;  %v4956_v56 = vld [vmem:[%s8388_s9 + $0x30] sm:$0xf]  ;;  %v5581_v57 = vld [vmem:[%s8388_s9 + $0x34] sm:$0xf0] }
 0x283   :  { %2907 = vmatpush.bf16.msrb.mxu1 %v4513_v60  ;;  %2920 = vmatpush.bf16.msrb.mxu2 %v4641_v27  ;;  %v5447_v60 = vld [vmem:[%s8386_s7 + $0x40c] sm:$0xf]  ;;  %v4577_v27 = vor.u32 %v5483_v48, %v4574_v54  ;;  %v5116_v48 = vld [vmem:[%s8388_s9 + $0x170] sm:$0xf]  ;;  %v5591_v41 = vld [vmem:[%s8388_s9 + $0x84] sm:$0xf0] }
 0x284   :  { %2933 = vmatpush.bf16.msrb.mxu3 %v4769_v1  ;;  %2946 = vmatpush.bf16.msra.mxu0 %v4897_v53  ;;  %v2617_v50 = vpop.f32.mrf.mxu2  ;;  %v4705_v1 = vor.u32 %v5515_v20, %v4702_v55  ;;  %v4558_v53 = vld [vmem:[%s8386_s7 + $0x518] sm:$0xf0]  ;;  %v5029_v55 = vor.u32 %v5599_v40, %v5028_v46  ;;  %v4997_v40 = vor.u32 %v5591_v41, %v4996_v39  ;;  %v5594_v39 = vld [vmem:[%s8388_s9 + $0xa4] sm:$0xf]  ;;  %v5014_v41 = vld [vmem:[%s8388_s9 + $0xa8] sm:$0xf0] }
 0x285   :  { %v2630_v51 = vpop.f32.mrf.mxu3  ;;  %v4561_v11 = vor.u32 %v5479_v10, %v4558_v53  ;;  %v4957_v10 = vor.u32 %v5581_v57, %v4956_v56  ;;  %v5602_v56 = vld [vmem:[%s8388_s9 + $0xe4] sm:$0xf] }
 0x286   :  { %v2654_v59 = vpop.f32.mrf.mxu1 }
 0x287   :  { %2908 = vmatpush.bf16.msrb.mxu1 %v4497_v4  ;;  %2921 = vmatpush.bf16.msrb.mxu2 %v4625_v6  ;;  %v7883_v7 = vpop.f32.mrf.mxu0  ;;  %v4988_v4 = vld [vmem:[%s8388_s9 + $0x70] sm:$0xf]  ;;  %v5589_v6 = vld [vmem:[%s8388_s9 + $0x74] sm:$0xf0]  ;;  %v2655_v43 = vadd.f32 %v2654_v59, %v1254_v36  ;;  %v5575_v36 = vld [vmem:[%s8388_s9 + $0x4] sm:$0xf0] }
 0x288   :  { %2934 = vmatpush.bf16.msrb.mxu3 %v4753_v8  ;;  %2947 = vmatpush.bf16.msra.mxu0 %v4881_v12  ;;  %v4433_v8 = vor.u32 %v5447_v60, %v4430_v32  ;;  %v4689_v12 = vor.u32 %v5511_v63, %v4686_v0  ;;  %v4989_v21 = vor.u32 %v5589_v6, %v4988_v4  ;;  %v5020_v59 = vld [vmem:[%s8388_s9 + $0xb0] sm:$0xf]  ;;  %v5597_v60 = vld [vmem:[%s8388_s9 + $0xb4] sm:$0xf0]  ;;  %v5579_v63 = vld [vmem:[%s8388_s9 + $0x24] sm:$0xf0] }
 0x289   :  { %v5021_v53 = vor.u32 %v5597_v60, %v5020_v59  ;;  %v5012_v0 = vld [vmem:[%s8388_s9 + $0xa0] sm:$0xf]  ;;  %v5595_v6 = vld [vmem:[%s8388_s9 + $0xa4] sm:$0xf0]  ;;  %v5068_v60 = vld [vmem:[%s8388_s9 + $0x110] sm:$0xf] }
 0x28b   :  { %2909 = vmatpush.bf16.msrb.mxu1 %v4481_v30  ;;  %2922 = vmatpush.bf16.msrb.mxu2 %v4609_v31  ;;  %v4980_v30 = vld [vmem:[%s8388_s9 + $0x60] sm:$0xf]  ;;  %v5587_v31 = vld [vmem:[%s8388_s9 + $0x64] sm:$0xf0] }
 0x28c   :  { %2935 = vmatpush.bf16.msrb.mxu3 %v4737_v33  ;;  %2948 = vmatpush.bf16.msra.mxu0 %v4865_v37  ;;  %v2667_v38 = vpop.f32.mrf.mxu2  ;;  %v5044_v33 = vld [vmem:[%s8388_s9 + $0xe0] sm:$0xf]  ;;  %v4981_v15 = vor.u32 %v5587_v31, %v4980_v30  ;;  %v5615_v31 = vld [vmem:[%s8388_s9 + $0x144] sm:$0xf0] }
 0x28d   :  { %v2680_v23 = vpop.f32.mrf.mxu3  ;;  %v5045_v37 = vor.u32 %v5603_v34, %v5044_v33  ;;  %v5092_v30 = vld [vmem:[%s8388_s9 + $0x140] sm:$0xf] }
 0x28e   :  { %v2656_v29 = vpop.f32.mrf.mxu1  ;;  %v5093_v33 = vor.u32 %v5615_v31, %v5092_v30  ;;  %v5596_v31 = vld [vmem:[%s8388_s9 + $0xb4] sm:$0xf] }
 0x28f   :  { %2910 = vmatpush.bf16.msrb.mxu1 %v4465_v45  ;;  %2923 = vmatpush.bf16.msrb.mxu2 %v4593_v13  ;;  %v2695_v35 = vpop.f32.mrf.mxu0  ;;  %v5577_v29 = vld [vmem:[%s8388_s9 + $0x14] sm:$0xf0] }
 0x290   :  { %2936 = vmatpush.bf16.msrb.mxu3 %v4721_v17  ;;  %2949 = vmatpush.bf16.msra.mxu0 %v4849_v49  ;;  %v5621_v49 = vld [vmem:[%s8388_s9 + $0x174] sm:$0xf0]  ;;  %v4932_v35 = vld [vmem:[%s8388_s9] sm:$0xf] }
 0x291   :  { %v5117_v51 = vor.u32 %v5621_v49, %v5116_v48  ;;  %v4933_v46 = vor.u32 %v5575_v36, %v4932_v35  ;;  %v5586_v49 = vld [vmem:[%s8388_s9 + $0x64] sm:$0xf] }
 0x293   :  { %2911 = vmatpush.bf16.msrb.mxu1 %v4449_v52  ;;  %2924 = vmatpush.bf16.msrb.mxu2 %v4577_v27  ;;  %v5108_v27 = vld [vmem:[%s8388_s9 + $0x160] sm:$0xf] }
 0x294   :  { %2937 = vmatpush.bf16.msrb.mxu3 %v4705_v1  ;;  %2950 = vmatpush.bf16.msra.mxu0 %v4833_v62  ;;  %v2669_v45 = vpop.f32.mrf.mxu2  ;;  %v5619_v1 = vld [vmem:[%s8388_s9 + $0x164] sm:$0xf0]  ;;  %v4948_v62 = vld [vmem:[%s8388_s9 + $0x20] sm:$0xf] }
 0x295   :  { %v2682_v13 = vpop.f32.mrf.mxu3  ;;  %v5109_v32 = vor.u32 %v5619_v1, %v5108_v27  ;;  %v5084_v45 = vld [vmem:[%s8388_s9 + $0x130] sm:$0xf]  ;;  %v5609_v27 = vld [vmem:[%s8388_s9 + $0x114] sm:$0xf0] }
 0x296   :  { %v5613_v13 = vld [vmem:[%s8388_s9 + $0x134] sm:$0xf0] }
 0x297   :  { %2912 = vmatpush.bf16.msrb.mxu1 %v4433_v8  ;;  %2925 = vmatpush.bf16.msrb.mxu2 %v4561_v11  ;;  %v2706_v50 = vpop.f32.mrf.mxu1  ;;  %v5100_v8 = vld [vmem:[%s8388_s9 + $0x150] sm:$0xf] }
 0x298   :  { %2938 = vmatpush.bf16.msrb.mxu3 %v4689_v12  ;;  %2951 = vmatpush.bf16.msra.mxu0 %v4817_v19  ;;  %v5101_v12 = vor.u32 %v5617_v5, %v5100_v8  ;;  %v4949_v19 = vor.u32 %v5579_v63, %v4948_v62  ;;  %v5600_v62 = vld [vmem:[%s8388_s9 + $0xd4] sm:$0xf]  ;;  %v5069_v63 = vor.u32 %v5609_v27, %v5068_v60  ;;  %v5582_v8 = vld [vmem:[%s8388_s9 + $0x44] sm:$0xf]  ;;  %v4966_v5 = vld [vmem:[%s8388_s9 + $0x48] sm:$0xf0] }
 0x29a   :  { %2913 = vmatmul.bf16.vlgmr.msrb.gmra.mxu1 %v6920_v24  ;;  %2926 = vmatmul.bf16.vlgmr.msrb.gmra.mxu2 %v6922_v25  ;;  %v5601_v24 = vld [vmem:[%s8388_s9 + $0xd4] sm:$0xf0]  ;;  %v4964_v25 = vld [vmem:[%s8388_s9 + $0x40] sm:$0xf]  ;;  %v7965_v20 = vpop.f32.mrf.mxu0 }
 0x29b   :  { %3351 = vmatpush.bf16.msra.mxu1 %v4989_v21  ;;  %3364 = vmatpush.bf16.msra.mxu2 %v5053_v26  ;;  %v5037_v17 = vor.u32 %v5601_v24, %v5036_v42  ;;  %v2616_v21 = vadd.f32 %v7813_v16, %v2603_v9  ;;  %v4940_v26 = vld [vmem:[%s8388_s9 + $0x10] sm:$0xf]  ;;  %v5593_v16 = vld [vmem:[%s8388_s9 + $0x94] sm:$0xf0]  ;;  %v5588_v42 = vld [vmem:[%s8388_s9 + $0x74] sm:$0xf] }
 0x29c   :  { %2939 = vmatmul.bf16.vlgmr.msrb.gmra.mxu3 %v6924_v22  ;;  %2952 = vmatmul.bf16.vlgmr.msra.gmra.mxu0 %v6926_v28  ;;  %v5583_v22 = vld [vmem:[%s8388_s9 + $0x44] sm:$0xf0]  ;;  %v2668_v28 = vadd.f32 %v2667_v38, %v2655_v43  ;;  %v4941_v34 = vor.u32 %v5577_v29, %v4940_v26  ;;  %v5598_v9 = vld [vmem:[%s8388_s9 + $0xc4] sm:$0xf]  ;;  %v5110_v29 = vld [vmem:[%s8388_s9 + $0x168] sm:$0xf0] }
 0x29d   :  { %v4965_v54 = vor.u32 %v5583_v22, %v4964_v25  ;;  %3377 = vmatpush.bf16.msra.mxu3 %v5117_v51  ;;  %v2719_v3 = vpop.f32.mrf.mxu2  ;;  %v5054_v25 = vld [vmem:[%s8388_s9 + $0xf8] sm:$0xf0]  ;;  %v5085_v22 = vor.u32 %v5613_v13, %v5084_v45  ;;  %v5618_v26 = vld [vmem:[%s8388_s9 + $0x164] sm:$0xf] }
 0x29e   :  { %v2681_v52 = vadd.f32 %v2680_v23, %v2668_v28  ;;  %v5013_v23 = vor.u32 %v5595_v6, %v5012_v0  ;;  %v5038_v0 = vld [vmem:[%s8388_s9 + $0xd8] sm:$0xf0] }
 0x29f   :  { %3352 = vmatpush.bf16.msra.mxu1 %v4981_v15  ;;  %3365 = vmatpush.bf16.msra.mxu2 %v5045_v37  ;;  %v2708_v11 = vpop.f32.mrf.mxu1  ;;  %v2629_v15 = vadd.f32 %v7815_v18, %v2616_v21  ;;  %v5005_v37 = vor.u32 %v5593_v16, %v5004_v14  ;;  %v4990_v18 = vld [vmem:[%s8388_s9 + $0x78] sm:$0xf0]  ;;  %v5041_v6 = vor.u32 %v5600_v62, %v5038_v0 }
 0x2a0   :  { %v2694_v2 = vadd.f32 %v7883_v7, %v2681_v52  ;;  %v2732_v4 = vpop.f32.mrf.mxu3  ;;  %v4993_v48 = vor.u32 %v5588_v42, %v4990_v18  ;;  %v4958_v16 = vld [vmem:[%s8388_s9 + $0x38] sm:$0xf0]  ;;  %v5616_v42 = vld [vmem:[%s8388_s9 + $0x154] sm:$0xf] }
 0x2a1   :  { %3378 = vmatpush.bf16.msra.mxu3 %v5109_v32  ;;  %v2642_v28 = vadd.f32 %v7778_v61, %v2629_v15  ;;  %v5611_v61 = vld [vmem:[%s8388_s9 + $0x124] sm:$0xf0]  ;;  %v5578_v15 = vld [vmem:[%s8388_s9 + $0x24] sm:$0xf] }
 0x2a2   :  { %v2707_v7 = vadd.f32 %v2706_v50, %v2694_v2  ;;  %v2747_v38 = vpop.f32.mrf.mxu0  ;;  %v5060_v2 = vld [vmem:[%s8388_s9 + $0x100] sm:$0xf] }
 0x2a3   :  { %3353 = vmatpush.bf16.msra.mxu1 %v4973_v44  ;;  %3366 = vmatpush.bf16.msra.mxu2 %v5037_v17  ;;  %v5604_v17 = vld [vmem:[%s8388_s9 + $0xf4] sm:$0xf]  ;;  %v8076_v59 = vpack.c.bf16 %v2642_v28, %v2642_v28 }
 0x2a4   :  { %v2720_v58 = vadd.f32 %v2719_v3, %v2707_v7  ;;  %v5057_v51 = vor.u32 %v5604_v17, %v5054_v25  ;;  %v5607_v3 = vld [vmem:[%s8388_s9 + $0x104] sm:$0xf0]  ;;  %v5620_v7 = vld [vmem:[%s8388_s9 + $0x174] sm:$0xf]  ;;  %v5017_v17 = vor.u32 %v5594_v39, %v5014_v41 }
 0x2a5   :  { %3379 = vmatpush.bf16.msra.mxu3 %v5101_v12  ;;  %v2721_v43 = vpop.f32.mrf.mxu2  ;;  %v5061_v11 = vor.u32 %v5607_v3, %v5060_v2  ;;  %v5030_v12 = vld [vmem:[%s8388_s9 + $0xc8] sm:$0xf0]  ;;  %v5576_v25 = vld [vmem:[%s8388_s9 + $0x14] sm:$0xf]  ;;  %v5070_v3 = vld [vmem:[%s8388_s9 + $0x118] sm:$0xf0] }
 0x2a6   :  { %v2733_v24 = vadd.f32 %v2732_v4, %v2720_v58  ;;  %v5033_v14 = vor.u32 %v5598_v9, %v5030_v12  ;;  %v5580_v58 = vld [vmem:[%s8388_s9 + $0x34] sm:$0xf]  ;;  %v5180_v12 = vld [vmem:[%s8388_s9 + $0x1f0] sm:$0xf] }
 0x2a7   :  { %3354 = vmatpush.bf16.msra.mxu1 %v4965_v54  ;;  %3367 = vmatpush.bf16.msra.mxu2 %v5029_v55  ;;  %v4982_v54 = vld [vmem:[%s8388_s9 + $0x68] sm:$0xf0]  ;;  %v5076_v55 = vld [vmem:[%s8388_s9 + $0x120] sm:$0xf]  ;;  %v4961_v35 = vor.u32 %v5580_v58, %v4958_v16  ;;  %v5608_v2 = vld [vmem:[%s8388_s9 + $0x114] sm:$0xf] }
 0x2a8   :  { %v2734_v44 = vpop.f32.mrf.mxu3  ;;  %v2746_v50 = vadd.f32 %v7965_v20, %v2733_v24  ;;  %v5046_v20 = vld [vmem:[%s8388_s9 + $0xe8] sm:$0xf0]  ;;  %v5077_v57 = vor.u32 %v5611_v61, %v5076_v55  ;;  %v4985_v52 = vor.u32 %v5586_v49, %v4982_v54  ;;  %v5102_v24 = vld [vmem:[%s8388_s9 + $0x158] sm:$0xf0]  ;;  %v5574_v55 = vld [vmem:[%s8388_s9 + $0x4] sm:$0xf] }
 0x2a9   :  { %3380 = vmatpush.bf16.msra.mxu3 %v5093_v33  ;;  %v5049_v32 = vor.u32 %v5602_v56, %v5046_v20  ;;  %v5022_v33 = vld [vmem:[%s8388_s9 + $0xb8] sm:$0xf0]  ;;  %v5105_v18 = vor.u32 %v5616_v42, %v5102_v24  ;;  %v5094_v49 = vld [vmem:[%s8388_s9 + $0x148] sm:$0xf0]  ;;  %v5590_v56 = vld [vmem:[%s8388_s9 + $0x84] sm:$0xf] }
 0x2aa   :  { %v8084_v1 = vpack.c.bf16 %v2746_v50, %v2746_v50  ;;  %v5025_v36 = vor.u32 %v5596_v31, %v5022_v33  ;;  %v4934_v61 = vld [vmem:[%s8388_s9 + $0x8] sm:$0xf0]  ;;  %v5633_v58 = vld [vmem:[%s8388_s9 + $0x1d4] sm:$0xf0]  ;;  %v5148_v24 = vld [vmem:[%s8388_s9 + $0x1b0] sm:$0xf] }
 0x2ab   :  { %3355 = vmatpush.bf16.msra.mxu1 %v4957_v10  ;;  %3368 = vmatpush.bf16.msra.mxu2 %v5021_v53  ;;  %v5584_v10 = vld [vmem:[%s8388_s9 + $0x54] sm:$0xf]  ;;  %v4974_v53 = vld [vmem:[%s8388_s9 + $0x58] sm:$0xf0]  ;;  %v4998_v20 = vld [vmem:[%s8388_s9 + $0x88] sm:$0xf0]  ;;  %v4937_v62 = vor.u32 %v5574_v55, %v4934_v61 }
 0x2ac   :  { %v4977_v4 = vor.u32 %v5584_v10, %v4974_v53  ;;  %v5610_v10 = vld [vmem:[%s8388_s9 + $0x124] sm:$0xf]  ;;  %v5078_v53 = vld [vmem:[%s8388_s9 + $0x128] sm:$0xf0] }
 0x2ad   :  { %3381 = vmatpush.bf16.msra.mxu3 %v5085_v22  ;;  %v4942_v22 = vld [vmem:[%s8388_s9 + $0x18] sm:$0xf0]  ;;  %v5081_v0 = vor.u32 %v5610_v10, %v5078_v53  ;;  %v5634_v61 = vld [vmem:[%s8388_s9 + $0x1e4] sm:$0xf] }
 0x2af   :  { %3356 = vmatpush.bf16.msra.mxu1 %v4949_v19  ;;  %3369 = vmatpush.bf16.msra.mxu2 %v5013_v23  ;;  %v5118_v19 = vld [vmem:[%s8388_s9 + $0x178] sm:$0xf0]  ;;  %v4969_v23 = vor.u32 %v5582_v8, %v4966_v5  ;;  %v5606_v8 = vld [vmem:[%s8388_s9 + $0x104] sm:$0xf]  ;;  %v5062_v5 = vld [vmem:[%s8388_s9 + $0x108] sm:$0xf0] }
 0x2b0   :  { %v5121_v21 = vor.u32 %v5620_v7, %v5118_v19 }
 0x2b1   :  { %3382 = vmatpush.bf16.msra.mxu3 %v5077_v57  ;;  %v5612_v57 = vld [vmem:[%s8388_s9 + $0x134] sm:$0xf] }
 0x2b3   :  { %3357 = vmatpush.bf16.msra.mxu1 %v4941_v34  ;;  %3370 = vmatpush.bf16.msra.mxu2 %v5005_v37  ;;  %v5113_v34 = vor.u32 %v5618_v26, %v5110_v29  ;;  %v4950_v37 = vld [vmem:[%s8388_s9 + $0x28] sm:$0xf0] }
 0x2b4   :  { %v4953_v13 = vor.u32 %v5578_v15, %v4950_v37  ;;  %v5631_v15 = vld [vmem:[%s8388_s9 + $0x1c4] sm:$0xf0] }
 0x2b5   :  { %3383 = vmatpush.bf16.msra.mxu3 %v5069_v63  ;;  %v5001_v63 = vor.u32 %v5590_v56, %v4998_v20  ;;  %v5174_v56 = vld [vmem:[%s8388_s9 + $0x1e8] sm:$0xf0] }
 0x2b7   :  { %3358 = vmatpush.bf16.msra.mxu1 %v4933_v46  ;;  %3371 = vmatpush.bf16.msra.mxu2 %v4997_v40  ;;  %v8124_v38 = vpop.f32.mrf.mxu1  ;;  %v5592_v46 = vld [vmem:[%s8388_s9 + $0x94] sm:$0xf]  ;;  %v5006_v40 = vld [vmem:[%s8388_s9 + $0x98] sm:$0xf0] }
 0x2b8   :  { %v5009_v54 = vor.u32 %v5592_v46, %v5006_v40  ;;  %v5132_v46 = vld [vmem:[%s8388_s9 + $0x190] sm:$0xf] }
 0x2b9   :  { %3384 = vmatpush.bf16.msra.mxu3 %v5061_v11 }
 0x2ba   :  { %3359 = vmatmul.bf16.vlgmr.msra.gmra.mxu1 %v8076_v59  ;;  %3372 = vmatmul.bf16.vlgmr.msra.gmra.mxu2 %v8084_v1  ;;  %v8138_v30 = vpop.f32.mrf.mxu0 }
 0x2bb   :  { %3403 = vmatpush.bf16.msrb.mxu1 %v4993_v48  ;;  %3416 = vmatpush.bf16.msrb.mxu2 %v5057_v51  ;;  %v5614_v48 = vld [vmem:[%s8388_s9 + $0x144] sm:$0xf]  ;;  %v4945_v51 = vor.u32 %v5576_v25, %v4942_v22 }
 0x2bc   :  { %v5097_v50 = vor.u32 %v5614_v48, %v5094_v49  ;;  %v5124_v48 = vld [vmem:[%s8388_s9 + $0x180] sm:$0xf]  ;;  %v5623_v49 = vld [vmem:[%s8388_s9 + $0x184] sm:$0xf0] }
 0x2bd   :  { %3429 = vmatpush.bf16.msrb.mxu3 %v5121_v21  ;;  %v2771_v43 = vpop.f32.mrf.mxu2 }
 0x2bf   :  { %3404 = vmatpush.bf16.msrb.mxu1 %v4985_v52  ;;  %3417 = vmatpush.bf16.msrb.mxu2 %v5049_v32  ;;  %v2760_v45 = vpop.f32.mrf.mxu1  ;;  %v5086_v52 = vld [vmem:[%s8388_s9 + $0x138] sm:$0xf0] }
 0x2c0   :  { %v2784_v44 = vpop.f32.mrf.mxu3  ;;  %v5089_v32 = vor.u32 %v5612_v57, %v5086_v52  ;;  %v5177_v57 = vor.u32 %v5634_v61, %v5174_v56  ;;  %v5653_v61 = vld [vmem:[%s8390_s11 + $0x78] sm:$0xff]  ;;  %v5644_v56 = vld [vmem:[%s8390_s11 + $0x30] sm:$0xff] }
 0x2c1   :  { %3430 = vmatpush.bf16.msrb.mxu3 %v5113_v34 }
 0x2c2   :  { %v2799_v28 = vpop.f32.mrf.mxu0 }
 0x2c3   :  { %3405 = vmatpush.bf16.msrb.mxu1 %v4977_v4  ;;  %3418 = vmatpush.bf16.msrb.mxu2 %v5041_v6  ;;  %v1255_v4 = vperm.slane %v7547_v47, 2  ;;  %v5073_v6 = vor.u32 %v5608_v2, %v5070_v3  ;;  %v5065_v47 = vor.u32 %v5606_v8, %v5062_v5  ;;  %v5625_v28 = vld [vmem:[%s8388_s9 + $0x194] sm:$0xf0]  ;;  %v5626_v5 = vld [vmem:[%s8388_s9 + $0x1a4] sm:$0xf] }
 0x2c4   :  { %v5133_v40 = vor.u32 %v5625_v28, %v5132_v46 }
 0x2c5   :  { %3431 = vmatpush.bf16.msrb.mxu3 %v5105_v18  ;;  %v2773_v60 = vpop.f32.mrf.mxu2  ;;  %v2759_v9 = vadd.f32 %v8124_v38, %v1255_v4  ;;  %v5635_v38 = vld [vmem:[%s8388_s9 + $0x1e4] sm:$0xf0]  ;;  %v5628_v4 = vld [vmem:[%s8388_s9 + $0x1b4] sm:$0xf] }
 0x2c6   :  { %v5632_v60 = vld [vmem:[%s8388_s9 + $0x1d4] sm:$0xf] }
 0x2c7   :  { %3406 = vmatpush.bf16.msrb.mxu1 %v4969_v23  ;;  %3419 = vmatpush.bf16.msrb.mxu2 %v5033_v14  ;;  %v2772_v11 = vadd.f32 %v2771_v43, %v2759_v9  ;;  %v5164_v14 = vld [vmem:[%s8388_s9 + $0x1d0] sm:$0xf]  ;;  %v5629_v43 = vld [vmem:[%s8388_s9 + $0x1b4] sm:$0xf0]  ;;  %v5142_v9 = vld [vmem:[%s8388_s9 + $0x1a8] sm:$0xf0] }
 0x2c8   :  { %v2786_v27 = vpop.f32.mrf.mxu3  ;;  %v5165_v31 = vor.u32 %v5633_v58, %v5164_v14  ;;  %v5149_v45 = vor.u32 %v5629_v43, %v5148_v24 }
 0x2c9   :  { %3432 = vmatpush.bf16.msrb.mxu3 %v5097_v50  ;;  %v2785_v19 = vadd.f32 %v2784_v44, %v2772_v11  ;;  %v5140_v44 = vld [vmem:[%s8388_s9 + $0x1a0] sm:$0xf]  ;;  %v5125_v50 = vor.u32 %v5623_v49, %v5124_v48  ;;  %v5166_v27 = vld [vmem:[%s8388_s9 + $0x1d8] sm:$0xf0] }
 0x2cb   :  { %3407 = vmatpush.bf16.msrb.mxu1 %v4961_v35  ;;  %3420 = vmatpush.bf16.msrb.mxu2 %v5025_v36  ;;  %v2798_v29 = vadd.f32 %v8138_v30, %v2785_v19  ;;  %v5156_v30 = vld [vmem:[%s8388_s9 + $0x1c0] sm:$0xf] }
 0x2cc   :  { %v5157_v37 = vor.u32 %v5631_v15, %v5156_v30  ;;  %v5670_v19 = vld [vmem:[%s8387_s8] sm:$0xf] }
 0x2cd   :  { %3433 = vmatpush.bf16.msrb.mxu3 %v5089_v32  ;;  %v5169_v32 = vor.u32 %v5632_v60, %v5166_v27  ;;  %v5642_v27 = vld [vmem:[%s8390_s11 + $0x20] sm:$0xff] }
 0x2cf   :  { %3408 = vmatpush.bf16.msrb.mxu1 %v4953_v13  ;;  %3421 = vmatpush.bf16.msrb.mxu2 %v5017_v17  ;;  %v5627_v13 = vld [vmem:[%s8388_s9 + $0x1a4] sm:$0xf0] }
 0x2d0   :  { %v5141_v22 = vor.u32 %v5627_v13, %v5140_v44  ;;  %v3025_v44 = vld [vmem:[%s8389_s10] sm:$0x3] }
 0x2d1   :  { %3434 = vmatpush.bf16.msrb.mxu3 %v5081_v0  ;;  %v5158_v0 = vld [vmem:[%s8388_s9 + $0x1c8] sm:$0xf0] }
 0x2d3   :  { %3409 = vmatpush.bf16.msrb.mxu1 %v4945_v51  ;;  %3422 = vmatpush.bf16.msrb.mxu2 %v5009_v54  ;;  %v5636_v51 = vld [vmem:[%s8388_s9 + $0x1f4] sm:$0xf]  ;;  %v5182_v54 = vld [vmem:[%s8388_s9 + $0x1f8] sm:$0xf0] }
 0x2d4   :  { %v5185_v55 = vor.u32 %v5636_v51, %v5182_v54 }
 0x2d5   :  { %3435 = vmatpush.bf16.msrb.mxu3 %v5073_v6  ;;  %v5150_v6 = vld [vmem:[%s8388_s9 + $0x1b8] sm:$0xf0] }
 0x2d6   :  { %v5153_v8 = vor.u32 %v5628_v4, %v5150_v6  ;;  %v5649_v4 = vld [vmem:[%s8390_s11 + $0x58] sm:$0xff]  ;;  %v5648_v6 = vld [vmem:[%s8390_s11 + $0x50] sm:$0xff] }
 0x2d7   :  { %3410 = vmatpush.bf16.msrb.mxu1 %v4937_v62  ;;  %3423 = vmatpush.bf16.msrb.mxu2 %v5001_v63  ;;  %v2810_v21 = vpop.f32.mrf.mxu1  ;;  %v5630_v63 = vld [vmem:[%s8388_s9 + $0x1c4] sm:$0xf] }
 0x2d8   :  { %v2811_v16 = vadd.f32 %v2810_v21, %v2798_v29  ;;  %v5161_v2 = vor.u32 %v5630_v63, %v5158_v0  ;;  %v1256_v21 = vperm.slane %v5670_v19, 3  ;;  %v5638_v0 = vld [vmem:[%s8390_s11] sm:$0xff] }
 0x2d9   :  { %3436 = vmatpush.bf16.msrb.mxu3 %v5065_v47 }
 0x2da   :  { %3411 = vmatmul.bf16.vlgmr.msrb.gmra.mxu1 %v8076_v59  ;;  %3424 = vmatmul.bf16.vlgmr.msrb.gmra.mxu2 %v8084_v1  ;;  %v5637_v59 = vld [vmem:[%s8388_s9 + $0x1f4] sm:$0xf0]  ;;  %v5172_v1 = vld [vmem:[%s8388_s9 + $0x1e0] sm:$0xf]  ;;  %v2849_v26 = vpop.f32.mrf.mxu0 }
 0x2db   :  { %v5181_v7 = vor.u32 %v5637_v59, %v5180_v12  ;;  %v5173_v23 = vor.u32 %v5635_v38, %v5172_v1  ;;  %v5145_v12 = vor.u32 %v5626_v5, %v5142_v9  ;;  %v5624_v59 = vld [vmem:[%s8388_s9 + $0x194] sm:$0xf]  ;;  %v5622_v38 = vld [vmem:[%s8388_s9 + $0x184] sm:$0xf]  ;;  %3602 = vmatpush.bf16.msra.mxu2 %v5653_v61 }
 0x2dc   :  { %v5646_v5 = vld [vmem:[%s8390_s11 + $0x40] sm:$0xff] }
 0x2dd   :  { %3390 = vmatpush.bf16.msrb.mxu0 %v5181_v7  ;;  %v2823_v33 = vpop.f32.mrf.mxu2  ;;  %v5134_v7 = vld [vmem:[%s8388_s9 + $0x198] sm:$0xf0] }
 0x2de   :  { %v2824_v35 = vadd.f32 %v2823_v33, %v2811_v16  ;;  %v5137_v1 = vor.u32 %v5624_v59, %v5134_v7 }
 0x2df   :  { %v2812_v36 = vpop.f32.mrf.mxu1 }
 0x2e0   :  { %v2836_v34 = vpop.f32.mrf.mxu3 }
 0x2e1   :  { %3391 = vmatpush.bf16.msrb.mxu0 %v5173_v23  ;;  %v2837_v39 = vadd.f32 %v2836_v34, %v2824_v35  ;;  %v5126_v23 = vld [vmem:[%s8388_s9 + $0x188] sm:$0xf0] }
 0x2e2   :  { %v2851_v41 = vpop.f32.mrf.mxu0  ;;  %v5129_v29 = vor.u32 %v5622_v38, %v5126_v23 }
 0x2e3   :  { %v2850_v42 = vadd.f32 %v2849_v26, %v2837_v39 }
 0x2e5   :  { %3392 = vmatpush.bf16.msrb.mxu0 %v5165_v31  ;;  %v2959_v18 = vpack.c.bf16 %v2850_v42, %v2850_v42  ;;  %v2825_v17 = vpop.f32.mrf.mxu2 }
 0x2e7   :  { %3385 = vmatmul.bf16.vlgmr.msra.gmra.mxu3 %v2959_v18 }
 0x2e8   :  { %v2838_v25 = vpop.f32.mrf.mxu3 }
 0x2e9   :  { %3393 = vmatpush.bf16.msrb.mxu0 %v5157_v37 }
 0x2ed   :  { %3394 = vmatpush.bf16.msrb.mxu0 %v5149_v45  ;;  %v3027_v45 = vperm.slane %v3025_v44, 0 }
 0x2f1   :  { %3395 = vmatpush.bf16.msrb.mxu0 %v5141_v22 }
 0x2f5   :  { %3396 = vmatpush.bf16.msrb.mxu0 %v5133_v40  ;;  %v3028_v40 = vperm.slane %v3025_v44, 1 }
 0x2f7   :  { %v2862_v20 = vpop.f32.mrf.mxu1  ;;  %3437 = vmatmul.bf16.vlgmr.msrb.gmra.mxu3 %v2959_v18 }
 0x2f8   :  { %v2863_v26 = vadd.f32 %v2862_v20, %v1256_v21  ;;  %v5652_v20 = vld [vmem:[%s8390_s11 + $0x70] sm:$0xff] }
 0x2f9   :  { %3397 = vmatpush.bf16.msrb.mxu0 %v5125_v50  ;;  %3603 = vmatpush.bf16.msra.mxu2 %v5652_v20 }
 0x2fa   :  { %v2901_v52 = vpop.f32.mrf.mxu0 }
 0x2fd   :  { %3442 = vmatpush.bf16.msra.mxu0 %v5185_v55  ;;  %v2875_v10 = vpop.f32.mrf.mxu2  ;;  %v5645_v55 = vld [vmem:[%s8390_s11 + $0x38] sm:$0xff] }
 0x2fe   :  { %v2876_v14 = vadd.f32 %v2875_v10, %v2863_v26  ;;  %3589 = vmatpush.bf16.msra.mxu1 %v5645_v55 }
 0x2ff   :  { %v2864_v62 = vpop.f32.mrf.mxu1 }
 0x300   :  { %v2888_v53 = vpop.f32.mrf.mxu3  ;;  %v5639_v62 = vld [vmem:[%s8390_s11 + $0x8] sm:$0xff] }
 0x301   :  { %3443 = vmatpush.bf16.msra.mxu0 %v5177_v57  ;;  %v2889_v58 = vadd.f32 %v2888_v53, %v2876_v14  ;;  %v5643_v57 = vld [vmem:[%s8390_s11 + $0x28] sm:$0xff]  ;;  %v5640_v53 = vld [vmem:[%s8390_s11 + $0x10] sm:$0xff] }
 0x302   :  { %v2903_v3 = vpop.f32.mrf.mxu0  ;;  %3590 = vmatpush.bf16.msra.mxu1 %v5644_v56 }
 0x303   :  { %v2902_v33 = vadd.f32 %v2901_v52, %v2889_v58  ;;  %v5651_v52 = vld [vmem:[%s8390_s11 + $0x68] sm:$0xff] }
 0x304   :  { %3604 = vmatpush.bf16.msra.mxu2 %v5651_v52 }
 0x305   :  { %3444 = vmatpush.bf16.msra.mxu0 %v5169_v32  ;;  %v2877_v11 = vpop.f32.mrf.mxu2  ;;  %v5641_v32 = vld [vmem:[%s8390_s11 + $0x18] sm:$0xff] }
 0x306   :  { %3591 = vmatpush.bf16.msra.mxu1 %v5643_v57 }
 0x308   :  { %v2890_v47 = vpop.f32.mrf.mxu3 }
 0x309   :  { %3445 = vmatpush.bf16.msra.mxu0 %v5161_v2  ;;  %v5650_v2 = vld [vmem:[%s8390_s11 + $0x60] sm:$0xff] }
 0x30a   :  { %3592 = vmatpush.bf16.msra.mxu1 %v5642_v27  ;;  %3605 = vmatpush.bf16.msra.mxu2 %v5650_v2 }
 0x30d   :  { %3446 = vmatpush.bf16.msra.mxu0 %v5153_v8  ;;  %v5647_v8 = vld [vmem:[%s8390_s11 + $0x48] sm:$0xff]  ;;  %s5700_s11 = smov [#allocation3]  }
 0x30e   :  { %3593 = vmatpush.bf16.msra.mxu1 %v5641_v32  ;;  %3606 = vmatpush.bf16.msra.mxu2 %v5649_v4  ;;  %s3621_s25 = sshll.u32 %s5700_s11, 4  ;;  %s3622_s25 = int_to_ptr.vmem [resolvable:$true] %s3621_s25 }
 0x311   :  { %3447 = vmatpush.bf16.msra.mxu0 %v5145_v12 }
 0x312   :  { %3594 = vmatpush.bf16.msra.mxu1 %v5640_v53  ;;  %3607 = vmatpush.bf16.msra.mxu2 %v5648_v6 }
 0x315   :  { %3448 = vmatpush.bf16.msra.mxu0 %v5137_v1 }
 0x316   :  { %3595 = vmatpush.bf16.msra.mxu1 %v5639_v62  ;;  %3608 = vmatpush.bf16.msra.mxu2 %v5647_v8 }
 0x317   :  { %v2914_v16 = vpop.f32.mrf.mxu1 }
 0x318   :  { %v2915_v34 = vadd.f32 %v2914_v16, %v2902_v33 }
 0x319   :  { %3449 = vmatpush.bf16.msra.mxu0 %v5129_v29  ;;  %v2953_v31 = vpop.f32.mrf.mxu0  ;;  %v5669_v29 = vld [vmem:[%s8391_s12] ss:$0 sm:$0xff] }
 0x31a   :  { %3596 = vmatpush.bf16.msra.mxu1 %v5638_v0  ;;  %3609 = vmatpush.bf16.msra.mxu2 %v5646_v5 }
 0x31d   :  { %v2927_v35 = vpop.f32.mrf.mxu2 }
 0x31e   :  { %v2928_v30 = vadd.f32 %v2927_v35, %v2915_v34 }
 0x31f   :  { %v2940_v36 = vpop.f32.mrf.mxu3  ;;  %v2916_v15 = vpop.f32.mrf.mxu1 }
 0x320   :  { %v2941_v37 = vadd.f32 %v2940_v36, %v2928_v30 }
 0x321   :  { %v2955_v39 = vpop.f32.mrf.mxu0 }
 0x322   :  { %v2954_v41 = vadd.f32 %v2953_v31, %v2941_v37 }
 0x324   :  { %v2960_v42 = vpack.c.bf16 %v2954_v41, %v2954_v41 }
 0x325   :  { %v2929_v24 = vpop.f32.mrf.mxu2 }
 0x326   :  { %3398 = vmatmul.bf16.vlgmr.msrb.gmra.mxu0 %v2960_v42 }
 0x327   :  { %v2942_v43 = vpop.f32.mrf.mxu3 }
 0x336   :  { %3450 = vmatmul.bf16.vlgmr.msra.gmra.mxu0 %v2960_v42 }
 0x337   :  { %v3360_v18 = vpop.f32.mrf.mxu1 }
 0x338   :  { %v3361_v13 = vadd.f32 %v3360_v18, %v3027_v45 }
 0x33d   :  { %v3373_v17 = vpop.f32.mrf.mxu2 }
 0x33e   :  { %v3374_v25 = vadd.f32 %v3373_v17, %v3361_v13 }
 0x33f   :  { %v3362_v22 = vpop.f32.mrf.mxu1 }
 0x345   :  { %v3375_v46 = vpop.f32.mrf.mxu2 }
 0x357   :  { %v3412_v28 = vpop.f32.mrf.mxu1 }
 0x358   :  { %v3413_v48 = vadd.f32 %v3412_v28, %v3028_v40 }
 0x35d   :  { %v3425_v49 = vpop.f32.mrf.mxu2 }
 0x35e   :  { %v3426_v50 = vadd.f32 %v3425_v49, %v3413_v48 }
 0x35f   :  { %v3414_v51 = vpop.f32.mrf.mxu1 }
 0x365   :  { %v3427_v54 = vpop.f32.mrf.mxu2 }
 0x36a   :  { %v3386_v60 = vpop.f32.mrf.mxu3 }
 0x36b   :  { %v3387_v9 = vadd.f32 %v3386_v60, %v3374_v25 }
 0x372   :  { %v3388_v10 = vpop.f32.mrf.mxu3 }
 0x37a   :  { %v3438_v63 = vpop.f32.mrf.mxu3 }
 0x37b   :  { %v3439_v7 = vadd.f32 %v3438_v63, %v3426_v50 }
 0x382   :  { %v3440_v3 = vpop.f32.mrf.mxu3 }
 0x3a3   :  { %v3399_v11 = vpop.f32.mrf.mxu0 }
 0x3a4   :  { %v3400_v47 = vadd.f32 %v3399_v11, %v3387_v9 }
 0x3a6   :  { %v3455_v12 = vpack.c.bf16 %v3400_v47, %v3400_v47 }
 0x3a8   :  { %3597 = vmatmul.bf16.vlgmr.msra.gmra.mxu1 %v3455_v12 }
 0x3ab   :  { %v3401_v59 = vpop.f32.mrf.mxu0 }
 0x3b3   :  { %v3451_v19 = vpop.f32.mrf.mxu0 }
 0x3b4   :  { %v3452_v21 = vadd.f32 %v3451_v19, %v3439_v7 }
 0x3b6   :  { %v3456_v1 = vpack.c.bf16 %v3452_v21, %v3452_v21 }
 0x3b8   :  { %3610 = vmatmul.bf16.vlgmr.msra.gmra.mxu2 %v3456_v1 }
 0x3bb   :  { %v3453_v38 = vpop.f32.mrf.mxu0 }
 0x425   :  { %v3598_v23 = vpop.f32.mrf.mxu1 }
 0x426   :  { %v3599_v14 = vadd.f32 %v5669_v29, %v3598_v23 }
 0x42d   :  { %v3600_v26 = vpop.f32.mrf.mxu1 }
 0x43b   :  { %v3611_v58 = vpop.f32.mrf.mxu2 }
 0x43c   :  { %v3612_v16 = vadd.f32 %v3611_v58, %v3599_v14 }
 0x43e   :  { %3615 = vst [vmem:[#allocation3] sm:$0x3] %v3612_v16 }
 0x43f   :  { %3626 = dma.vmem_to_hbm [thread:$0]  %s3622_s25, 32, %s3624_s27, [#allocation4]  }
 0x443   :  { %v3613_v31 = vpop.f32.mrf.mxu2 }
 0x444   :  { %5695 = dma.done.wait [#allocation4], 32  }
 0x445   :  { %5696 = vsyncadd [#allocation4], 4294967264 }
 0x446   :  { %3631 = vsyncpa [#allocation4], 1 }

</bundles_post_ra>
